<compile_context>
chip_gen: v7x
topology: tpu7x:2x2x1
jax: 0.10.0
libtpu: 0.0.40
codegen_flags: <defaults>
</compile_context>

<pallas_src>
import jax
import jax.numpy as jnp
from jax import lax
from jax.experimental import pallas as pl
from jax.experimental.pallas import tpu as pltpu

INPUT_SIZE = 3
HIDDEN_SIZE = 256
OUTPUT_SIZE = 1
NUM_LAYERS = 8              # 1 input layer + (NUM_LAYERS-1) hidden layers + 1 output layer
NUM_HIDDEN = NUM_LAYERS - 1


def _round_up(a, b):
    return -(-a // b) * b


def _choose_tile(n, tile_n):
    """Pick a lane-aligned batch tile; keep >=2 grid steps when N allows (v7x 2-TC)."""
    tile_n = max(128, _round_up(tile_n, 128))
    n128 = _round_up(n, 128)
    tile = min(tile_n, n128)
    if n128 // tile < 2 and n128 >= 256:
        tile = max(128, _round_up(n128 // 2, 128))
    return tile


def ffnn_kernel(xt_ref, w0_ref, b0_ref, wh_ref, bh_ref, wo_ref, bo_ref, o_ref):
    # ---- Layer 0: Linear(3 -> 256) + ReLU, on the VPU (K=3 would waste an MXU pass)
    xt = xt_ref[...]                    # (3, tile)  batch on lanes
    w0 = w0_ref[...]                    # (256, 3)   PyTorch (out, in) layout
    h = (w0[:, 0:1] * xt[0:1, :]
         + w0[:, 1:2] * xt[1:2, :]
         + w0[:, 2:3] * xt[2:3, :]
         + b0_ref[...])                 # (256, tile)
    h = jnp.maximum(h, 0.0)

    cdt = wh_ref.dtype                  # compute dtype of the 256x256 layers (f32 or bf16)

    # ---- 7x hidden layers: Linear(256 -> 256) + ReLU on the MXU, f32 accumulation.
    def layer(i, h):
        w = wh_ref[i]                   # (256, 256)
        b = bh_ref[i]                   # (256, 1)
        y = jnp.dot(w, h.astype(cdt), preferred_element_type=jnp.float32)
        return jnp.maximum(y + b, 0.0)

    h = lax.fori_loop(0, NUM_HIDDEN, layer, h, unroll=True)

    # ---- Output layer: Linear(256 -> 1) as broadcast-mul + sublane reduction.
    # Result is (1, tile): lane-dense, unmasked store.
    out = jnp.sum(h * wo_ref[...], axis=0, keepdims=True) + bo_ref[...]
    o_ref[...] = out.astype(o_ref.dtype)


def ffnn_forward(x, params, *, tile_n=512, compute_dtype=jnp.float32):
    """x: (N, 3) float32 -> (N, 1) float32."""
    w0, b0, wh, bh, wo, bo = params
    N = x.shape[0]

    tile = _choose_tile(N, tile_n)
    n_pad = _round_up(N, tile)
    grid = (n_pad // tile,)

    # Zero-pad the batch and transpose to feature-major (3, N_pad).
    x_pad = jnp.pad(x.astype(jnp.float32), ((0, n_pad - N), (0, 0)))
    xt = x_pad.T

    # Only the big 256x256 weights go to the (optionally reduced) compute dtype.
    wh_c = wh.astype(compute_dtype)

    out = pl.pallas_call(
        ffnn_kernel,
        out_shape=jax.ShapeDtypeStruct((1, n_pad), jnp.float32),
        grid_spec=pltpu.PrefetchScalarGridSpec(
            num_scalar_prefetch=0,
            grid=grid,
            in_specs=[
                pl.BlockSpec((INPUT_SIZE, tile), lambda i: (0, i)),                 # x^T tile
                pl.BlockSpec((HIDDEN_SIZE, INPUT_SIZE), lambda i: (0, 0)),          # W0 (256,3)
                pl.BlockSpec((HIDDEN_SIZE, 1), lambda i: (0, 0)),                   # b0 (256,1)
                pl.BlockSpec((NUM_HIDDEN, HIDDEN_SIZE, HIDDEN_SIZE),
                             lambda i: (0, 0, 0)),                                  # hidden Ws
                pl.BlockSpec((NUM_HIDDEN, HIDDEN_SIZE, 1), lambda i: (0, 0, 0)),    # hidden bs
                pl.BlockSpec((HIDDEN_SIZE, 1), lambda i: (0, 0)),                   # Wout^T (256,1)
                pl.BlockSpec((1, 1), lambda i: (0, 0)),                             # bout (1,1)
            ],
            out_specs=pl.BlockSpec((1, tile), lambda i: (0, i)),                    # lane-dense out
        ),
        compiler_params=pltpu.CompilerParams(
            dimension_semantics=("parallel",)),
    )(xt, w0, b0, wh_c, bh, wo, bo)

    return out.reshape(n_pad, 1)[:N]


def init_params(key):
    """PyTorch nn.Linear-style init U(-1/sqrt(fan_in), 1/sqrt(fan_in)).
    Weights kept in (out, in) layout; biases as (out, 1) columns."""
    ks = jax.random.split(key, 2 * (NUM_LAYERS + 1))

    def linear_init(kw, kb, fan_in, fan_out):
        bound = 1.0 / (fan_in ** 0.5)
        w = jax.random.uniform(kw, (fan_out, fan_in), jnp.float32, -bound, bound)
        b = jax.random.uniform(kb, (fan_out, 1), jnp.float32, -bound, bound)
        return w, b

    w0, b0 = linear_init(ks[0], ks[1], INPUT_SIZE, HIDDEN_SIZE)

    wh_list, bh_list = [], []
    for l in range(NUM_HIDDEN):
        w, b = linear_init(ks[2 + 2 * l], ks[3 + 2 * l], HIDDEN_SIZE, HIDDEN_SIZE)
        wh_list.append(w)
        bh_list.append(b)
    wh = jnp.stack(wh_list, axis=0)     # (7, 256, 256)
    bh = jnp.stack(bh_list, axis=0)     # (7, 256, 1)

    wo_t, bo = linear_init(ks[2 + 2 * NUM_HIDDEN], ks[3 + 2 * NUM_HIDDEN],
                           HIDDEN_SIZE, OUTPUT_SIZE)   # (1, 256), (1, 1)
    wo = wo_t.T                                        # (256, 1)
    return (w0, b0, wh, bh, wo, bo)


def ffnn_reference(x, params):
    w0, b0, wh, bh, wo, bo = params
    hp = lax.Precision.HIGHEST
    h = jnp.maximum(jnp.dot(x, w0.T, precision=hp) + b0[:, 0][None, :], 0.0)
    for l in range(NUM_HIDDEN):
        h = jnp.maximum(jnp.dot(h, wh[l].T, precision=hp) + bh[l, :, 0][None, :], 0.0)
    return jnp.dot(h, wo, precision=hp) + bo


if __name__ == "__main__":
    key = jax.random.PRNGKey(0)
    kp, kx = jax.random.split(key)
    params = init_params(kp)

    # Small batch of 3-D points (samples from the [-1.5, 1.5]^3 domain).
    # N=200 exercises batch padding and the 2-step grid path.
    N = 200
    x = jax.random.uniform(kx, (N, INPUT_SIZE), jnp.float32, -1.5, 1.5)

    ref = ffnn_reference(x, params)

    # f32 path
    out = jax.block_until_ready(ffnn_forward(x, params))
    assert out.shape == (N, OUTPUT_SIZE)
    assert bool(jnp.all(jnp.isfinite(out)))
    assert jnp.allclose(out, ref, atol=1e-3, rtol=1e-2), "f32 kernel mismatch vs reference"

    # bf16 hidden-weight path (v6e/v7x fast MXU path), f32 accumulation
    out_bf16 = jax.block_until_ready(
        ffnn_forward(x, params, compute_dtype=jnp.bfloat16))
    assert out_bf16.shape == (N, OUTPUT_SIZE)
    assert bool(jnp.all(jnp.isfinite(out_bf16)))
    assert jnp.allclose(out_bf16, ref, atol=3e-2, rtol=1e-1), "bf16 kernel mismatch vs reference"

    print("KERNEL_OK")
</pallas_src>

<mosaic_0001>
module attributes {stable_mosaic.version = 11 : i64} {
  func.func @ffnn_kernel(%arg0: i32, %arg1: memref<3x128xf32, #tpu.memory_space<vmem>>, %arg2: memref<256x3xf32, #tpu.memory_space<vmem>>, %arg3: memref<256x1xf32, #tpu.memory_space<vmem>>, %arg4: memref<7x256x256xf32, #tpu.memory_space<vmem>>, %arg5: memref<7x256x1xf32, #tpu.memory_space<vmem>>, %arg6: memref<256x1xf32, #tpu.memory_space<vmem>>, %arg7: memref<1x1xf32, #tpu.memory_space<vmem>>, %arg8: memref<1x128xf32, #tpu.memory_space<vmem>>) attributes {dimension_semantics = [#tpu.dimension_semantics<parallel>], iteration_bounds = array<i64: 2>, scalar_prefetch = 0 : i64, scratch_operands = 0 : i64, tpu.core_type = #tpu.core_type<tc>, window_params = [{transform_indices = @transform_0, window_bounds = array<i64: 3, 128>}, {pipeline_mode = #tpu.pipeline_mode<synchronous>, transform_indices = @transform_1, window_bounds = array<i64: 256, 3>}, {pipeline_mode = #tpu.pipeline_mode<synchronous>, transform_indices = @transform_2, window_bounds = array<i64: 256, 1>}, {pipeline_mode = #tpu.pipeline_mode<synchronous>, transform_indices = @transform_3, window_bounds = array<i64: 7, 256, 256>}, {pipeline_mode = #tpu.pipeline_mode<synchronous>, transform_indices = @transform_4, window_bounds = array<i64: 7, 256, 1>}, {pipeline_mode = #tpu.pipeline_mode<synchronous>, transform_indices = @transform_5, window_bounds = array<i64: 256, 1>}, {pipeline_mode = #tpu.pipeline_mode<synchronous>, transform_indices = @transform_6, window_bounds = array<i64: 1, 1>}, {transform_indices = @transform_7, window_bounds = array<i64: 1, 128>}]} {
    %c0 = arith.constant 0 : index
    %c0_0 = arith.constant 0 : index
    %0 = vector.load %arg1[%c0, %c0_0] : memref<3x128xf32, #tpu.memory_space<vmem>>, vector<3x128xf32>
    %c0_1 = arith.constant 0 : index
    %c0_2 = arith.constant 0 : index
    %1 = vector.load %arg2[%c0_1, %c0_2] : memref<256x3xf32, #tpu.memory_space<vmem>>, vector<256x3xf32>
    %2 = vector.extract_strided_slice %1 {offsets = [0, 0], sizes = [256, 1], strides = [1, 1]} : vector<256x3xf32> to vector<256x1xf32>
    %3 = vector.extract_strided_slice %0 {offsets = [0, 0], sizes = [1, 128], strides = [1, 1]} : vector<3x128xf32> to vector<1x128xf32>
    %4 = vector.broadcast %2 : vector<256x1xf32> to vector<256x128xf32>
    %5 = vector.broadcast %3 : vector<1x128xf32> to vector<256x128xf32>
    %6 = arith.mulf %4, %5 : vector<256x128xf32>
    %7 = vector.extract_strided_slice %1 {offsets = [0, 1], sizes = [256, 1], strides = [1, 1]} : vector<256x3xf32> to vector<256x1xf32>
    %8 = vector.extract_strided_slice %0 {offsets = [1, 0], sizes = [1, 128], strides = [1, 1]} : vector<3x128xf32> to vector<1x128xf32>
    %9 = vector.broadcast %7 : vector<256x1xf32> to vector<256x128xf32>
    %10 = vector.broadcast %8 : vector<1x128xf32> to vector<256x128xf32>
    %11 = arith.mulf %9, %10 : vector<256x128xf32>
    %12 = arith.addf %6, %11 : vector<256x128xf32>
    %13 = vector.extract_strided_slice %1 {offsets = [0, 2], sizes = [256, 1], strides = [1, 1]} : vector<256x3xf32> to vector<256x1xf32>
    %14 = vector.extract_strided_slice %0 {offsets = [2, 0], sizes = [1, 128], strides = [1, 1]} : vector<3x128xf32> to vector<1x128xf32>
    %15 = vector.broadcast %13 : vector<256x1xf32> to vector<256x128xf32>
    %16 = vector.broadcast %14 : vector<1x128xf32> to vector<256x128xf32>
    %17 = arith.mulf %15, %16 : vector<256x128xf32>
    %18 = arith.addf %12, %17 : vector<256x128xf32>
    %c0_3 = arith.constant 0 : index
    %c0_4 = arith.constant 0 : index
    %19 = vector.load %arg3[%c0_3, %c0_4] : memref<256x1xf32, #tpu.memory_space<vmem>>, vector<256x1xf32>
    %20 = vector.broadcast %19 : vector<256x1xf32> to vector<256x128xf32>
    %21 = arith.addf %18, %20 : vector<256x128xf32>
    %cst = arith.constant 0.000000e+00 : f32
    %22 = vector.broadcast %cst : f32 to vector<256x128xf32>
    %23 = arith.maximumf %21, %22 : vector<256x128xf32>
    %c0_i32 = arith.constant 0 : i32
    %24 = arith.index_cast %c0_i32 : i32 to index
    %c0_5 = arith.constant 0 : index
    %c0_6 = arith.constant 0 : index
    %25 = vector.load %arg4[%24, %c0_5, %c0_6] : memref<7x256x256xf32, #tpu.memory_space<vmem>>, vector<1x256x256xf32>
    %26 = vector.shape_cast %25 : vector<1x256x256xf32> to vector<256x256xf32>
    %27 = arith.index_cast %c0_i32 : i32 to index
    %c0_7 = arith.constant 0 : index
    %c0_8 = arith.constant 0 : index
    %28 = vector.load %arg5[%27, %c0_7, %c0_8] : memref<7x256x1xf32, #tpu.memory_space<vmem>>, vector<1x256x1xf32>
    %29 = vector.shape_cast %28 : vector<1x256x1xf32> to vector<256x1xf32>
    %cst_9 = arith.constant dense<0.000000e+00> : vector<256x128xf32>
    %30 = tpu.matmul %26, %23, %cst_9 {dimension_numbers = #tpu.dot_dimension_numbers<[1], [0], [0], [1], [0, 0, 1, 1], [], []>} : vector<256x256xf32>, vector<256x128xf32>, vector<256x128xf32> -> vector<256x128xf32>
    %31 = vector.broadcast %29 : vector<256x1xf32> to vector<256x128xf32>
    %32 = arith.addf %30, %31 : vector<256x128xf32>
    %cst_10 = arith.constant 0.000000e+00 : f32
    %33 = vector.broadcast %cst_10 : f32 to vector<256x128xf32>
    %34 = arith.maximumf %32, %33 : vector<256x128xf32>
    %c1_i32 = arith.constant 1 : i32
    %35 = arith.index_cast %c1_i32 : i32 to index
    %c0_11 = arith.constant 0 : index
    %c0_12 = arith.constant 0 : index
    %36 = vector.load %arg4[%35, %c0_11, %c0_12] : memref<7x256x256xf32, #tpu.memory_space<vmem>>, vector<1x256x256xf32>
    %37 = vector.shape_cast %36 : vector<1x256x256xf32> to vector<256x256xf32>
    %38 = arith.index_cast %c1_i32 : i32 to index
    %c0_13 = arith.constant 0 : index
    %c0_14 = arith.constant 0 : index
    %39 = vector.load %arg5[%38, %c0_13, %c0_14] : memref<7x256x1xf32, #tpu.memory_space<vmem>>, vector<1x256x1xf32>
    %40 = vector.shape_cast %39 : vector<1x256x1xf32> to vector<256x1xf32>
    %cst_15 = arith.constant dense<0.000000e+00> : vector<256x128xf32>
    %41 = tpu.matmul %37, %34, %cst_15 {dimension_numbers = #tpu.dot_dimension_numbers<[1], [0], [0], [1], [0, 0, 1, 1], [], []>} : vector<256x256xf32>, vector<256x128xf32>, vector<256x128xf32> -> vector<256x128xf32>
    %42 = vector.broadcast %40 : vector<256x1xf32> to vector<256x128xf32>
    %43 = arith.addf %41, %42 : vector<256x128xf32>
    %cst_16 = arith.constant 0.000000e+00 : f32
    %44 = vector.broadcast %cst_16 : f32 to vector<256x128xf32>
    %45 = arith.maximumf %43, %44 : vector<256x128xf32>
    %c2_i32 = arith.constant 2 : i32
    %46 = arith.index_cast %c2_i32 : i32 to index
    %c0_17 = arith.constant 0 : index
    %c0_18 = arith.constant 0 : index
    %47 = vector.load %arg4[%46, %c0_17, %c0_18] : memref<7x256x256xf32, #tpu.memory_space<vmem>>, vector<1x256x256xf32>
    %48 = vector.shape_cast %47 : vector<1x256x256xf32> to vector<256x256xf32>
    %49 = arith.index_cast %c2_i32 : i32 to index
    %c0_19 = arith.constant 0 : index
    %c0_20 = arith.constant 0 : index
    %50 = vector.load %arg5[%49, %c0_19, %c0_20] : memref<7x256x1xf32, #tpu.memory_space<vmem>>, vector<1x256x1xf32>
    %51 = vector.shape_cast %50 : vector<1x256x1xf32> to vector<256x1xf32>
    %cst_21 = arith.constant dense<0.000000e+00> : vector<256x128xf32>
    %52 = tpu.matmul %48, %45, %cst_21 {dimension_numbers = #tpu.dot_dimension_numbers<[1], [0], [0], [1], [0, 0, 1, 1], [], []>} : vector<256x256xf32>, vector<256x128xf32>, vector<256x128xf32> -> vector<256x128xf32>
    %53 = vector.broadcast %51 : vector<256x1xf32> to vector<256x128xf32>
    %54 = arith.addf %52, %53 : vector<256x128xf32>
    %cst_22 = arith.constant 0.000000e+00 : f32
    %55 = vector.broadcast %cst_22 : f32 to vector<256x128xf32>
    %56 = arith.maximumf %54, %55 : vector<256x128xf32>
    %c3_i32 = arith.constant 3 : i32
    %57 = arith.index_cast %c3_i32 : i32 to index
    %c0_23 = arith.constant 0 : index
    %c0_24 = arith.constant 0 : index
    %58 = vector.load %arg4[%57, %c0_23, %c0_24] : memref<7x256x256xf32, #tpu.memory_space<vmem>>, vector<1x256x256xf32>
    %59 = vector.shape_cast %58 : vector<1x256x256xf32> to vector<256x256xf32>
    %60 = arith.index_cast %c3_i32 : i32 to index
    %c0_25 = arith.constant 0 : index
    %c0_26 = arith.constant 0 : index
    %61 = vector.load %arg5[%60, %c0_25, %c0_26] : memref<7x256x1xf32, #tpu.memory_space<vmem>>, vector<1x256x1xf32>
    %62 = vector.shape_cast %61 : vector<1x256x1xf32> to vector<256x1xf32>
    %cst_27 = arith.constant dense<0.000000e+00> : vector<256x128xf32>
    %63 = tpu.matmul %59, %56, %cst_27 {dimension_numbers = #tpu.dot_dimension_numbers<[1], [0], [0], [1], [0, 0, 1, 1], [], []>} : vector<256x256xf32>, vector<256x128xf32>, vector<256x128xf32> -> vector<256x128xf32>
    %64 = vector.broadcast %62 : vector<256x1xf32> to vector<256x128xf32>
    %65 = arith.addf %63, %64 : vector<256x128xf32>
    %cst_28 = arith.constant 0.000000e+00 : f32
    %66 = vector.broadcast %cst_28 : f32 to vector<256x128xf32>
    %67 = arith.maximumf %65, %66 : vector<256x128xf32>
    %c4_i32 = arith.constant 4 : i32
    %68 = arith.index_cast %c4_i32 : i32 to index
    %c0_29 = arith.constant 0 : index
    %c0_30 = arith.constant 0 : index
    %69 = vector.load %arg4[%68, %c0_29, %c0_30] : memref<7x256x256xf32, #tpu.memory_space<vmem>>, vector<1x256x256xf32>
    %70 = vector.shape_cast %69 : vector<1x256x256xf32> to vector<256x256xf32>
    %71 = arith.index_cast %c4_i32 : i32 to index
    %c0_31 = arith.constant 0 : index
    %c0_32 = arith.constant 0 : index
    %72 = vector.load %arg5[%71, %c0_31, %c0_32] : memref<7x256x1xf32, #tpu.memory_space<vmem>>, vector<1x256x1xf32>
    %73 = vector.shape_cast %72 : vector<1x256x1xf32> to vector<256x1xf32>
    %cst_33 = arith.constant dense<0.000000e+00> : vector<256x128xf32>
    %74 = tpu.matmul %70, %67, %cst_33 {dimension_numbers = #tpu.dot_dimension_numbers<[1], [0], [0], [1], [0, 0, 1, 1], [], []>} : vector<256x256xf32>, vector<256x128xf32>, vector<256x128xf32> -> vector<256x128xf32>
    %75 = vector.broadcast %73 : vector<256x1xf32> to vector<256x128xf32>
    %76 = arith.addf %74, %75 : vector<256x128xf32>
    %cst_34 = arith.constant 0.000000e+00 : f32
    %77 = vector.broadcast %cst_34 : f32 to vector<256x128xf32>
    %78 = arith.maximumf %76, %77 : vector<256x128xf32>
    %c5_i32 = arith.constant 5 : i32
    %79 = arith.index_cast %c5_i32 : i32 to index
    %c0_35 = arith.constant 0 : index
    %c0_36 = arith.constant 0 : index
    %80 = vector.load %arg4[%79, %c0_35, %c0_36] : memref<7x256x256xf32, #tpu.memory_space<vmem>>, vector<1x256x256xf32>
    %81 = vector.shape_cast %80 : vector<1x256x256xf32> to vector<256x256xf32>
    %82 = arith.index_cast %c5_i32 : i32 to index
    %c0_37 = arith.constant 0 : index
    %c0_38 = arith.constant 0 : index
    %83 = vector.load %arg5[%82, %c0_37, %c0_38] : memref<7x256x1xf32, #tpu.memory_space<vmem>>, vector<1x256x1xf32>
    %84 = vector.shape_cast %83 : vector<1x256x1xf32> to vector<256x1xf32>
    %cst_39 = arith.constant dense<0.000000e+00> : vector<256x128xf32>
    %85 = tpu.matmul %81, %78, %cst_39 {dimension_numbers = #tpu.dot_dimension_numbers<[1], [0], [0], [1], [0, 0, 1, 1], [], []>} : vector<256x256xf32>, vector<256x128xf32>, vector<256x128xf32> -> vector<256x128xf32>
    %86 = vector.broadcast %84 : vector<256x1xf32> to vector<256x128xf32>
    %87 = arith.addf %85, %86 : vector<256x128xf32>
    %cst_40 = arith.constant 0.000000e+00 : f32
    %88 = vector.broadcast %cst_40 : f32 to vector<256x128xf32>
    %89 = arith.maximumf %87, %88 : vector<256x128xf32>
    %c6_i32 = arith.constant 6 : i32
    %90 = arith.index_cast %c6_i32 : i32 to index
    %c0_41 = arith.constant 0 : index
    %c0_42 = arith.constant 0 : index
    %91 = vector.load %arg4[%90, %c0_41, %c0_42] : memref<7x256x256xf32, #tpu.memory_space<vmem>>, vector<1x256x256xf32>
    %92 = vector.shape_cast %91 : vector<1x256x256xf32> to vector<256x256xf32>
    %93 = arith.index_cast %c6_i32 : i32 to index
    %c0_43 = arith.constant 0 : index
    %c0_44 = arith.constant 0 : index
    %94 = vector.load %arg5[%93, %c0_43, %c0_44] : memref<7x256x1xf32, #tpu.memory_space<vmem>>, vector<1x256x1xf32>
    %95 = vector.shape_cast %94 : vector<1x256x1xf32> to vector<256x1xf32>
    %cst_45 = arith.constant dense<0.000000e+00> : vector<256x128xf32>
    %96 = tpu.matmul %92, %89, %cst_45 {dimension_numbers = #tpu.dot_dimension_numbers<[1], [0], [0], [1], [0, 0, 1, 1], [], []>} : vector<256x256xf32>, vector<256x128xf32>, vector<256x128xf32> -> vector<256x128xf32>
    %97 = vector.broadcast %95 : vector<256x1xf32> to vector<256x128xf32>
    %98 = arith.addf %96, %97 : vector<256x128xf32>
    %cst_46 = arith.constant 0.000000e+00 : f32
    %99 = vector.broadcast %cst_46 : f32 to vector<256x128xf32>
    %100 = arith.maximumf %98, %99 : vector<256x128xf32>
    %c7_i32 = arith.constant 7 : i32
    %c0_47 = arith.constant 0 : index
    %c0_48 = arith.constant 0 : index
    %101 = vector.load %arg6[%c0_47, %c0_48] : memref<256x1xf32, #tpu.memory_space<vmem>>, vector<256x1xf32>
    %102 = vector.broadcast %101 : vector<256x1xf32> to vector<256x128xf32>
    %103 = arith.mulf %100, %102 : vector<256x128xf32>
    %cst_49 = arith.constant dense<0.000000e+00> : vector<128xf32>
    %104 = vector.multi_reduction <add>, %103, %cst_49 [0] : vector<256x128xf32> to vector<128xf32>
    %105 = vector.shape_cast %104 : vector<128xf32> to vector<1x128xf32>
    %c0_50 = arith.constant 0 : index
    %c0_51 = arith.constant 0 : index
    %106 = vector.load %arg7[%c0_50, %c0_51] : memref<1x1xf32, #tpu.memory_space<vmem>>, vector<1x1xf32>
    %107 = vector.broadcast %106 : vector<1x1xf32> to vector<1x128xf32>
    %108 = arith.addf %105, %107 : vector<1x128xf32>
    %c0_52 = arith.constant 0 : index
    %c0_53 = arith.constant 0 : index
    %109 = vector.load %arg8[%c0_52, %c0_53] : memref<1x128xf32, #tpu.memory_space<vmem>>, vector<1x128xf32>
    tpu.vector_store %arg8[%c0_52, %c0_53], %108 {strides = array<i32>} : memref<1x128xf32, #tpu.memory_space<vmem>>, vector<1x128xf32>,
    return
  }
  func.func @transform_0(%arg0: i32) -> (i32, i32) {
    %c0_i32 = arith.constant 0 : i32
    %c0_i32_0 = arith.constant 0 : i32
    return %c0_i32, %arg0 : i32, i32
  }
  func.func @transform_1(%arg0: i32) -> (i32, i32) {
    %c0_i32 = arith.constant 0 : i32
    %c0_i32_0 = arith.constant 0 : i32
    %c0_i32_1 = arith.constant 0 : i32
    return %c0_i32, %c0_i32_0 : i32, i32
  }
  func.func @transform_2(%arg0: i32) -> (i32, i32) {
    %c0_i32 = arith.constant 0 : i32
    %c0_i32_0 = arith.constant 0 : i32
    %c0_i32_1 = arith.constant 0 : i32
    return %c0_i32, %c0_i32_0 : i32, i32
  }
  func.func @transform_3(%arg0: i32) -> (i32, i32, i32) {
    %c0_i32 = arith.constant 0 : i32
    %c0_i32_0 = arith.constant 0 : i32
    %c0_i32_1 = arith.constant 0 : i32
    %c0_i32_2 = arith.constant 0 : i32
    return %c0_i32, %c0_i32_0, %c0_i32_1 : i32, i32, i32
  }
  func.func @transform_4(%arg0: i32) -> (i32, i32, i32) {
    %c0_i32 = arith.constant 0 : i32
    %c0_i32_0 = arith.constant 0 : i32
    %c0_i32_1 = arith.constant 0 : i32
    %c0_i32_2 = arith.constant 0 : i32
    return %c0_i32, %c0_i32_0, %c0_i32_1 : i32, i32, i32
  }
  func.func @transform_5(%arg0: i32) -> (i32, i32) {
    %c0_i32 = arith.constant 0 : i32
    %c0_i32_0 = arith.constant 0 : i32
    %c0_i32_1 = arith.constant 0 : i32
    return %c0_i32, %c0_i32_0 : i32, i32
  }
  func.func @transform_6(%arg0: i32) -> (i32, i32) {
    %c0_i32 = arith.constant 0 : i32
    %c0_i32_0 = arith.constant 0 : i32
    %c0_i32_1 = arith.constant 0 : i32
    return %c0_i32, %c0_i32_0 : i32, i32
  }
  func.func @transform_7(%arg0: i32) -> (i32, i32) {
    %c0_i32 = arith.constant 0 : i32
    %c0_i32_0 = arith.constant 0 : i32
    return %c0_i32, %arg0 : i32, i32
  }
}

</mosaic_0001>

<bundles_post_ra>
// kernel: tpu_custom_call.1
= control target key start
LH: loop header
LB: loop body
LE: loop exit
PB: predicated region body
PF: predicated region fallthrough
CT: control target
= control target key end

     0   :  { %s8317_s0 = inlined_call_operand.hbm [shape: f32[3,256], index: 0, kind: input, shape index: {}]   ;;  %s8318_s1 = inlined_call_operand.vmem [shape: f32[256,3], index: 1, kind: input, shape index: {}]   ;;  %s8319_s2 = inlined_call_operand.vmem [shape: f32[256,1], index: 2, kind: input, shape index: {}]   ;;  %s8320_s3 = inlined_call_operand.hbm [shape: f32[7,256,256], index: 3, kind: input, shape index: {}]   ;;  %s8321_s4 = inlined_call_operand.vmem [shape: f32[7,256,1], index: 4, kind: input, shape index: {}]   ;;  %s8322_s5 = inlined_call_operand.vmem [shape: f32[256,1], index: 5, kind: input, shape index: {}]   ;;  %s8323_s6 = inlined_call_operand.<no memory space> [shape: f32[1,1], index: 6, kind: input, shape index: {}]   ;;  %s8324_s7 = inlined_call_operand.hbm [shape: f32[1,256], index: 7, kind: output, shape index: {}]  }
   0x1   :  { %v12_v0 = vstv %s8323_s6 }
   0x2   :  { %13 = vst [vmem:[#allocation2] sm:$0x1] %v12_v0 }
   0x3   :  { %14 = vsyncpa [#allocation4], 0 }
   0x4   :  { %16 = vsyncpa [#allocation4 + $0x1], 0 }
   0x5   :  { %17 = vsyncpa [#allocation7], 0 }
   0x6   :  { %18 = vsyncpa [#allocation5], 0 }
   0x7   :  { %20 = vsyncpa [#allocation5 + $0x1], 0  ;;  %s6021_s26 = smov 0   ;;  %s6023_s27 = smov 0  }
   0x8   :  { %s6025_s28 = smov 0   ;;  %s6027_s29 = smov 0  }
   0x9 LB: > { %s6042_s6 = sadd.s32 4294967295, %s5967_s29   ;;  %s5152_s30 = sadd.s32 4294967294, %s5967_s29   ;;  %s5967_s29 = sphi %s6027_s29, %s8526_s29   ;;  %s5963_s28 = sphi %s6025_s28, %s8525_s28   ;;  %s5959_s27 = sphi %s6023_s27, %s8524_s27   ;;  %s5955_s26 = sphi %s6021_s26, %s8523_s26  }
   0xa   : > { %p46_p0 = scmp.ne.s32.totalorder %s5959_s27, %s5955_s26  ;;  %p8325_p1 = scmp.eq.s32.totalorder %s6042_s6, 0 }
   0xb   : > { %p202_p3 = scmp.eq.s32.totalorder %s5152_s30, 1  ;;  %p5153_p5 = scmp.ge.s32.totalorder %s5967_s29, 1 }
   0xc   : > { %p6051_p4 = por %p8325_p1, %p46_p0  ;;  %p209_p7 = scmp.lt.s32.totalorder %s5967_s29, 3 }
   0xd   : > { %p6056_p6 = por %p202_p3, %p46_p0  ;;  %s5969_s11 = smov [#allocation6]  }
   0xe   : > { %s8332_s8 = scalar_select %p6051_p4, 1, 0 }
   0xf   : > { %s8333_s9 = scalar_select %p6056_p6, 1, 0 }
  0x10   : > { %p6061_p8 = pnand %p5153_p5, %p209_p7  ;;  %s227_s12 = sshll.u32 %s5969_s11, 4  ;;  %s6065_s12 = int_to_ptr.vmem [resolvable:$true] %s227_s12 }
  0x11   : > { %s6077_s14 = sadd.s32 1, %s5967_s29   ;;  %s33_s15 = sadd.s32 1, %s5963_s28 }
  0x12   : > { %s8334_s10 = scalar_select %p6061_p8, 1, 0 }
  0x13   : > { %p5732_p9 = pneg %p6061_p8  ;;  %s30_s16 = ssub.s32 %s5967_s29, %s6077_s14 }
  0x14   : > { %s5839_s19 = scalar_lea.hbm %s8320_s3, 57344 }
  0x15   : > { %p6072_p11 = pnand %p5732_p9, %p8325_p1  ;;  %p5840_p12 = scmp.ne.s32.totalorder %s8320_s3, %s5839_s19 }
  0x16   : > { %p5846_p5 = scmp.lt.u32.totalorder %s5839_s19, %s8320_s3 }
  0x17   : > { %p5841_p13 = pneg %p6072_p11 }
  0x19   : > { %p5842_p0 = pnand %p5841_p13, %p5840_p12 }
  0x1b   : > { %p5843_p3 = pneg %p5842_p0 }
  0x1d   : > { %p5848_p7 = pnand %p5846_p5, %p5843_p3 }
  0x1f   : > { %5851 = shalt.err (!%p5848_p7)
}
  0x20   : > { %s5852_s24 = scalar_lea.vmem %s6065_s12, 57344  ;;  %p5860_p2 = scmp.lt.s32.totalorder %s6065_s12, %s6065_s12 }
  0x21   : > { %p5853_p9 = scmp.ne.s32.totalorder %s6065_s12, %s5852_s24  ;;  %p5861_p6 = scmp.lt.s32.totalorder %s5852_s24, %s5852_s24 }
  0x23   : > { %p5855_p10 = pnand %p5853_p9, %p5841_p13  ;;  %p5862_p4 = por %p5861_p6, %p5860_p2 }
  0x25   : > { %p5856_p1 = pneg %p5855_p10 }
  0x27   : > { %p5863_p8 = pnand %p5862_p4, %p5856_p1 }
  0x29   : > { %5866 = shalt.err (!%p5863_p8)
}
  0x2a   : > { %s5970_s25 = smov 256   ;;  %s5971_s30 = smov 16  }
  0x2b   : > { %5735 = dma.hbm_to_vmem [thread:$0]  (!%p6072_p11), %s8320_s3, 57344, %s6065_s12, [#allocation7], %s5970_s25, %s5970_s25, %s5971_s30  }
  0x2c   : > { %p31_p2 = scmp.eq.s32.totalorder %s30_s16, 0  ;;  %p40_p1 = scmp.ne.s32.totalorder %s5963_s28, %s5959_s27 }
  0x2d   : > { %p41_p4 = scmp.eq.s32.totalorder %s5967_s29, 0  ;;  %p5745_p6 = scmp.lt.s32.totalorder %s5967_s29, 2 }
  0x2e   : > { %s6108_s18 = scalar_select %p31_p2, %s5963_s28, %s33_s15  }
  0x2f   : > { %p42_p8 = por %p41_p4, %p40_p1  ;;  %p8336_p10 = scmp.eq.s32.totalorder %s6042_s6, 1 }
  0x30   : > { %s250_s20 = sand.u32 1, %s5963_s28   ;;  %s5157_s21 = sshll.u32 %s5967_s29, 6 }
  0x31   : > { %p6112_p12 = por %p8336_p10, %p40_p1  ;;  %s5156_s22 = sshll.u32 %s250_s20, 2 }
  0x32   : > { %s6121_s24 = scalar_lea.hbm %s8317_s0, %s5157_s21  ;;  %s254_s12 = scalar_lea.vmem [#allocation3], %s5156_s22 }
  0x33   : > { %s261_s15 = sshll.u32 %s254_s12, 4  ;;  %p6123_p11 = pnand %p5745_p6, %p42_p8  ;;  %s6127_s15 = int_to_ptr.vmem [resolvable:$true] %s261_s15 }
  0x34   : > { %s251_s25 = scalar_lea.sflag [#allocation4], %s250_s20  ;;  %s5867_s30 = scalar_lea.hbm %s6121_s24, 64 }
  0x35   : > { %p5868_p13 = scmp.ne.s32.totalorder %s6121_s24, %s5867_s30  ;;  %p5869_p0 = pneg %p6123_p11 }
  0x36   : > { %s5872_s21 = scalar_lea.hbm %s8317_s0, 128  ;;  %p5873_p7 = scmp.lt.u32.totalorder %s6121_s24, %s8317_s0 }
  0x37   : > { %p5870_p3 = pnand %p5869_p0, %p5868_p13  ;;  %p5874_p9 = scmp.lt.u32.totalorder %s5872_s21, %s5867_s30 }
  0x38   : > { %p5876_p1 = scmp.lt.u32.totalorder %s5867_s30, %s6121_s24 }
  0x39   : > { %p5871_p5 = pneg %p5870_p3  ;;  %p5875_p2 = por %p5874_p9, %p5873_p7 }
  0x3b   : > { %p5877_p4 = por %p5876_p1, %p5875_p2 }
  0x3d   : > { %p5878_p6 = pnand %p5877_p4, %p5871_p5 }
  0x3f   : > { %5881 = shalt.err (!%p5878_p6)
}
  0x40   : > { %s5882_s20 = scalar_lea.vmem %s6127_s15, 64  ;;  %s5972_s23 = smov [#allocation3]  }
  0x41   : > { %p5883_p8 = scmp.ne.s32.totalorder %s6127_s15, %s5882_s20  ;;  %s5887_s12 = sshll.u32 %s5972_s23, 4  ;;  %s5888_s12 = int_to_ptr.vmem [resolvable:$false] %s5887_s12 }
  0x42   : > { %s5889_s11 = scalar_lea.vmem %s5888_s12, 128  ;;  %p5890_p3 = scmp.lt.s32.totalorder %s6127_s15, %s5888_s12 }
  0x43   : > { %p5885_p10 = pnand %p5883_p8, %p5869_p0  ;;  %p5891_p7 = scmp.lt.s32.totalorder %s5889_s11, %s5882_s20 }
  0x45   : > { %p5886_p13 = pneg %p5885_p10  ;;  %p5892_p9 = por %p5891_p7, %p5890_p3 }
  0x47   : > { %p5893_p2 = pnand %p5892_p9, %p5886_p13 }
  0x49   : > { %5896 = shalt.err (!%p5893_p2)
}
  0x4a   : > { %5739 = dma.hbm_to_vmem [thread:$0]  (!%p6123_p11), %s6121_s24, 64, %s6127_s15, %s251_s25  }
  0x4b   : > { %p8339_p5 = scmp.ne.s32.totalorder %s8334_s10, 0 }
  0x4d   : > { %270 = sbr.rel (%p8339_p5) target bundleno = 3003 (0xbbb), region = 48 }
  0x54   : > { %s6157_s30 = sand.u32 1, %s5959_s27   ;;  %p8340_p0 = scmp.ne.s32.totalorder %s8332_s8, 0 }
  0x55   : > { %s5159_s17 = sshll.u32 %s6157_s30, 2  ;;  %s273_s21 = scalar_lea.sflag [#allocation4], %s6157_s30 }
  0x56   : > { %s6161_s22 = scalar_lea.vmem [#allocation3], %s5159_s17 }
  0x57   : > { %5942 = dma.done.wait (%p8340_p0), %s273_s21, 64  }
  0x58   : > { %5944 = vsyncadd (%p8340_p0), %s273_s21, 4294967232  ;;  %p8341_p11 = scmp.eq.s32.totalorder %s6042_s6, 0 }
  0x5a   : > { %5946 = dma.done.wait (%p8341_p11), [#allocation7], 57344   ;;  %p8342_p1 = pmov %p8341_p11 }
  0x5b   : > { %v5973_v1 = vmov 2   ;;  %v5974_v2 = vmov 1   ;;  %v6176_v3 = vld [vmem:[%s8318_s1] sm:$0xff]  ;;  %v313_v4 = vld [vmem:[%s8318_s1 + $0x10] sm:$0xff]  ;;  %v6186_v5 = vld [vmem:[%s8318_s1 + $0x8] sm:$0xff]  ;;  %v5975_v8 = vmov 0  }
  0x5c   : > { %5948 = vsyncadd (%p8342_p1), [#allocation7], 4294909952  ;;  %5788 = vset.pattern.permute.xlu0 %v5973_v1  ;;  %5787 = vset.pattern.permute.xlu1 %v5974_v2  ;;  %v316_v6 = vld [vmem:[%s8318_s1 + $0x28] sm:$0xff]  ;;  %v315_v7 = vld [vmem:[%s8318_s1 + $0x20] sm:$0xff]  ;;  %v8329_v31 = vmov 0.0|0.0   ;;  %s5353_s25 = sshll.u32 %s6042_s6, 4 }
  0x5d   : > { %736 = vperm.xlu0 %5788, %v6176_v3   ;;  %540 = vperm.xlu1 %5787, %v6176_v3   ;;  %v318_v9 = vld [vmem:[%s8318_s1 + $0x38] sm:$0xff]  ;;  %v6206_v10 = vld [vmem:[%s8318_s1 + $0x48] sm:$0xff]  ;;  %v931_v15 = vld [vmem:[%s8319_s2] sm:$0xff]  ;;  %s309_s13 = scalar_lea.vmem [#allocation8], %s6157_s30  ;;  %s8273_s12 = scalar_lea.hbm %s8324_s7, %s5353_s25 }
  0x5e   : > { %v314_v11 = vld [vmem:[%s8318_s1 + $0x18] sm:$0xff]  ;;  %v6221_v13 = vld [vmem:[%s8318_s1 + $0x68] sm:$0xff]  ;;  %v933_v21 = vld [vmem:[%s8319_s2 + $0x10] sm:$0xff]  ;;  %5356 = vmatprep.subr.bf16.mxu0 %v8329_v31  ;;  %5692 = vmatprep.subr.bf16.mxu1 %v8329_v31  ;;  %s5076_s20 = sshll.u32 %s309_s13, 4  ;;  %s5064_s11 = scalar_lea.sflag [#allocation5], %s6157_s30  ;;  %s8275_s20 = int_to_ptr.vmem [resolvable:$true] %s5076_s20 }
  0x5f   : > { %v6215_v12 = vld [vmem:[%s8318_s1 + $0x58] sm:$0xff]  ;;  %v6238_v16 = vld [vmem:[%s8318_s1 + $0x88] sm:$0xff]  ;;  %v317_v26 = vld [vmem:[%s8318_s1 + $0x30] sm:$0xff]  ;;  %s5897_s6 = scalar_lea.vmem %s8275_s20, 16  ;;  %s5977_s17 = smov [#allocation8]  }
  0x60   : > { %v6228_v14 = vld [vmem:[%s8318_s1 + $0x78] sm:$0xff]  ;;  %v6250_v18 = vld [vmem:[%s8318_s1 + $0xa8] sm:$0xff]  ;;  %v319_v29 = vld [vmem:[%s8318_s1 + $0x40] sm:$0xff]  ;;  %p5898_p4 = scmp.ne.s32.totalorder %s8275_s20, %s5897_s6  ;;  %s5901_s21 = sshll.u32 %s5977_s17, 4  ;;  %s5902_s21 = int_to_ptr.vmem [resolvable:$false] %s5901_s21 }
  0x61   : > { %744 = vperm.xlu0 %5788, %v313_v4   ;;  %544 = vperm.xlu1 %5787, %v6186_v5   ;;  %v6244_v17 = vld [vmem:[%s8318_s1 + $0x98] sm:$0xff]  ;;  %v6264_v20 = vld [vmem:[%s8318_s1 + $0xc8] sm:$0xff]  ;;  %v935_v30 = vld [vmem:[%s8319_s2 + $0x20] sm:$0xff]  ;;  %s5903_s10 = scalar_lea.vmem %s5902_s21, 32  ;;  %p5904_p10 = scmp.lt.s32.totalorder %s8275_s20, %s5902_s21 }
  0x62   : > { %v6257_v19 = vld [vmem:[%s8318_s1 + $0xb8] sm:$0xff]  ;;  %v6283_v24 = vld [vmem:[%s8318_s1 + $0xe8] sm:$0xff]  ;;  %v937_v32 = vld [vmem:[%s8319_s2 + $0x30] sm:$0xff]  ;;  %p5899_p6 = pnand %p5898_p4, %p6112_p12  ;;  %p5905_p13 = scmp.lt.s32.totalorder %s5903_s10, %s5897_s6 }
  0x63   : > { %v6273_v22 = vld [vmem:[%s8318_s1 + $0xd8] sm:$0xff]  ;;  %v932_v27 = vld [vmem:[%s8319_s2 + $0x8] sm:$0xff]  ;;  %v939_v33 = vld [vmem:[%s8319_s2 + $0x40] sm:$0xff] }
  0x64   : > { %v934_v23 = vld [vmem:[%s8319_s2 + $0x18] sm:$0xff]  ;;  %v936_v28 = vld [vmem:[%s8319_s2 + $0x28] sm:$0xff]  ;;  %v321_v35 = vld [vmem:[%s8318_s1 + $0x50] sm:$0xff]  ;;  %p5900_p8 = pneg %p5899_p6  ;;  %p5906_p3 = por %p5905_p13, %p5904_p10 }
  0x65   : > { %756 = vperm.xlu0 %5788, %v316_v6   ;;  %5789 = vset.pattern.permute.xlu1 %v5973_v1  ;;  %v6289_v25 = vld [vmem:[%s8318_s1 + $0xf8] sm:$0xff]  ;;  %v941_v36 = vld [vmem:[%s8319_s2 + $0x50] sm:$0xff]  ;;  %v943_v37 = vld [vmem:[%s8319_s2 + $0x60] sm:$0xff] }
  0x66   : > { %740 = vperm.xlu1 %5789, %v6186_v5   ;;  %v938_v34 = vld [vmem:[%s8319_s2 + $0x38] sm:$0xff]  ;;  %v940_v38 = vld [vmem:[%s8319_s2 + $0x48] sm:$0xff]  ;;  %v945_v41 = vld [vmem:[%s8319_s2 + $0x70] sm:$0xff]  ;;  %p5907_p7 = pnand %p5906_p3, %p5900_p8 }
  0x67   : > { %v323_v42 = vld [vmem:[%s8318_s1 + $0x60] sm:$0xff]  ;;  %v949_v50 = vld [vmem:[%s8319_s2 + $0x90] sm:$0xff]  ;;  %v942_v54 = vld [vmem:[%s8319_s2 + $0x58] sm:$0xff] }
  0x68   : > { %v947_v46 = vld [vmem:[%s8319_s2 + $0x80] sm:$0xff]  ;;  %v325_v58 = vld [vmem:[%s8318_s1 + $0x70] sm:$0xff] }
  0x69   : > { %5796 = vset.pattern.permute.xlu0 %v5974_v2  ;;  %v951_v56 = vld [vmem:[%s8319_s2 + $0xa0] sm:$0xff]  ;;  %v953_v61 = vld [vmem:[%s8319_s2 + $0xb0] sm:$0xff] }
  0x6a   : > { %556 = vperm.xlu0 %5796, %v315_v7   ;;  %5790 = vset.pattern.permute.xlu1 %v5975_v8 }
  0x6b   : > { %355 = vperm.xlu1 %5790, %v313_v4  }
  0x6e   : > { %568 = vperm.xlu0 %5796, %v318_v9  }
  0x6f   : > { %5791 = vset.pattern.permute.xlu1 %v5974_v2 }
  0x70   : > { %548 = vperm.xlu1 %5791, %v313_v4   ;;  %v955_v4 = vld [vmem:[%s8319_s2 + $0xc0] sm:$0xff] }
  0x72   : > { %576 = vperm.xlu0 %5796, %v6206_v10  }
  0x74   : > { %552 = vperm.xlu1 %5791, %v314_v11  }
  0x76   : > { %584 = vperm.xlu0 %5796, %v6215_v12  }
  0x78   : > { %5792 = vset.pattern.permute.xlu1 %v5973_v1 }
  0x79   : > { %748 = vperm.xlu1 %5792, %v314_v11  }
  0x7a   : > { %592 = vperm.xlu0 %5796, %v6221_v13  }
  0x7d   : > { %5793 = vset.pattern.permute.xlu1 %v5975_v8 }
  0x7e   : > { %600 = vperm.xlu0 %5796, %v6228_v14   ;;  %965 = vperm.xlu1 %5793, %v931_v15  }
  0x82   : > { %608 = vperm.xlu0 %5796, %v6238_v16   ;;  %365 = vperm.xlu1 %5793, %v315_v7  }
  0x86   : > { %616 = vperm.xlu0 %5796, %v6244_v17   ;;  %370 = vperm.xlu1 %5793, %v316_v6  }
  0x8a   : > { %624 = vperm.xlu0 %5796, %v6250_v18   ;;  %5794 = vset.pattern.permute.xlu1 %v5974_v2 }
  0x8b   : > { %560 = vperm.xlu1 %5794, %v316_v6  }
  0x8e   : > { %632 = vperm.xlu0 %5796, %v6257_v19  }
  0x8f   : > { %5795 = vset.pattern.permute.xlu1 %v5973_v1 }
  0x90   : > { %752 = vperm.xlu1 %5795, %v315_v7  }
  0x92   : > { %640 = vperm.xlu0 %5796, %v6264_v20  }
  0x94   : > { %5797 = vset.pattern.permute.xlu1 %v5975_v8 }
  0x95   : > { %975 = vperm.xlu1 %5797, %v933_v21   ;;  %v503_v21 = vlaneseq }
  0x96   : > { %648 = vperm.xlu0 %5796, %v6273_v22  }
  0x99   : > { %980 = vperm.xlu1 %5797, %v934_v23  }
  0x9a   : > { %656 = vperm.xlu0 %5796, %v6283_v24  }
  0x9d   : > { %380 = vperm.xlu1 %5797, %v318_v9  }
  0x9e   : > { %664 = vperm.xlu0 %5796, %v6289_v25  }
  0xa1   : > { %5798 = vset.pattern.permute.xlu1 %v5974_v2 }
  0xa2   : > { %5835 = vset.pattern.permute.xlu0 %v5975_v8  ;;  %564 = vperm.xlu1 %5798, %v317_v26  }
  0xa3   : > { %345 = vperm.xlu0 %5835, %v6176_v3  }
  0xa6   : > { %5799 = vset.pattern.permute.xlu1 %v5973_v1 }
  0xa7   : > { %350 = vperm.xlu0 %5835, %v6186_v5   ;;  %760 = vperm.xlu1 %5799, %v317_v26  }
  0xab   : > { %360 = vperm.xlu0 %5835, %v314_v11   ;;  %764 = vperm.xlu1 %5799, %v318_v9   ;;  %v944_v9 = vld [vmem:[%s8319_s2 + $0x68] sm:$0xff]  ;;  %v957_v11 = vld [vmem:[%s8319_s2 + $0xd0] sm:$0xff] }
  0xaf   : > { %970 = vperm.xlu0 %5835, %v932_v27   ;;  %5800 = vset.pattern.permute.xlu1 %v5975_v8 }
  0xb0   : > { %990 = vperm.xlu1 %5800, %v936_v28   ;;  %v6460_v28 = vshrl.u32 %v503_v21, 7 }
  0xb2   : > { %8343 = vst [vmem:[#allocation12_spill] sm:$0xff] %v6460_v28 }
  0xb3   : > { %375 = vperm.xlu0 %5835, %v317_v26   ;;  %v959_v26 = vld [vmem:[%s8319_s2 + $0xe0] sm:$0xff] }
  0xb4   : > { %385 = vperm.xlu1 %5800, %v319_v29  }
  0xb7   : > { %985 = vperm.xlu0 %5835, %v935_v30  }
  0xb8   : > { %5801 = vset.pattern.permute.xlu1 %v5974_v2 }
  0xb9   : > { %572 = vperm.xlu1 %5801, %v319_v29  }
  0xbb   : > { %390 = vperm.xlu0 %5835, %v6206_v10  }
  0xbd   : > { %5802 = vset.pattern.permute.xlu1 %v5973_v1 }
  0xbe   : > { %768 = vperm.xlu1 %5802, %v319_v29  }
  0xbf   : > { %995 = vperm.xlu0 %5835, %v937_v32   ;;  %v669_v32 = vsub.s32 1, %v6460_v28 }
  0xc2   : > { %772 = vperm.xlu1 %5802, %v6206_v10  }
  0xc3   : > { %400 = vperm.xlu0 %5835, %v6215_v12  }
  0xc6   : > { %5803 = vset.pattern.permute.xlu1 %v5975_v8 }
  0xc7   : > { %1005 = vperm.xlu0 %5835, %v939_v33   ;;  %1000 = vperm.xlu1 %5803, %v938_v34   ;;  %v310_v33 = vld [vmem:[%s6161_s22] sm:$0x7] }
  0xcb   : > { %410 = vperm.xlu0 %5835, %v6221_v13   ;;  %395 = vperm.xlu1 %5803, %v321_v35  }
  0xcf   : > { %1015 = vperm.xlu0 %5835, %v941_v36   ;;  %5804 = vset.pattern.permute.xlu1 %v5974_v2  ;;  %v8328_v36 = vsub.s32 0, %v6460_v28 }
  0xd0   : > { %580 = vperm.xlu1 %5804, %v321_v35  }
  0xd3   : > { %420 = vperm.xlu0 %5835, %v6228_v14  }
  0xd4   : > { %5805 = vset.pattern.permute.xlu1 %v5973_v1 }
  0xd5   : > { %776 = vperm.xlu1 %5805, %v321_v35   ;;  %v1252_v35 = vld [vmem:[%s8321_s4 + $0x8] sm:$0xff] }
  0xd7   : > { %1025 = vperm.xlu0 %5835, %v943_v37  }
  0xd9   : > { %780 = vperm.xlu1 %5805, %v6215_v12  }
  0xdb   : > { %430 = vperm.xlu0 %5835, %v6238_v16  }
  0xdc   : > { %v6348_v39 = vpop.permute.xlu1 %540  ;;  %v6350_v40 = vpop.permute.xlu0 %736 }
  0xdd   : > { %5806 = vset.pattern.permute.xlu1 %v5975_v8 }
  0xde   : > { %1010 = vperm.xlu1 %5806, %v940_v38   ;;  %v6481_v38 = vrot.slane %v310_v33, %v669_v32 }
  0xdf   : > { %1035 = vperm.xlu0 %5835, %v945_v41   ;;  %v865_v41 = vsub.s32 2, %v6460_v28 }
  0xe0   : > { %v6359_v43 = vpop.permute.xlu1 %544  ;;  %v6361_v44 = vpop.permute.xlu0 %744 }
  0xe2   : > { %405 = vperm.xlu1 %5806, %v323_v42  }
  0xe3   : > { %440 = vperm.xlu0 %5835, %v6244_v17  }
  0xe4   : > { %v6364_v45 = vpop.permute.xlu0 %756 }
  0xe5   : > { %v6369_v47 = vpop.permute.xlu1 %740 }
  0xe6   : > { %5807 = vset.pattern.permute.xlu1 %v5974_v2 }
  0xe7   : > { %1045 = vperm.xlu0 %5835, %v947_v46   ;;  %588 = vperm.xlu1 %5807, %v323_v42   ;;  %v946_v46 = vld [vmem:[%s8319_s2 + $0x78] sm:$0xff] }
  0xe9   : > { %v6372_v48 = vpop.permute.xlu0 %556 }
  0xea   : > { %v6374_v49 = vpop.permute.xlu1 %355 }
  0xeb   : > { %450 = vperm.xlu0 %5835, %v6250_v18   ;;  %5808 = vset.pattern.permute.xlu1 %v5973_v1 }
  0xec   : > { %784 = vperm.xlu1 %5808, %v323_v42   ;;  %v1254_v42 = vld [vmem:[%s8321_s4 + $0x18] sm:$0xff] }
  0xed   : > { %v6381_v51 = vpop.permute.xlu0 %568 }
  0xef   : > { %1055 = vperm.xlu0 %5835, %v949_v50   ;;  %v6383_v52 = vpop.permute.xlu1 %548  ;;  %v6492_v50 = vrot.slane %v310_v33, %v8328_v36 }
  0xf0   : > { %788 = vperm.xlu1 %5808, %v6221_v13   ;;  %v327_v13 = vld [vmem:[%s8318_s1 + $0x80] sm:$0xff] }
  0xf1   : > { %v6386_v53 = vpop.permute.xlu0 %576 }
  0xf3   : > { %460 = vperm.xlu0 %5835, %v6257_v19   ;;  %v6392_v55 = vpop.permute.xlu1 %552 }
  0xf4   : > { %5809 = vset.pattern.permute.xlu1 %v5975_v8 }
  0xf5   : > { %1020 = vperm.xlu1 %5809, %v942_v54   ;;  %v6398_v57 = vpop.permute.xlu0 %584 }
  0xf7   : > { %1065 = vperm.xlu0 %5835, %v951_v56   ;;  %v671_v56 = vmul.f32 %v6481_v38, %v6348_v39  ;;  %v673_v39 = vmul.f32 %v6481_v38, %v6383_v52 }
  0xf8   : > { %v6403_v59 = vpop.permute.xlu1 %748 }
  0xf9   : > { %415 = vperm.xlu1 %5809, %v325_v58   ;;  %v6405_v60 = vpop.permute.xlu0 %592 }
  0xfb   : > { %470 = vperm.xlu0 %5835, %v6264_v20  }
  0xfd   : > { %5810 = vset.pattern.permute.xlu1 %v5974_v2  ;;  %v6412_v62 = vpop.permute.xlu1 %965  ;;  %v6414_v63 = vpop.permute.xlu0 %600 }
  0xfe   : > { %596 = vperm.xlu1 %5810, %v325_v58  }
  0xff   : > { %1075 = vperm.xlu0 %5835, %v953_v61  }
 0x101   : > { %v6416_v0 = vpop.permute.xlu1 %365  ;;  %v6418_v3 = vpop.permute.xlu0 %608 }
 0x102   : > { %5811 = vset.pattern.permute.xlu1 %v5973_v1 }
 0x103   : > { %480 = vperm.xlu0 %5835, %v6273_v22   ;;  %792 = vperm.xlu1 %5811, %v325_v58   ;;  %v6499_v58 = vrot.slane %v310_v33, %v865_v41  ;;  %v509_v33 = vmul.f32 %v6492_v50, %v6374_v49 }
 0x105   : > { %v6425_v5 = vpop.permute.xlu1 %370  ;;  %v6427_v6 = vpop.permute.xlu0 %616  ;;  %v869_v52 = vmul.f32 %v6499_v58, %v6361_v44  ;;  %v870_v44 = vmul.f32 %v6499_v58, %v6403_v59 }
 0x107   : > { %1085 = vperm.xlu0 %5835, %v955_v4   ;;  %796 = vperm.xlu1 %5811, %v6228_v14   ;;  %v1256_v4 = vld [vmem:[%s8321_s4 + $0x28] sm:$0xff] }
 0x109   : > { %v6430_v7 = vpop.permute.xlu0 %624 }
 0x10a   : > { %v6435_v10 = vpop.permute.xlu1 %560 }
 0x10b   : > { %490 = vperm.xlu0 %5835, %v6283_v24   ;;  %5812 = vset.pattern.permute.xlu1 %v5975_v8  ;;  %v676_v49 = vmul.f32 %v6481_v38, %v6435_v10 }
 0x10c   : > { %1030 = vperm.xlu1 %5812, %v944_v9   ;;  %v329_v9 = vld [vmem:[%s8318_s1 + $0x90] sm:$0xff] }
 0x10d   : > { %v6442_v12 = vpop.permute.xlu0 %632 }
 0x10f   : > { %1095 = vperm.xlu0 %5835, %v957_v11   ;;  %v6447_v14 = vpop.permute.xlu1 %752  ;;  %v867_v11 = vmul.f32 %v6499_v58, %v6350_v40  ;;  %v1258_v40 = vld [vmem:[%s8321_s4 + $0x38] sm:$0xff] }
 0x110   : > { %425 = vperm.xlu1 %5812, %v327_v13  }
 0x111   : > { %v6449_v15 = vpop.permute.xlu0 %640 }
 0x113   : > { %500 = vperm.xlu0 %5835, %v6289_v25   ;;  %v962_v25 = vld [vmem:[%s8319_s2 + $0xf8] sm:$0xff] }
 0x114   : > { %5813 = vset.pattern.permute.xlu1 %v5974_v2  ;;  %v6453_v23 = vpop.permute.xlu1 %975 }
 0x115   : > { %604 = vperm.xlu1 %5813, %v327_v13   ;;  %v6458_v27 = vpop.permute.xlu0 %648 }
 0x117   : > { %1105 = vperm.xlu0 %5835, %v959_v26  }
 0x118   : > { %v6462_v29 = vpop.permute.xlu1 %980 }
 0x119   : > { %5814 = vset.pattern.permute.xlu1 %v5973_v1  ;;  %v6468_v30 = vpop.permute.xlu0 %656 }
 0x11a   : > { %800 = vperm.xlu1 %5814, %v327_v13  }
 0x11b   : > { %1120 = vperm.xlu0 %5835, %v962_v25   ;;  %v672_v25 = vmul.f32 %v6481_v38, %v6359_v43  ;;  %v705_v43 = vadd.f32 %v673_v39, %v509_v33  ;;  %v675_v39 = vmul.f32 %v6481_v38, %v6372_v48 }
 0x11c   : > { %v6472_v34 = vpop.permute.xlu1 %380 }
 0x11d   : > { %v6478_v37 = vpop.permute.xlu0 %664 }
 0x11e   : > { %804 = vperm.xlu1 %5814, %v6238_v16  }
 0x11f   : > { %1290 = vperm.xlu0 %5835, %v1252_v35  }
 0x121   : > { %v6494_v54 = vpop.permute.xlu1 %564 }
 0x122   : > { %v346_v16 = vpop.permute.xlu0 %345  ;;  %5815 = vset.pattern.permute.xlu1 %v5975_v8 }
 0x123   : > { %v507_v61 = vmul.f32 %v6492_v50, %v346_v16  ;;  %1300 = vperm.xlu0 %5835, %v1254_v42   ;;  %1040 = vperm.xlu1 %5815, %v946_v46   ;;  %v868_v42 = vmul.f32 %v6499_v58, %v6369_v47  ;;  %v1260_v47 = vld [vmem:[%s8321_s4 + $0x48] sm:$0xff] }
 0x125   : > { %v703_v13 = vadd.f32 %v671_v56, %v507_v61  ;;  %v674_v56 = vmul.f32 %v6481_v38, %v6392_v55 }
 0x126   : > { %v351_v21 = vpop.permute.xlu0 %350  ;;  %v6512_v26 = vpop.permute.xlu1 %760 }
 0x127   : > { %v508_v32 = vmul.f32 %v6492_v50, %v351_v21  ;;  %1310 = vperm.xlu0 %5835, %v1256_v4   ;;  %435 = vperm.xlu1 %5815, %v329_v9   ;;  %v899_v35 = vadd.f32 %v867_v11, %v703_v13  ;;  %v512_v4 = vmul.f32 %v6492_v50, %v6425_v5 }
 0x128   : > { %v872_v13 = vmul.f32 %v6499_v58, %v6364_v45  ;;  %v901_v21 = vadd.f32 %v869_v52, %v705_v43  ;;  %v1262_v45 = vld [vmem:[%s8321_s4 + $0x58] sm:$0xff] }
 0x129   : > { %v704_v41 = vadd.f32 %v672_v25, %v508_v32  ;;  %v1123_v10 = vadd.f32 %v6412_v62, %v899_v35  ;;  %v511_v25 = vmul.f32 %v6492_v50, %v6416_v0  ;;  %v708_v32 = vadd.f32 %v676_v49, %v512_v4  ;;  %v1264_v49 = vld [vmem:[%s8321_s4 + $0x68] sm:$0xff] }
 0x12a   : > { %v361_v46 = vpop.permute.xlu0 %360  ;;  %v6526_v16 = vpop.permute.xlu1 %764  ;;  %v1125_v48 = vadd.f32 %v6453_v23, %v901_v21  ;;  %v948_v4 = vld [vmem:[%s8319_s2 + $0x88] sm:$0xff] }
 0x12b   : > { %v510_v61 = vmul.f32 %v6492_v50, %v361_v46  ;;  %1320 = vperm.xlu0 %5835, %v1258_v40   ;;  %5816 = vset.pattern.permute.xlu1 %v5974_v2  ;;  %v900_v11 = vadd.f32 %v868_v42, %v704_v41  ;;  %v871_v41 = vmul.f32 %v6499_v58, %v6447_v14  ;;  %v1155_v35 = vmax.f32 %v1123_v10, 0.0 }
 0x12c   : > { %612 = vperm.xlu1 %5816, %v329_v9   ;;  %v707_v42 = vadd.f32 %v675_v39, %v511_v25  ;;  %v904_v43 = vadd.f32 %v872_v13, %v708_v32  ;;  %v1268_v25 = vld [vmem:[%s8321_s4 + $0x88] sm:$0xff]  ;;  %v677_v32 = vmul.f32 %v6481_v38, %v6494_v54  ;;  %v873_v54 = vmul.f32 %v6499_v58, %v6512_v26 }
 0x12d   : > { %v706_v55 = vadd.f32 %v674_v56, %v510_v61  ;;  %v1157_v61 = vmax.f32 %v1125_v48, 0.0  ;;  %v1270_v48 = vld [vmem:[%s8321_s4 + $0x98] sm:$0xff] }
 0x12e   : > { %v971_v59 = vpop.permute.xlu0 %970  ;;  %v903_v23 = vadd.f32 %v871_v41, %v707_v42  ;;  %v514_v41 = vmul.f32 %v6492_v50, %v6472_v34 }
 0x12f   : > { %v902_v33 = vadd.f32 %v870_v44, %v706_v55  ;;  %v1124_v40 = vadd.f32 %v971_v59, %v900_v11  ;;  %1330 = vperm.xlu0 %5835, %v1260_v47   ;;  %v991_v5 = vpop.permute.xlu1 %990  ;;  %v331_v59 = vld [vmem:[%s8318_s1 + $0xa0] sm:$0xff] }
 0x130   : > { %5817 = vset.pattern.permute.xlu1 %v5973_v1  ;;  %v1128_v44 = vadd.f32 %v991_v5, %v904_v43  ;;  %v678_v5 = vmul.f32 %v6481_v38, %v6381_v51 }
 0x131   : > { %v1156_v62 = vmax.f32 %v1124_v40, 0.0  ;;  %808 = vperm.xlu1 %5817, %v329_v9   ;;  %v1126_v0 = vadd.f32 %v6462_v29, %v902_v33 }
 0x132   : > { %v376_v52 = vpop.permute.xlu0 %375  ;;  %v1160_v11 = vmax.f32 %v1128_v44, 0.0  ;;  %v710_v34 = vadd.f32 %v678_v5, %v514_v41 }
 0x133   : > { %1340 = vperm.xlu0 %5835, %v1262_v45   ;;  %v6556_v46 = vpop.permute.xlu1 %385  ;;  %v5357_v14 = vpack.c.bf16 %v1156_v62, %v1155_v35  ;;  %v1158_v56 = vmax.f32 %v1126_v0, 0.0  ;;  %v513_v39 = vmul.f32 %v6492_v50, %v376_v52  ;;  %v874_v62 = vmul.f32 %v6499_v58, %v6526_v16  ;;  %v1272_v52 = vld [vmem:[%s8321_s4 + $0xa8] sm:$0xff]  ;;  %v1274_v16 = vld [vmem:[%s8321_s4 + $0xb8] sm:$0xff] }
 0x135   : > { %812 = vperm.xlu1 %5817, %v6244_v17   ;;  %5358 = vmatpush1.bf16.msra.mxu0 %v5357_v14  ;;  %v5360_v47 = vpack.c.bf16 %v1158_v56, %v1157_v61  ;;  %v1266_v17 = vld [vmem:[%s8321_s4 + $0x78] sm:$0xff]  ;;  %v709_v45 = vadd.f32 %v677_v32, %v513_v39  ;;  %v906_v43 = vadd.f32 %v874_v62, %v710_v34  ;;  %v1280_v32 = vld [vmem:[%s8321_s4 + $0xe8] sm:$0xff] }
 0x136   : > { %5708 = vmatpush1.bf16.msra.mxu1 %v5357_v14  ;;  %v986_v29 = vpop.permute.xlu0 %985  ;;  %5359 = vmatprep.subr.bf16.mxu0 %v8329_v31  ;;  %v680_v39 = vmul.f32 %v6481_v38, %v6386_v53  ;;  %v5162_v34 = vld [vmem:[%s8321_s4 + $0x108] sm:$0xff] }
 0x137   : > { %v1127_v9 = vadd.f32 %v986_v29, %v903_v23  ;;  %1350 = vperm.xlu0 %5835, %v1264_v49   ;;  %5693 = vmatprep.subr.bf16.mxu1 %v8329_v31  ;;  %v905_v0 = vadd.f32 %v873_v54, %v709_v45 }
 0x138   : > { %v6567_v55 = vpop.permute.xlu1 %572 }
 0x139   : > { %v1159_v10 = vmax.f32 %v1127_v9, 0.0  ;;  %5818 = vset.pattern.permute.xlu1 %v5975_v8  ;;  %5361 = vmatpush1.bf16.msra.mxu0 %v5360_v47  ;;  %v1276_v9 = vld [vmem:[%s8321_s4 + $0xc8] sm:$0xff] }
 0x13a   : > { %5709 = vmatpush1.bf16.msra.mxu1 %v5360_v47  ;;  %v6573_v13 = vpop.permute.xlu0 %390  ;;  %1050 = vperm.xlu1 %5818, %v948_v4   ;;  %v950_v4 = vld [vmem:[%s8319_s2 + $0x98] sm:$0xff] }
 0x13b   : > { %1360 = vperm.xlu0 %5835, %v1266_v17   ;;  %5362 = vmatprep.subr.bf16.mxu0 %v8329_v31  ;;  %v5363_v21 = vpack.c.bf16 %v1160_v11, %v1159_v10  ;;  %v333_v10 = vld [vmem:[%s8318_s1 + $0xb0] sm:$0xff] }
 0x13c   : > { %5694 = vmatprep.subr.bf16.mxu1 %v8329_v31 }
 0x13d   : > { %v769_v33 = vpop.permute.xlu1 %768  ;;  %5364 = vmatpush1.bf16.msra.mxu0 %v5363_v21 }
 0x13e   : > { %5710 = vmatpush1.bf16.msra.mxu1 %v5363_v21  ;;  %v996_v40 = vpop.permute.xlu0 %995  ;;  %445 = vperm.xlu1 %5818, %v331_v59   ;;  %v679_v21 = vmul.f32 %v6481_v38, %v6567_v55  ;;  %v875_v5 = vmul.f32 %v6499_v58, %v769_v33 }
 0x13f   : > { %1370 = vperm.xlu0 %5835, %v1268_v25   ;;  %5365 = vmatprep.subr.bf16.mxu0 %v8329_v31  ;;  %v1129_v42 = vadd.f32 %v996_v40, %v905_v0  ;;  %v515_v40 = vmul.f32 %v6492_v50, %v6556_v46 }
 0x140   : > { %5695 = vmatprep.subr.bf16.mxu1 %v8329_v31 }
 0x141   : > { %v773_v51 = vpop.permute.xlu1 %772  ;;  %v1161_v49 = vmax.f32 %v1129_v42, 0.0  ;;  %v711_v53 = vadd.f32 %v679_v21, %v515_v40 }
 0x142   : > { %v6599_v35 = vpop.permute.xlu0 %400  ;;  %5819 = vset.pattern.permute.xlu1 %v5974_v2  ;;  %v876_v55 = vmul.f32 %v6499_v58, %v773_v51 }
 0x143   : > { %1380 = vperm.xlu0 %5835, %v1270_v48   ;;  %620 = vperm.xlu1 %5819, %v331_v59   ;;  %v907_v54 = vadd.f32 %v875_v5, %v711_v53  ;;  %v518_v21 = vmul.f32 %v6492_v50, %v6599_v35 }
 0x146   : > { %v1006_v14 = vpop.permute.xlu0 %1005  ;;  %v1001_v26 = vpop.permute.xlu1 %1000 }
 0x147   : > { %v1130_v56 = vadd.f32 %v1001_v26, %v906_v43  ;;  %1390 = vperm.xlu0 %5835, %v1272_v52   ;;  %5820 = vset.pattern.permute.xlu1 %v5973_v1  ;;  %v1131_v46 = vadd.f32 %v1006_v14, %v907_v54  ;;  %v5164_v26 = vld [vmem:[%s8321_s4 + $0x118] sm:$0xff] }
 0x148   : > { %816 = vperm.xlu1 %5820, %v331_v59   ;;  %v516_v59 = vmul.f32 %v6492_v50, %v6573_v13  ;;  %v1282_v13 = vld [vmem:[%s8321_s4 + $0xf8] sm:$0xff] }
 0x149   : > { %v1162_v61 = vmax.f32 %v1130_v56, 0.0  ;;  %v1163_v42 = vmax.f32 %v1131_v46, 0.0 }
 0x14a   : > { %v6609_v44 = vpop.permute.xlu0 %410  ;;  %v6611_v23 = vpop.permute.xlu1 %395  ;;  %v712_v45 = vadd.f32 %v680_v39, %v516_v59  ;;  %v682_v39 = vmul.f32 %v6481_v38, %v6398_v57 }
 0x14b   : > { %1400 = vperm.xlu0 %5835, %v1274_v16   ;;  %v5366_v29 = vpack.c.bf16 %v1162_v61, %v1161_v49  ;;  %v5166_v49 = vld [vmem:[%s8321_s4 + $0x128] sm:$0xff]  ;;  %v517_v59 = vmul.f32 %v6492_v50, %v6611_v23  ;;  %v5172_v23 = vld [vmem:[%s8321_s4 + $0x158] sm:$0xff] }
 0x14c   : > { %820 = vperm.xlu1 %5820, %v6250_v18   ;;  %v1278_v18 = vld [vmem:[%s8321_s4 + $0xd8] sm:$0xff]  ;;  %v908_v33 = vadd.f32 %v876_v55, %v712_v45  ;;  %v952_v61 = vld [vmem:[%s8319_s2 + $0xa8] sm:$0xff]  ;;  %v714_v45 = vadd.f32 %v682_v39, %v518_v21  ;;  %v684_v39 = vmul.f32 %v6481_v38, %v6405_v60  ;;  %v520_v21 = vmul.f32 %v6492_v50, %v6609_v44 }
 0x14d   : > { %5367 = vmatpush1.bf16.msra.mxu0 %v5366_v29  ;;  %5711 = vmatpush1.bf16.msra.mxu1 %v5366_v29 }
 0x14e   : > { %v6617_v47 = vpop.permute.xlu0 %1015  ;;  %5368 = vmatprep.subr.bf16.mxu0 %v8329_v31  ;;  %5696 = vmatprep.subr.bf16.mxu1 %v8329_v31 }
 0x14f   : > { %1410 = vperm.xlu0 %5835, %v1276_v9   ;;  %v581_v17 = vpop.permute.xlu1 %580 }
 0x150   : > { %5821 = vset.pattern.permute.xlu1 %v5975_v8 }
 0x151   : > { %1060 = vperm.xlu1 %5821, %v950_v4   ;;  %v681_v4 = vmul.f32 %v6481_v38, %v581_v17  ;;  %v5170_v17 = vld [vmem:[%s8321_s4 + $0x148] sm:$0xff] }
 0x152   : > { %v6628_v11 = vpop.permute.xlu0 %420 }
 0x153   : > { %1420 = vperm.xlu0 %5835, %v1278_v18   ;;  %v335_v18 = vld [vmem:[%s8318_s1 + $0xc0] sm:$0xff]  ;;  %v713_v5 = vadd.f32 %v681_v4, %v517_v59  ;;  %v5180_v4 = vld [vmem:[%s8321_s4 + $0x198] sm:$0xff] }
 0x154   : > { %v777_v25 = vpop.permute.xlu1 %776 }
 0x155   : > { %455 = vperm.xlu1 %5821, %v333_v10  }
 0x156   : > { %v6645_v41 = vpop.permute.xlu0 %1025 }
 0x157   : > { %1430 = vperm.xlu0 %5835, %v1280_v32   ;;  %v877_v32 = vmul.f32 %v6499_v58, %v777_v25 }
 0x158   : > { %v781_v48 = vpop.permute.xlu1 %780 }
 0x159   : > { %5822 = vset.pattern.permute.xlu1 %v5974_v2  ;;  %v909_v57 = vadd.f32 %v877_v32, %v713_v5  ;;  %v878_v55 = vmul.f32 %v6499_v58, %v781_v48  ;;  %v5174_v48 = vld [vmem:[%s8321_s4 + $0x168] sm:$0xff] }
 0x15a   : > { %v6652_v62 = vpop.permute.xlu0 %430  ;;  %628 = vperm.xlu1 %5822, %v333_v10  }
 0x15b   : > { %1440 = vperm.xlu0 %5835, %v1282_v13   ;;  %v1133_v13 = vadd.f32 %v6617_v47, %v909_v57  ;;  %v910_v54 = vadd.f32 %v878_v55, %v714_v45  ;;  %v5176_v47 = vld [vmem:[%s8321_s4 + $0x178] sm:$0xff]  ;;  %v5182_v45 = vld [vmem:[%s8321_s4 + $0x1a8] sm:$0xff]  ;;  %v716_v57 = vadd.f32 %v684_v39, %v520_v21  ;;  %v339_v39 = vld [vmem:[%s8318_s1 + $0xe0] sm:$0xff] }
 0x15c   : > { %v5192_v21 = vld [vmem:[%s8321_s4 + $0x1f8] sm:$0xff] }
 0x15d   : > { %v1011_v0 = vpop.permute.xlu1 %1010 }
 0x15e   : > { %v1132_v51 = vadd.f32 %v1011_v0, %v908_v33  ;;  %v6657_v52 = vpop.permute.xlu0 %1035  ;;  %5823 = vset.pattern.permute.xlu1 %v5973_v1 }
 0x15f   : > { %1805 = vperm.xlu0 %5835, %v5162_v34   ;;  %824 = vperm.xlu1 %5823, %v333_v10  }
 0x160   : > { %v1164_v43 = vmax.f32 %v1132_v51, 0.0  ;;  %v1165_v51 = vmax.f32 %v1133_v13, 0.0 }
 0x161   : > { %v6663_v14 = vpop.permute.xlu1 %405 }
 0x162   : > { %v6665_v56 = vpop.permute.xlu0 %440  ;;  %v5369_v16 = vpack.c.bf16 %v1164_v43, %v1163_v42  ;;  %v519_v59 = vmul.f32 %v6492_v50, %v6663_v14  ;;  %v5184_v14 = vld [vmem:[%s8321_s4 + $0x1b8] sm:$0xff] }
 0x163   : > { %1815 = vperm.xlu0 %5835, %v5164_v26   ;;  %828 = vperm.xlu1 %5823, %v6257_v19   ;;  %v5168_v19 = vld [vmem:[%s8321_s4 + $0x138] sm:$0xff] }
 0x164   : > { %5370 = vmatpush1.bf16.msra.mxu0 %v5369_v16  ;;  %5712 = vmatpush1.bf16.msra.mxu1 %v5369_v16  ;;  %v5178_v16 = vld [vmem:[%s8321_s4 + $0x188] sm:$0xff] }
 0x165   : > { %5371 = vmatprep.subr.bf16.mxu0 %v8329_v31  ;;  %5697 = vmatprep.subr.bf16.mxu1 %v8329_v31 }
 0x166   : > { %v6676_v29 = vpop.permute.xlu0 %1045  ;;  %v589_v9 = vpop.permute.xlu1 %588 }
 0x167   : > { %1825 = vperm.xlu0 %5835, %v5166_v49   ;;  %5824 = vset.pattern.permute.xlu1 %v5975_v8  ;;  %v954_v49 = vld [vmem:[%s8319_s2 + $0xb8] sm:$0xff] }
 0x168   : > { %1070 = vperm.xlu1 %5824, %v952_v61  }
 0x16a   : > { %v6686_v10 = vpop.permute.xlu0 %450 }
 0x16b   : > { %1835 = vperm.xlu0 %5835, %v5168_v19   ;;  %v785_v40 = vpop.permute.xlu1 %784 }
 0x16c   : > { %465 = vperm.xlu1 %5824, %v335_v18   ;;  %v879_v32 = vmul.f32 %v6499_v58, %v785_v40 }
 0x16e   : > { %v6698_v53 = vpop.permute.xlu0 %1055 }
 0x16f   : > { %1845 = vperm.xlu0 %5835, %v5170_v17   ;;  %v789_v35 = vpop.permute.xlu1 %788 }
 0x170   : > { %5825 = vset.pattern.permute.xlu1 %v5974_v2  ;;  %v880_v55 = vmul.f32 %v6499_v58, %v789_v35  ;;  %v5186_v35 = vld [vmem:[%s8321_s4 + $0x1c8] sm:$0xff] }
 0x171   : > { %636 = vperm.xlu1 %5825, %v335_v18  }
 0x172   : > { %v6705_v25 = vpop.permute.xlu0 %460 }
 0x173   : > { %1855 = vperm.xlu0 %5835, %v5172_v23  }
 0x174   : > { %v1021_v46 = vpop.permute.xlu1 %1020 }
 0x175   : > { %v1134_v33 = vadd.f32 %v1021_v46, %v910_v54  ;;  %5826 = vset.pattern.permute.xlu1 %v5973_v1  ;;  %v912_v54 = vadd.f32 %v880_v55, %v716_v57  ;;  %v5194_v55 = vld [vmem:[%s8321_s4 + $0x208] sm:$0xff] }
 0x176   : > { %v6712_v34 = vpop.permute.xlu0 %1065  ;;  %832 = vperm.xlu1 %5826, %v335_v18   ;;  %v337_v18 = vld [vmem:[%s8318_s1 + $0xd0] sm:$0xff] }
 0x177   : > { %v1166_v0 = vmax.f32 %v1134_v33, 0.0  ;;  %1865 = vperm.xlu0 %5835, %v5174_v48  }
 0x178   : > { %v6714_v42 = vpop.permute.xlu1 %415 }
 0x179   : > { %v5372_v43 = vpack.c.bf16 %v1166_v0, %v1165_v51 }
 0x17a   : > { %v6719_v26 = vpop.permute.xlu0 %470  ;;  %836 = vperm.xlu1 %5826, %v6264_v20   ;;  %v683_v20 = vmul.f32 %v6481_v38, %v589_v9 }
 0x17b   : > { %1875 = vperm.xlu0 %5835, %v5176_v47   ;;  %5373 = vmatpush1.bf16.msra.mxu0 %v5372_v43 }
 0x17c   : > { %5713 = vmatpush1.bf16.msra.mxu1 %v5372_v43  ;;  %5374 = vmatprep.subr.bf16.mxu0 %v8329_v31  ;;  %v715_v5 = vadd.f32 %v683_v20, %v519_v59  ;;  %v5188_v43 = vld [vmem:[%s8321_s4 + $0x1d8] sm:$0xff]  ;;  %v686_v59 = vmul.f32 %v6481_v38, %v6414_v63 }
 0x17d   : > { %v597_v61 = vpop.permute.xlu1 %596  ;;  %5698 = vmatprep.subr.bf16.mxu1 %v8329_v31 }
 0x17e   : > { %v6730_v19 = vpop.permute.xlu0 %1075  ;;  %5827 = vset.pattern.permute.xlu1 %v5975_v8  ;;  %v911_v60 = vadd.f32 %v879_v32, %v715_v5  ;;  %v522_v32 = vmul.f32 %v6492_v50, %v6628_v11  ;;  %v521_v5 = vmul.f32 %v6492_v50, %v6714_v42  ;;  %v5196_v42 = vld [vmem:[%s8321_s4 + $0x218] sm:$0xff] }
 0x17f   : > { %1885 = vperm.xlu0 %5835, %v5178_v16   ;;  %1080 = vperm.xlu1 %5827, %v954_v49   ;;  %v956_v49 = vld [vmem:[%s8319_s2 + $0xc8] sm:$0xff] }
 0x180   : > { %v1135_v40 = vadd.f32 %v6645_v41, %v911_v60 }
 0x182   : > { %v6747_v9 = vpop.permute.xlu0 %480  ;;  %v793_v17 = vpop.permute.xlu1 %792  ;;  %v1167_v51 = vmax.f32 %v1135_v40, 0.0 }
 0x183   : > { %1895 = vperm.xlu0 %5835, %v5180_v4   ;;  %475 = vperm.xlu1 %5827, %v337_v18   ;;  %v5190_v4 = vld [vmem:[%s8321_s4 + $0x1e8] sm:$0xff] }
 0x186   : > { %v6753_v44 = vpop.permute.xlu0 %1085  ;;  %v797_v23 = vpop.permute.xlu1 %796 }
 0x187   : > { %1905 = vperm.xlu0 %5835, %v5182_v45   ;;  %5828 = vset.pattern.permute.xlu1 %v5974_v2  ;;  %v882_v40 = vmul.f32 %v6499_v58, %v797_v23  ;;  %v5198_v23 = vld [vmem:[%s8321_s4 + $0x228] sm:$0xff] }
 0x188   : > { %644 = vperm.xlu1 %5828, %v337_v18  }
 0x18a   : > { %v6760_v13 = vpop.permute.xlu0 %490 }
 0x18b   : > { %1915 = vperm.xlu0 %5835, %v5184_v14   ;;  %v1031_v46 = vpop.permute.xlu1 %1030  ;;  %v718_v14 = vadd.f32 %v686_v59, %v522_v32 }
 0x18c   : > { %v1136_v48 = vadd.f32 %v1031_v46, %v912_v54  ;;  %5829 = vset.pattern.permute.xlu1 %v5973_v1 }
 0x18d   : > { %840 = vperm.xlu1 %5829, %v337_v18   ;;  %v685_v18 = vmul.f32 %v6481_v38, %v597_v61  ;;  %v881_v61 = vmul.f32 %v6499_v58, %v793_v17  ;;  %v914_v46 = vadd.f32 %v882_v40, %v718_v14  ;;  %v5204_v14 = vld [vmem:[%s8321_s4 + $0x258] sm:$0xff] }
 0x18e   : > { %v1168_v33 = vmax.f32 %v1136_v48, 0.0  ;;  %v6766_v0 = vpop.permute.xlu0 %1095 }
 0x18f   : > { %1925 = vperm.xlu0 %5835, %v5186_v35   ;;  %v6768_v47 = vpop.permute.xlu1 %425  ;;  %v717_v60 = vadd.f32 %v685_v18, %v521_v5  ;;  %v341_v5 = vld [vmem:[%s8318_s1 + $0xf0] sm:$0xff] }
 0x190   : > { %v5375_v41 = vpack.c.bf16 %v1168_v33, %v1167_v51 }
 0x191   : > { %844 = vperm.xlu1 %5829, %v6273_v22   ;;  %v913_v63 = vadd.f32 %v881_v61, %v717_v60  ;;  %v523_v61 = vmul.f32 %v6492_v50, %v6768_v47 }
 0x192   : > { %v6774_v16 = vpop.permute.xlu0 %500  ;;  %5376 = vmatpush1.bf16.msra.mxu0 %v5375_v41  ;;  %5714 = vmatpush1.bf16.msra.mxu1 %v5375_v41 }
 0x193   : > { %1935 = vperm.xlu0 %5835, %v5188_v43   ;;  %5377 = vmatprep.subr.bf16.mxu0 %v8329_v31  ;;  %v1137_v17 = vadd.f32 %v6657_v52, %v913_v63  ;;  %v524_v63 = vmul.f32 %v6492_v50, %v6652_v62 }
 0x194   : > { %v605_v20 = vpop.permute.xlu1 %604  ;;  %5699 = vmatprep.subr.bf16.mxu1 %v8329_v31 }
 0x195   : > { %5830 = vset.pattern.permute.xlu1 %v5975_v8  ;;  %v1169_v41 = vmax.f32 %v1137_v17, 0.0  ;;  %v687_v59 = vmul.f32 %v6481_v38, %v605_v20  ;;  %v688_v20 = vmul.f32 %v6481_v38, %v6418_v3 }
 0x196   : > { %v6785_v22 = vpop.permute.xlu0 %1105  ;;  %1090 = vperm.xlu1 %5830, %v956_v49  }
 0x197   : > { %1945 = vperm.xlu0 %5835, %v5190_v4   ;;  %v5200_v4 = vld [vmem:[%s8321_s4 + $0x238] sm:$0xff]  ;;  %v719_v40 = vadd.f32 %v687_v59, %v523_v61 }
 0x198   : > { %v5838_v59 = vld [vmem:[%s8318_s1 + $0xf8] sm:$0xff] }
 0x199   : > { %v801_v45 = vpop.permute.xlu1 %800 }
 0x19a   : > { %v6801_v57 = vpop.permute.xlu0 %1120  ;;  %485 = vperm.xlu1 %5830, %v339_v39   ;;  %v883_v60 = vmul.f32 %v6499_v58, %v801_v45 }
 0x19b   : > { %1955 = vperm.xlu0 %5835, %v5192_v21  }
 0x19c   : > { %v915_v17 = vadd.f32 %v883_v60, %v719_v40 }
 0x19d   : > { %v805_v11 = vpop.permute.xlu1 %804 }
 0x19e   : > { %v6807_v54 = vpop.permute.xlu0 %1290  ;;  %5831 = vset.pattern.permute.xlu1 %v5974_v2  ;;  %v884_v47 = vmul.f32 %v6499_v58, %v805_v11  ;;  %v1139_v3 = vadd.f32 %v6676_v29, %v915_v17 }
 0x19f   : > { %2320 = vperm.xlu0 %5835, %v5194_v55   ;;  %652 = vperm.xlu1 %5831, %v339_v39  }
 0x1a2   : > { %v6814_v48 = vpop.permute.xlu0 %1300  ;;  %v1041_v35 = vpop.permute.xlu1 %1040 }
 0x1a3   : > { %v1138_v33 = vadd.f32 %v1041_v35, %v914_v46  ;;  %2330 = vperm.xlu0 %5835, %v5196_v42   ;;  %5832 = vset.pattern.permute.xlu1 %v5973_v1  ;;  %v5206_v46 = vld [vmem:[%s8321_s4 + $0x268] sm:$0xff]  ;;  %v720_v35 = vadd.f32 %v688_v20, %v524_v63  ;;  %v961_v63 = vld [vmem:[%s8319_s2 + $0xf0] sm:$0xff] }
 0x1a4   : > { %848 = vperm.xlu1 %5832, %v339_v39   ;;  %v958_v39 = vld [vmem:[%s8319_s2 + $0xd8] sm:$0xff] }
 0x1a5   : > { %v1170_v51 = vmax.f32 %v1138_v33, 0.0  ;;  %v916_v62 = vadd.f32 %v884_v47, %v720_v35  ;;  %v526_v35 = vmul.f32 %v6492_v50, %v6665_v56  ;;  %v1253_v56 = vld [vmem:[%s8321_s4 + $0x10] sm:$0xff] }
 0x1a6   : > { %v6820_v43 = vpop.permute.xlu0 %1310  ;;  %v6822_v49 = vpop.permute.xlu1 %435 }
 0x1a7   : > { %2340 = vperm.xlu0 %5835, %v5198_v23   ;;  %v5378_v52 = vpack.c.bf16 %v1170_v51, %v1169_v41  ;;  %v5208_v23 = vld [vmem:[%s8321_s4 + $0x278] sm:$0xff]  ;;  %v525_v17 = vmul.f32 %v6492_v50, %v6822_v49  ;;  %v1251_v49 = vld [vmem:[%s8321_s4] sm:$0xff] }
 0x1a8   : > { %852 = vperm.xlu1 %5832, %v6283_v24   ;;  %v5202_v24 = vld [vmem:[%s8321_s4 + $0x248] sm:$0xff] }
 0x1a9   : > { %5379 = vmatpush1.bf16.msra.mxu0 %v5378_v52  ;;  %5715 = vmatpush1.bf16.msra.mxu1 %v5378_v52  ;;  %v5210_v52 = vld [vmem:[%s8321_s4 + $0x288] sm:$0xff] }
 0x1aa   : > { %v6828_v18 = vpop.permute.xlu0 %1320  ;;  %5380 = vmatprep.subr.bf16.mxu0 %v8329_v31  ;;  %5700 = vmatprep.subr.bf16.mxu1 %v8329_v31 }
 0x1ab   : > { %2350 = vperm.xlu0 %5835, %v5200_v4   ;;  %v613_v21 = vpop.permute.xlu1 %612  ;;  %v1171_v4 = vmax.f32 %v1139_v3, 0.0 }
 0x1ac   : > { %5833 = vset.pattern.permute.xlu1 %v5975_v8  ;;  %v689_v20 = vmul.f32 %v6481_v38, %v613_v21  ;;  %v690_v21 = vmul.f32 %v6481_v38, %v6427_v6  ;;  %v5218_v6 = vld [vmem:[%s8321_s4 + $0x2c8] sm:$0xff] }
 0x1ad   : > { %1100 = vperm.xlu1 %5833, %v958_v39  }
 0x1ae   : > { %v6840_v32 = vpop.permute.xlu0 %1330  ;;  %v721_v3 = vadd.f32 %v689_v20, %v525_v17 }
 0x1af   : > { %2360 = vperm.xlu0 %5835, %v5202_v24  }
 0x1b0   : > { %v809_v55 = vpop.permute.xlu1 %808 }
 0x1b1   : > { %495 = vperm.xlu1 %5833, %v341_v5   ;;  %v885_v47 = vmul.f32 %v6499_v58, %v809_v55 }
 0x1b2   : > { %v6855_v42 = vpop.permute.xlu0 %1340 }
 0x1b3   : > { %2370 = vperm.xlu0 %5835, %v5204_v14   ;;  %v5214_v14 = vld [vmem:[%s8321_s4 + $0x2a8] sm:$0xff]  ;;  %v917_v55 = vadd.f32 %v885_v47, %v721_v3  ;;  %v5224_v3 = vld [vmem:[%s8321_s4 + $0x2f8] sm:$0xff] }
 0x1b4   : > { %v813_v45 = vpop.permute.xlu1 %812  ;;  %v5222_v47 = vld [vmem:[%s8321_s4 + $0x2e8] sm:$0xff] }
 0x1b5   : > { %5834 = vset.pattern.permute.xlu1 %v5974_v2 }
 0x1b6   : > { %v6862_v33 = vpop.permute.xlu0 %1350  ;;  %660 = vperm.xlu1 %5834, %v341_v5  }
 0x1b7   : > { %2380 = vperm.xlu0 %5835, %v5206_v46   ;;  %v5216_v46 = vld [vmem:[%s8321_s4 + $0x2b8] sm:$0xff] }
 0x1b9   : > { %v1051_v11 = vpop.permute.xlu1 %1050 }
 0x1ba   : > { %v1140_v51 = vadd.f32 %v1051_v11, %v916_v62  ;;  %v6868_v41 = vpop.permute.xlu0 %1360  ;;  %5836 = vset.pattern.permute.xlu1 %v5973_v1  ;;  %v5212_v1 = vld [vmem:[%s8321_s4 + $0x298] sm:$0xff] }
 0x1bb   : > { %2390 = vperm.xlu0 %5835, %v5208_v23   ;;  %856 = vperm.xlu1 %5836, %v341_v5   ;;  %v960_v5 = vld [vmem:[%s8319_s2 + $0xe8] sm:$0xff]  ;;  %v886_v23 = vmul.f32 %v6499_v58, %v813_v45  ;;  %v1220_v45 = vld [vmem:[#allocation6 + $0x108] sm:$0xff] }
 0x1bc   : > { %v1172_v2 = vmax.f32 %v1140_v51, 0.0  ;;  %v722_v51 = vadd.f32 %v690_v21, %v526_v35  ;;  %1587 = vmatprep.mubr.f32.mxu1 %v1220_v45  ;;  %v1257_v21 = vld [vmem:[%s8321_s4 + $0x30] sm:$0xff] }
 0x1bd   : > { %v6874_v29 = vpop.permute.xlu1 %445 }
 0x1be   : > { %v6876_v39 = vpop.permute.xlu0 %1370  ;;  %v5381_v24 = vpack.c.bf16 %v1172_v2, %v1171_v4  ;;  %v918_v4 = vadd.f32 %v886_v23, %v722_v51  ;;  %v5226_v51 = vld [vmem:[%s8321_s4 + $0x308] sm:$0xff] }
 0x1bf   : > { %2400 = vperm.xlu0 %5835, %v5210_v52   ;;  %860 = vperm.xlu1 %5836, %v5838_v59   ;;  %v1141_v52 = vadd.f32 %v6698_v53, %v917_v55  ;;  %v1259_v55 = vld [vmem:[%s8321_s4 + $0x40] sm:$0xff] }
 0x1c0   : > { %5382 = vmatpush1.bf16.msra.mxu0 %v5381_v24  ;;  %5716 = vmatpush1.bf16.msra.mxu1 %v5381_v24  ;;  %v1188_v24 = vld [vmem:[#allocation6 + $0x8] sm:$0xff] }
 0x1c1   : > { %5383 = vmatprep.subr.bf16.mxu0 %v8329_v31  ;;  %5701 = vmatprep.subr.bf16.mxu1 %v8329_v31 }
 0x1c2   : > { %v6889_v61 = vpop.permute.xlu0 %1380  ;;  %v621_v60 = vpop.permute.xlu1 %620  ;;  %1507 = vmatprep.mubr.f32.mxu0 %v1188_v24 }
 0x1c3   : > { %2410 = vperm.xlu0 %5835, %v5212_v1   ;;  %5837 = vset.pattern.permute.xlu1 %v5975_v8  ;;  %v5220_v1 = vld [vmem:[%s8321_s4 + $0x2d8] sm:$0xff] }
 0x1c4   : > { %1110 = vperm.xlu1 %5837, %v960_v5  }
 0x1c6   : > { %v6899_v40 = vpop.permute.xlu0 %1390 }
 0x1c7   : > { %2420 = vperm.xlu0 %5835, %v5214_v14   ;;  %v817_v8 = vpop.permute.xlu1 %816  ;;  %v1255_v14 = vld [vmem:[%s8321_s4 + $0x20] sm:$0xff] }
 0x1c8   : > { %1115 = vperm.xlu1 %5837, %v961_v63   ;;  %v1173_v63 = vmax.f32 %v1141_v52, 0.0  ;;  %v527_v52 = vmul.f32 %v6492_v50, %v6874_v29  ;;  %v1263_v29 = vld [vmem:[%s8321_s4 + $0x60] sm:$0xff] }
 0x1ca   : > { %v6914_v62 = vpop.permute.xlu0 %1400 }
 0x1cb   : > { %2430 = vperm.xlu0 %5835, %v5216_v46   ;;  %v821_v11 = vpop.permute.xlu1 %820 }
 0x1cc   : > { %1285 = vperm.xlu1 %5837, %v1251_v49  }
 0x1ce   : > { %v6923_v2 = vpop.permute.xlu0 %1410 }
 0x1cf   : > { %2440 = vperm.xlu0 %5835, %v5218_v6   ;;  %v691_v6 = vmul.f32 %v6481_v38, %v621_v60  ;;  %v692_v60 = vmul.f32 %v6481_v38, %v6430_v7 }
 0x1d0   : > { %1295 = vperm.xlu1 %5837, %v1253_v56   ;;  %v1061_v59 = vpop.permute.xlu1 %1060  ;;  %v1261_v56 = vld [vmem:[%s8321_s4 + $0x50] sm:$0xff] }
 0x1d1   : > { %v1142_v5 = vadd.f32 %v1061_v59, %v918_v4  ;;  %v887_v4 = vmul.f32 %v6499_v58, %v817_v8  ;;  %v528_v59 = vmul.f32 %v6492_v50, %v6686_v10  ;;  %v5230_v10 = vld [vmem:[%s8321_s4 + $0x328] sm:$0xff] }
 0x1d2   : > { %v6932_v20 = vpop.permute.xlu0 %1420 }
 0x1d3   : > { %v1174_v53 = vmax.f32 %v1142_v5, 0.0  ;;  %2450 = vperm.xlu0 %5835, %v5220_v1   ;;  %v723_v1 = vadd.f32 %v691_v6, %v527_v52  ;;  %v5228_v5 = vld [vmem:[%s8321_s4 + $0x318] sm:$0xff]  ;;  %v724_v7 = vadd.f32 %v692_v60, %v528_v59  ;;  %v5234_v59 = vld [vmem:[%s8321_s4 + $0x348] sm:$0xff] }
 0x1d4   : > { %1305 = vperm.xlu1 %5837, %v1255_v14   ;;  %v6934_v17 = vpop.permute.xlu1 %455  ;;  %v888_v14 = vmul.f32 %v6499_v58, %v821_v11  ;;  %v5232_v6 = vld [vmem:[%s8321_s4 + $0x338] sm:$0xff] }
 0x1d5   : > { %v5384_v46 = vpack.c.bf16 %v1174_v53, %v1173_v63  ;;  %v919_v8 = vadd.f32 %v887_v4, %v723_v1  ;;  %v1269_v1 = vld [vmem:[%s8321_s4 + $0x90] sm:$0xff] }
 0x1d6   : > { %v6942_v35 = vpop.permute.xlu0 %1430 }
 0x1d7   : > { %2460 = vperm.xlu0 %5835, %v5222_v47   ;;  %5385 = vmatpush1.bf16.msra.mxu0 %v5384_v46  ;;  %v1265_v47 = vld [vmem:[%s8321_s4 + $0x70] sm:$0xff] }
 0x1d8   : > { %5717 = vmatpush1.bf16.msra.mxu1 %v5384_v46  ;;  %1315 = vperm.xlu1 %5837, %v1257_v21   ;;  %v1143_v46 = vadd.f32 %v6712_v34, %v919_v8  ;;  %v5236_v8 = vld [vmem:[%s8321_s4 + $0x358] sm:$0xff] }
 0x1d9   : > { %v629_v49 = vpop.permute.xlu1 %628  ;;  %5386 = vmatprep.subr.bf16.mxu0 %v8329_v31  ;;  %5702 = vmatprep.subr.bf16.mxu1 %v8329_v31 }
 0x1da   : > { %v6952_v23 = vpop.permute.xlu0 %1440  ;;  %v1175_v4 = vmax.f32 %v1143_v46, 0.0  ;;  %v529_v46 = vmul.f32 %v6492_v50, %v6934_v17  ;;  %v5240_v17 = vld [vmem:[%s8321_s4 + $0x378] sm:$0xff] }
 0x1db   : > { %2470 = vperm.xlu0 %5835, %v5224_v3   ;;  %v920_v3 = vadd.f32 %v888_v14, %v724_v7  ;;  %v1271_v14 = vld [vmem:[%s8321_s4 + $0xa0] sm:$0xff] }
 0x1dc   : > { %1325 = vperm.xlu1 %5837, %v1259_v55  }
 0x1de   : > { %v6964_v24 = vpop.permute.xlu0 %1805  ;;  %v825_v45 = vpop.permute.xlu1 %824 }
 0x1df   : > { %2835 = vperm.xlu0 %5835, %v5226_v51   ;;  %v1267_v51 = vld [vmem:[%s8321_s4 + $0x80] sm:$0xff] }
 0x1e0   : > { %1335 = vperm.xlu1 %5837, %v1261_v56  }
 0x1e2   : > { %v6977_v53 = vpop.permute.xlu0 %1815  ;;  %v829_v63 = vpop.permute.xlu1 %828 }
 0x1e3   : > { %2845 = vperm.xlu0 %5835, %v5228_v5  }
 0x1e4   : > { %1345 = vperm.xlu1 %5837, %v1263_v29  }
 0x1e6   : > { %v6986_v21 = vpop.permute.xlu0 %1825 }
 0x1e7   : > { %2855 = vperm.xlu0 %5835, %v5230_v10   ;;  %v1071_v11 = vpop.permute.xlu1 %1070  ;;  %v693_v10 = vmul.f32 %v6481_v38, %v629_v49  ;;  %v694_v49 = vmul.f32 %v6481_v38, %v6442_v12 }
 0x1e8   : > { %v1144_v55 = vadd.f32 %v1071_v11, %v920_v3  ;;  %1355 = vperm.xlu1 %5837, %v1265_v47   ;;  %v5238_v47 = vld [vmem:[%s8321_s4 + $0x368] sm:$0xff]  ;;  %v889_v3 = vmul.f32 %v6499_v58, %v825_v45 }
 0x1ea   : > { %v1176_v56 = vmax.f32 %v1144_v55, 0.0  ;;  %v6994_v52 = vpop.permute.xlu0 %1835  ;;  %v1273_v55 = vld [vmem:[%s8321_s4 + $0xb0] sm:$0xff] }
 0x1eb   : > { %2865 = vperm.xlu0 %5835, %v5232_v6   ;;  %v6996_v34 = vpop.permute.xlu1 %465 }
 0x1ec   : > { %1365 = vperm.xlu1 %5837, %v1267_v51   ;;  %v5387_v60 = vpack.c.bf16 %v1176_v56, %v1175_v4  ;;  %v530_v51 = vmul.f32 %v6492_v50, %v6705_v25  ;;  %v725_v56 = vadd.f32 %v693_v10, %v529_v46  ;;  %v890_v4 = vmul.f32 %v6499_v58, %v829_v63  ;;  %v5242_v25 = vld [vmem:[%s8321_s4 + $0x388] sm:$0xff]  ;;  %v1277_v63 = vld [vmem:[%s8321_s4 + $0xd0] sm:$0xff] }
 0x1ee   : > { %v7004_v5 = vpop.permute.xlu0 %1845  ;;  %5388 = vmatpush1.bf16.msra.mxu0 %v5387_v60  ;;  %5718 = vmatpush1.bf16.msra.mxu1 %v5387_v60  ;;  %v921_v45 = vadd.f32 %v889_v3, %v725_v56  ;;  %v726_v12 = vadd.f32 %v694_v49, %v530_v51  ;;  %v5244_v3 = vld [vmem:[%s8321_s4 + $0x398] sm:$0xff] }
 0x1ef   : > { %2875 = vperm.xlu0 %5835, %v5234_v59   ;;  %5389 = vmatprep.subr.bf16.mxu0 %v8329_v31  ;;  %v1275_v59 = vld [vmem:[%s8321_s4 + $0xc0] sm:$0xff] }
 0x1f0   : > { %1375 = vperm.xlu1 %5837, %v1269_v1   ;;  %v637_v29 = vpop.permute.xlu1 %636  ;;  %5703 = vmatprep.subr.bf16.mxu1 %v8329_v31 }
 0x1f2   : > { %v7014_v7 = vpop.permute.xlu0 %1855 }
 0x1f3   : > { %2885 = vperm.xlu0 %5835, %v5236_v8   ;;  %v1145_v8 = vadd.f32 %v6730_v19, %v921_v45  ;;  %v1279_v19 = vld [vmem:[%s8321_s4 + $0xe0] sm:$0xff]  ;;  %v5246_v45 = vld [vmem:[%s8321_s4 + $0x3a8] sm:$0xff] }
 0x1f4   : > { %1385 = vperm.xlu1 %5837, %v1271_v14   ;;  %v922_v14 = vadd.f32 %v890_v4, %v726_v12  ;;  %v1281_v4 = vld [vmem:[%s8321_s4 + $0xf0] sm:$0xff] }
 0x1f5   : > { %v833_v11 = vpop.permute.xlu1 %832  ;;  %v1177_v49 = vmax.f32 %v1145_v8, 0.0  ;;  %v5161_v8 = vld [vmem:[%s8321_s4 + $0x100] sm:$0xff] }
 0x1f6   : > { %v7026_v6 = vpop.permute.xlu0 %1865 }
 0x1f7   : > { %2895 = vperm.xlu0 %5835, %v5238_v47  }
 0x1f8   : > { %1395 = vperm.xlu1 %5837, %v1273_v55  }
 0x1f9   : > { %v837_v60 = vpop.permute.xlu1 %836 }
 0x1fa   : > { %v7039_v1 = vpop.permute.xlu0 %1875 }
 0x1fb   : > { %8344 = vst [vmem:[#allocation13_spill] sm:$0xff] %v7039_v1  ;;  %2905 = vperm.xlu0 %5835, %v5240_v17  }
 0x1fc   : > { %1405 = vperm.xlu1 %5837, %v1275_v59  }
 0x1fe   : > { %v7048_v10 = vpop.permute.xlu0 %1885  ;;  %v1081_v47 = vpop.permute.xlu1 %1080 }
 0x1ff   : > { %8345 = vst [vmem:[#allocation14_spill] sm:$0xff] %v7048_v10  ;;  %v1146_v46 = vadd.f32 %v1081_v47, %v922_v14  ;;  %2915 = vperm.xlu0 %5835, %v5242_v25   ;;  %v5248_v25 = vld [vmem:[%s8321_s4 + $0x3b8] sm:$0xff]  ;;  %v695_v14 = vmul.f32 %v6481_v38, %v637_v29  ;;  %v531_v47 = vmul.f32 %v6492_v50, %v6996_v34 }
 0x200   : > { %1415 = vperm.xlu1 %5837, %v1277_v63   ;;  %v696_v29 = vmul.f32 %v6481_v38, %v6449_v15  ;;  %v5165_v15 = vld [vmem:[%s8321_s4 + $0x120] sm:$0xff] }
 0x201   : > { %v1178_v55 = vmax.f32 %v1146_v46, 0.0  ;;  %v891_v46 = vmul.f32 %v6499_v58, %v833_v11 }
 0x202   : > { %v7056_v51 = vpop.permute.xlu0 %1895  ;;  %v7058_v56 = vpop.permute.xlu1 %475 }
 0x203   : > { %8346 = vst [vmem:[#allocation15_spill] sm:$0xff] %v7056_v51  ;;  %2925 = vperm.xlu0 %5835, %v5244_v3   ;;  %v5390_v17 = vpack.c.bf16 %v1178_v55, %v1177_v49  ;;  %v5250_v55 = vld [vmem:[%s8321_s4 + $0x3c8] sm:$0xff]  ;;  %v532_v49 = vmul.f32 %v6492_v50, %v6719_v26 }
 0x204   : > { %1425 = vperm.xlu1 %5837, %v1279_v19   ;;  %v5163_v19 = vld [vmem:[%s8321_s4 + $0x110] sm:$0xff] }
 0x205   : > { %5391 = vmatpush1.bf16.msra.mxu0 %v5390_v17  ;;  %5719 = vmatpush1.bf16.msra.mxu1 %v5390_v17  ;;  %v727_v17 = vadd.f32 %v695_v14, %v531_v47 }
 0x206   : > { %v7066_v59 = vpop.permute.xlu0 %1905  ;;  %5392 = vmatprep.subr.bf16.mxu0 %v8329_v31  ;;  %5704 = vmatprep.subr.bf16.mxu1 %v8329_v31 }
 0x207   : > { %8347 = vst [vmem:[#allocation16_spill] sm:$0xff] %v7066_v59  ;;  %2935 = vperm.xlu0 %5835, %v5246_v45   ;;  %v645_v12 = vpop.permute.xlu1 %644  ;;  %v923_v11 = vadd.f32 %v891_v46, %v727_v17  ;;  %v892_v45 = vmul.f32 %v6499_v58, %v837_v60  ;;  %v5254_v60 = vld [vmem:[%s8321_s4 + $0x3e8] sm:$0xff]  ;;  %v5167_v46 = vld [vmem:[%s8321_s4 + $0x130] sm:$0xff] }
 0x208   : > { %1435 = vperm.xlu1 %5837, %v1281_v4  }
 0x209   : > { %v1147_v26 = vadd.f32 %v6753_v44, %v923_v11  ;;  %v5256_v44 = vld [vmem:[%s8321_s4 + $0x3f8] sm:$0xff]  ;;  %v5169_v11 = vld [vmem:[%s8321_s4 + $0x140] sm:$0xff] }
 0x20a   : > { %v7077_v63 = vpop.permute.xlu0 %1915 }
 0x20b   : > { %8348 = vst [vmem:[#allocation17_spill] sm:$0xff] %v7077_v63  ;;  %2945 = vperm.xlu0 %5835, %v5248_v25   ;;  %v5252_v25 = vld [vmem:[%s8321_s4 + $0x3d8] sm:$0xff] }
 0x20c   : > { %1800 = vperm.xlu1 %5837, %v5161_v8   ;;  %v841_v3 = vpop.permute.xlu1 %840  ;;  %v728_v8 = vadd.f32 %v696_v29, %v532_v49  ;;  %v1179_v49 = vmax.f32 %v1147_v26, 0.0 }
 0x20e   : > { %v7092_v34 = vpop.permute.xlu0 %1925  ;;  %v924_v14 = vadd.f32 %v892_v45, %v728_v8  ;;  %v5171_v8 = vld [vmem:[%s8321_s4 + $0x150] sm:$0xff] }
 0x20f   : > { %8349 = vst [vmem:[#allocation18_spill] sm:$0xff] %v7092_v34  ;;  %2955 = vperm.xlu0 %5835, %v5250_v55  }
 0x210   : > { %1810 = vperm.xlu1 %5837, %v5163_v19   ;;  %v845_v4 = vpop.permute.xlu1 %844 }
 0x212   : > { %v7101_v36 = vpop.permute.xlu0 %1935 }
 0x213   : > { %8350 = vst [vmem:[#allocation19_spill] sm:$0xff] %v7101_v36  ;;  %2965 = vperm.xlu0 %5835, %v5252_v25  }
 0x214   : > { %1820 = vperm.xlu1 %5837, %v5165_v15   ;;  %v5258_v15 = vld [vmem:[%s8321_s4 + $0x408] sm:$0xff] }
 0x215   : > { %v1091_v47 = vpop.permute.xlu1 %1090 }
 0x216   : > { %v1148_v55 = vadd.f32 %v1091_v47, %v924_v14  ;;  %v7110_v19 = vpop.permute.xlu0 %1945  ;;  %v697_v47 = vmul.f32 %v6481_v38, %v645_v12  ;;  %v698_v12 = vmul.f32 %v6481_v38, %v6458_v27  ;;  %v5264_v27 = vld [vmem:[%s8321_s4 + $0x438] sm:$0xff] }
 0x217   : > { %8351 = vst [vmem:[#allocation20_spill] sm:$0xff] %v7110_v19  ;;  %2975 = vperm.xlu0 %5835, %v5254_v60   ;;  %v5260_v60 = vld [vmem:[%s8321_s4 + $0x418] sm:$0xff] }
 0x218   : > { %v1180_v29 = vmax.f32 %v1148_v55, 0.0  ;;  %1830 = vperm.xlu1 %5837, %v5167_v46   ;;  %v5173_v46 = vld [vmem:[%s8321_s4 + $0x160] sm:$0xff] }
 0x219   : > { %v7115_v17 = vpop.permute.xlu1 %485 }
 0x21a   : > { %v7120_v45 = vpop.permute.xlu0 %1955  ;;  %v5393_v25 = vpack.c.bf16 %v1180_v29, %v1179_v49  ;;  %v533_v29 = vmul.f32 %v6492_v50, %v7058_v56  ;;  %v5175_v56 = vld [vmem:[%s8321_s4 + $0x170] sm:$0xff] }
 0x21b   : > { %8352 = vst [vmem:[#allocation21_spill] sm:$0xff] %v7120_v45  ;;  %2985 = vperm.xlu0 %5835, %v5256_v44   ;;  %v893_v44 = vmul.f32 %v6499_v58, %v841_v3 }
 0x21c   : > { %1840 = vperm.xlu1 %5837, %v5169_v11   ;;  %5394 = vmatpush1.bf16.msra.mxu0 %v5393_v25  ;;  %v5262_v11 = vld [vmem:[%s8321_s4 + $0x428] sm:$0xff] }
 0x21d   : > { %5720 = vmatpush1.bf16.msra.mxu1 %v5393_v25  ;;  %5395 = vmatprep.subr.bf16.mxu0 %v8329_v31  ;;  %v534_v25 = vmul.f32 %v6492_v50, %v6747_v9  ;;  %v5177_v9 = vld [vmem:[%s8321_s4 + $0x180] sm:$0xff] }
 0x21e   : > { %v7129_v26 = vpop.permute.xlu0 %2320  ;;  %v653_v14 = vpop.permute.xlu1 %652  ;;  %5705 = vmatprep.subr.bf16.mxu1 %v8329_v31 }
 0x21f   : > { %8353 = vst [vmem:[#allocation22_spill] sm:$0xff] %v7129_v26  ;;  %3350 = vperm.xlu0 %5835, %v5258_v15   ;;  %v729_v15 = vadd.f32 %v697_v47, %v533_v29  ;;  %v730_v31 = vadd.f32 %v698_v12, %v534_v25  ;;  %v5179_v12 = vld [vmem:[%s8321_s4 + $0x190] sm:$0xff] }
 0x220   : > { %1850 = vperm.xlu1 %5837, %v5171_v8  }
 0x221   : > { %v925_v3 = vadd.f32 %v893_v44, %v729_v15 }
 0x222   : > { %v7139_v55 = vpop.permute.xlu0 %2330 }
 0x223   : > { %8354 = vst [vmem:[#allocation23_spill] sm:$0xff] %v7139_v55  ;;  %3360 = vperm.xlu0 %5835, %v5260_v60   ;;  %v849_v49 = vpop.permute.xlu1 %848  ;;  %v894_v60 = vmul.f32 %v6499_v58, %v845_v4  ;;  %v1149_v29 = vadd.f32 %v6766_v0, %v925_v3 }
 0x224   : > { %1860 = vperm.xlu1 %5837, %v5173_v46  }
 0x225   : > { %v926_v44 = vadd.f32 %v894_v60, %v730_v31  ;;  %v1181_v28 = vmax.f32 %v1149_v29, 0.0  ;;  %v5268_v31 = vld [vmem:[%s8321_s4 + $0x458] sm:$0xff]  ;;  %v5181_v60 = vld [vmem:[%s8321_s4 + $0x1a0] sm:$0xff] }
 0x226   : > { %v7154_v8 = vpop.permute.xlu0 %2340 }
 0x227   : > { %8355 = vst [vmem:[#allocation24_spill] sm:$0xff] %v7154_v8  ;;  %3370 = vperm.xlu0 %5835, %v5262_v11   ;;  %v853_v46 = vpop.permute.xlu1 %852  ;;  %v5266_v11 = vld [vmem:[%s8321_s4 + $0x448] sm:$0xff] }
 0x228   : > { %1870 = vperm.xlu1 %5837, %v5175_v56  }
 0x22a   : > { %v7163_v47 = vpop.permute.xlu0 %2350 }
 0x22b   : > { %8356 = vst [vmem:[#allocation25_spill] sm:$0xff] %v7163_v47  ;;  %3380 = vperm.xlu0 %5835, %v5264_v27  }
 0x22c   : > { %1880 = vperm.xlu1 %5837, %v5177_v9   ;;  %v1101_v4 = vpop.permute.xlu1 %1100  ;;  %v5270_v9 = vld [vmem:[%s8321_s4 + $0x468] sm:$0xff] }
 0x22d   : > { %v1150_v15 = vadd.f32 %v1101_v4, %v926_v44  ;;  %v5183_v44 = vld [vmem:[%s8321_s4 + $0x1b0] sm:$0xff] }
 0x22e   : > { %v7172_v25 = vpop.permute.xlu0 %2360 }
 0x22f   : > { %8357 = vst [vmem:[#allocation26_spill] sm:$0xff] %v7172_v25  ;;  %v1182_v56 = vmax.f32 %v1150_v15, 0.0  ;;  %3390 = vperm.xlu0 %5835, %v5266_v11   ;;  %v699_v11 = vmul.f32 %v6481_v38, %v653_v14  ;;  %v5272_v15 = vld [vmem:[%s8321_s4 + $0x478] sm:$0xff]  ;;  %v700_v14 = vmul.f32 %v6481_v38, %v6468_v30  ;;  %v896_v30 = vmul.f32 %v6499_v58, %v853_v46  ;;  %v5189_v46 = vld [vmem:[%s8321_s4 + $0x1e0] sm:$0xff] }
 0x230   : > { %1890 = vperm.xlu1 %5837, %v5179_v12   ;;  %v496_v0 = vpop.permute.xlu1 %495  ;;  %v535_v12 = vmul.f32 %v6492_v50, %v7115_v17  ;;  %v536_v17 = vmul.f32 %v6492_v50, %v6760_v13  ;;  %v1250_v25 = vld [vmem:[#allocation6 + $0x1f8] sm:$0xff] }
 0x231   : > { %v5396_v3 = vpack.c.bf16 %v1182_v56, %v1181_v28  ;;  %v8359_v28 = vmov 0.0|0.0   ;;  %v895_v56 = vmul.f32 %v6499_v58, %v849_v49  ;;  %v538_v49 = vmul.f32 %v6492_v50, %v6774_v16 }
 0x232   : > { %v7180_v27 = vpop.permute.xlu0 %2370 }
 0x233   : > { %8358 = vst [vmem:[#allocation27_spill] sm:$0xff] %v7180_v27  ;;  %3400 = vperm.xlu0 %5835, %v5268_v31   ;;  %5397 = vmatpush1.bf16.msra.mxu0 %v5396_v3  ;;  %v5185_v31 = vld [vmem:[%s8321_s4 + $0x1c0] sm:$0xff]  ;;  %v1248_v27 = vld [vmem:[#allocation6 + $0x1e8] sm:$0xff] }
 0x234   : > { %5721 = vmatpush1.bf16.msra.mxu1 %v5396_v3  ;;  %1900 = vperm.xlu1 %5837, %v5181_v60  }
 0x235   : > { %v661_v29 = vpop.permute.xlu1 %660  ;;  %5398 = vmatprep.subr.bf16.mxu0 %v8359_v28  ;;  %5706 = vmatprep.subr.bf16.mxu1 %v8359_v28 }
 0x236   : > { %v7190_v4 = vpop.permute.xlu0 %2380 }
 0x237   : > { %8360 = vst [vmem:[#allocation28_spill] sm:$0xff] %v7190_v4  ;;  %3410 = vperm.xlu0 %5835, %v5270_v9   ;;  %v731_v4 = vadd.f32 %v699_v11, %v535_v12  ;;  %v702_v9 = vmul.f32 %v6481_v38, %v6478_v37  ;;  %v5187_v11 = vld [vmem:[%s8321_s4 + $0x1d0] sm:$0xff]  ;;  %v732_v12 = vadd.f32 %v700_v14, %v536_v17 }
 0x238   : > { %1910 = vperm.xlu1 %5837, %v5183_v44   ;;  %v5274_v44 = vld [vmem:[%s8321_s4 + $0x488] sm:$0xff] }
 0x239   : > { %v734_v16 = vadd.f32 %v702_v9, %v538_v49  ;;  %v928_v9 = vadd.f32 %v896_v30, %v732_v12  ;;  %v5193_v12 = vld [vmem:[%s8321_s4 + $0x200] sm:$0xff] }
 0x23a   : > { %v7202_v3 = vpop.permute.xlu0 %2390  ;;  %v857_v60 = vpop.permute.xlu1 %856 }
 0x23b   : > { %8361 = vst [vmem:[#allocation29_spill] sm:$0xff] %v7202_v3  ;;  %3420 = vperm.xlu0 %5835, %v5272_v15   ;;  %v927_v3 = vadd.f32 %v895_v56, %v731_v4  ;;  %v5276_v4 = vld [vmem:[%s8321_s4 + $0x498] sm:$0xff] }
 0x23c   : > { %1920 = vperm.xlu1 %5837, %v5185_v31   ;;  %v701_v31 = vmul.f32 %v6481_v38, %v661_v29 }
 0x23d   : > { %v1151_v56 = vadd.f32 %v6785_v22, %v927_v3  ;;  %v5278_v22 = vld [vmem:[%s8321_s4 + $0x4a8] sm:$0xff]  ;;  %v5191_v3 = vld [vmem:[%s8321_s4 + $0x1f0] sm:$0xff] }
 0x23e   : > { %v7219_v15 = vpop.permute.xlu0 %2400  ;;  %v861_v37 = vpop.permute.xlu1 %860 }
 0x23f   : > { %8362 = vst [vmem:[#allocation30_spill] sm:$0xff] %v7219_v15  ;;  %v898_v13 = vmul.f32 %v6499_v58, %v861_v37  ;;  %3430 = vperm.xlu0 %5835, %v5274_v44   ;;  %v537_v15 = vmul.f32 %v6492_v50, %v496_v0  ;;  %v897_v37 = vmul.f32 %v6499_v58, %v857_v60  ;;  %v1183_v49 = vmax.f32 %v1151_v56, 0.0 }
 0x240   : > { %1930 = vperm.xlu1 %5837, %v5187_v11  }
 0x241   : > { %v930_v44 = vadd.f32 %v898_v13, %v734_v16  ;;  %v733_v29 = vadd.f32 %v701_v31, %v537_v15  ;;  %v5280_v13 = vld [vmem:[%s8321_s4 + $0x4b8] sm:$0xff] }
 0x242   : > { %v7232_v14 = vpop.permute.xlu0 %2410 }
 0x243   : > { %8363 = vst [vmem:[#allocation31_spill] sm:$0xff] %v7232_v14  ;;  %3440 = vperm.xlu0 %5835, %v5276_v4   ;;  %v1111_v38 = vpop.permute.xlu1 %1110  ;;  %v1154_v50 = vadd.f32 %v6801_v57, %v930_v44  ;;  %v929_v60 = vadd.f32 %v897_v37, %v733_v29  ;;  %v5195_v37 = vld [vmem:[%s8321_s4 + $0x210] sm:$0xff]  ;;  %v1246_v14 = vld [vmem:[#allocation6 + $0x1d8] sm:$0xff] }
 0x244   : > { %v1152_v17 = vadd.f32 %v1111_v38, %v928_v9  ;;  %1940 = vperm.xlu1 %5837, %v5189_v46   ;;  %v5282_v46 = vld [vmem:[%s8321_s4 + $0x4c8] sm:$0xff] }
 0x245   : > { %v1186_v31 = vmax.f32 %v1154_v50, 0.0  ;;  %v1187_v44 = vld [vmem:[#allocation6] sm:$0xff]  ;;  %v5197_v50 = vld [vmem:[%s8321_s4 + $0x220] sm:$0xff] }
 0x246   : > { %v1184_v58 = vmax.f32 %v1152_v17, 0.0  ;;  %v7241_v0 = vpop.permute.xlu0 %2420  ;;  %v1219_v9 = vld [vmem:[#allocation6 + $0x100] sm:$0xff]  ;;  %v1190_v17 = vld [vmem:[#allocation6 + $0x18] sm:$0xff] }
 0x247   : > { %8364 = vst [vmem:[#allocation32_spill] sm:$0xff] %v7241_v0  ;;  %3450 = vperm.xlu0 %5835, %v5278_v22   ;;  %v1116_v11 = vpop.permute.xlu1 %1115  ;;  %v1222_v22 = vld [vmem:[#allocation6 + $0x118] sm:$0xff]  ;;  %v1244_v0 = vld [vmem:[#allocation6 + $0x1c8] sm:$0xff] }
 0x248   : > { %v1153_v30 = vadd.f32 %v1116_v11, %v929_v60  ;;  %1950 = vperm.xlu1 %5837, %v5191_v3   ;;  %v5399_v15 = vpack.c.bf16 %v1184_v58, %v1183_v49  ;;  %v5284_v3 = vld [vmem:[%s8321_s4 + $0x4d8] sm:$0xff] }
 0x249   : > { %v1189_v58 = vld [vmem:[#allocation6 + $0x10] sm:$0xff]  ;;  %v1192_v11 = vld [vmem:[#allocation6 + $0x28] sm:$0xff] }
 0x24a   : > { %v1185_v16 = vmax.f32 %v1153_v30, 0.0  ;;  %v7249_v57 = vpop.permute.xlu0 %2430  ;;  %5400 = vmatpush1.bf16.msra.mxu0 %v5399_v15  ;;  %5722 = vmatpush1.bf16.msra.mxu1 %v5399_v15  ;;  %v1221_v60 = vld [vmem:[#allocation6 + $0x110] sm:$0xff]  ;;  %v1224_v30 = vld [vmem:[#allocation6 + $0x128] sm:$0xff]  ;;  %v5286_v15 = vld [vmem:[%s8321_s4 + $0x4e8] sm:$0xff] }
 0x24b   : > { %8365 = vst [vmem:[#allocation33_spill] sm:$0xff] %v7249_v57  ;;  %3460 = vperm.xlu0 %5835, %v5280_v13   ;;  %v7251_v4 = vpop.permute.xlu1 %1285  ;;  %5401 = vmatprep.subr.bf16.mxu0 %v8359_v28  ;;  %v1242_v57 = vld [vmem:[#allocation6 + $0x1b8] sm:$0xff] }
 0x24c   : > { %2315 = vperm.xlu1 %5837, %v5193_v12   ;;  %5707 = vmatprep.subr.bf16.mxu1 %v8359_v28  ;;  %v5402_v56 = vpack.c.bf16 %v1186_v31, %v1185_v16  ;;  %v5199_v12 = vld [vmem:[%s8321_s4 + $0x230] sm:$0xff] }
 0x24d   : > { %v1191_v16 = vld [vmem:[#allocation6 + $0x20] sm:$0xff] }
 0x24e   : > { %5403 = vmatpush1.bf16.msra.mxu0 %v5402_v56  ;;  %5723 = vmatpush1.bf16.msra.mxu1 %v5402_v56  ;;  %v7261_v38 = vpop.permute.xlu0 %2440  ;;  %v1223_v31 = vld [vmem:[#allocation6 + $0x120] sm:$0xff] }
 0x24f   : > { %8366 = vst [vmem:[#allocation34_spill] sm:$0xff] %v7261_v38  ;;  %3470 = vperm.xlu0 %5835, %v5282_v46   ;;  %v7263_v29 = vpop.permute.xlu1 %1295  ;;  %5404 = vmatprep.subr.bf16.mxu1 %v8359_v28  ;;  %v1194_v46 = vld [vmem:[#allocation6 + $0x38] sm:$0xff]  ;;  %v1240_v38 = vld [vmem:[#allocation6 + $0x1a8] sm:$0xff] }
 0x250   : > { %2325 = vperm.xlu1 %5837, %v5195_v37   ;;  %5452 = vmatprep.subr.bf16.mxu0 %v8359_v28  ;;  %v1226_v37 = vld [vmem:[#allocation6 + $0x138] sm:$0xff] }
 0x251   : > { %1508 = vmatmul.mubr.f32.vlgmr.msra.gmra.mrb[0].mxu0 %v1187_v44  ;;  %1588 = vmatmul.mubr.f32.vlgmr.msra.gmra.mrb[0].mxu1 %v1219_v9  ;;  %v5288_v44 = vld [vmem:[%s8321_s4 + $0x4f8] sm:$0xff]  ;;  %v5201_v9 = vld [vmem:[%s8321_s4 + $0x240] sm:$0xff] }
 0x252   : > { %1512 = vmatprep.mubr.f32.mxu0 %v1190_v17  ;;  %1592 = vmatprep.mubr.f32.mxu1 %v1222_v22  ;;  %v7278_v13 = vpop.permute.xlu0 %2450  ;;  %v1193_v17 = vld [vmem:[#allocation6 + $0x30] sm:$0xff] }
 0x253   : > { %3480 = vperm.xlu0 %5835, %v5284_v3   ;;  %v7273_v49 = vpop.permute.xlu1 %1305  ;;  %8367 = vst [vmem:[#allocation35_spill] sm:$0xff] %v7278_v13  ;;  %v1225_v22 = vld [vmem:[#allocation6 + $0x130] sm:$0xff]  ;;  %v1238_v13 = vld [vmem:[#allocation6 + $0x198] sm:$0xff] }
 0x254   : > { %2335 = vperm.xlu1 %5837, %v5197_v50  }
 0x255   : > { %1513 = vmatmul.mubr.f32.gmra.mrb[2].mxu0 %v1189_v58  ;;  %1593 = vmatmul.mubr.f32.gmra.mrb[2].mxu1 %v1221_v60  ;;  %v1196_v58 = vld [vmem:[#allocation6 + $0x48] sm:$0xff] }
 0x256   : > { %1517 = vmatprep.mubr.f32.mxu0 %v1192_v11  ;;  %1597 = vmatprep.mubr.f32.mxu1 %v1224_v30  ;;  %v7291_v3 = vpop.permute.xlu0 %2460  ;;  %v1228_v60 = vld [vmem:[#allocation6 + $0x148] sm:$0xff]  ;;  %v5290_v11 = vld [vmem:[%s8321_s4 + $0x508] sm:$0xff] }
 0x257   : > { %3490 = vperm.xlu0 %5835, %v5286_v15   ;;  %v7283_v56 = vpop.permute.xlu1 %1315  ;;  %8368 = vst [vmem:[#allocation36_spill] sm:$0xff] %v7291_v3  ;;  %v5203_v30 = vld [vmem:[%s8321_s4 + $0x250] sm:$0xff] }
 0x258   : > { %2345 = vperm.xlu1 %5837, %v5199_v12   ;;  %v1195_v15 = vld [vmem:[#allocation6 + $0x40] sm:$0xff]  ;;  %v1236_v3 = vld [vmem:[#allocation6 + $0x188] sm:$0xff] }
 0x259   : > { %1518 = vmatmul.mubr.f32.gmra.mrb[4].mxu0 %v1191_v16  ;;  %1598 = vmatmul.mubr.f32.gmra.mrb[4].mxu1 %v1223_v31  ;;  %v1227_v12 = vld [vmem:[#allocation6 + $0x140] sm:$0xff]  ;;  %v1198_v31 = vld [vmem:[#allocation6 + $0x58] sm:$0xff] }
 0x25a   : > { %1522 = vmatprep.mubr.f32.mxu0 %v1194_v46  ;;  %1602 = vmatprep.mubr.f32.mxu1 %v1226_v37  ;;  %v1230_v46 = vld [vmem:[#allocation6 + $0x158] sm:$0xff]  ;;  %v5292_v37 = vld [vmem:[%s8321_s4 + $0x518] sm:$0xff] }
 0x25b   : > { %3500 = vperm.xlu0 %5835, %v5288_v44   ;;  %v7293_v50 = vpop.permute.xlu1 %1325  ;;  %v7306_v44 = vpop.permute.xlu0 %2470 }
 0x25c   : > { %2355 = vperm.xlu1 %5837, %v5201_v9   ;;  %8369 = vst [vmem:[#allocation37_spill] sm:$0xff] %v7306_v44  ;;  %v5205_v9 = vld [vmem:[%s8321_s4 + $0x260] sm:$0xff] }
 0x25d   : > { %1523 = vmatmul.mubr.f32.gmra.mrb[6].mxu0 %v1193_v17  ;;  %1603 = vmatmul.mubr.f32.gmra.mrb[6].mxu1 %v1225_v22  ;;  %v1197_v17 = vld [vmem:[#allocation6 + $0x50] sm:$0xff]  ;;  %v1234_v44 = vld [vmem:[#allocation6 + $0x178] sm:$0xff] }
 0x25e   : > { %1527 = vmatprep.mubr.f32.mxu0 %v1196_v58  ;;  %1607 = vmatprep.mubr.f32.mxu1 %v1228_v60  ;;  %v1229_v22 = vld [vmem:[#allocation6 + $0x150] sm:$0xff]  ;;  %v1200_v60 = vld [vmem:[#allocation6 + $0x68] sm:$0xff] }
 0x25f   : > { %3865 = vperm.xlu0 %5835, %v5290_v11   ;;  %v7301_v16 = vpop.permute.xlu1 %1335  ;;  %v1232_v11 = vld [vmem:[#allocation6 + $0x168] sm:$0xff] }
 0x260   : > { %2365 = vperm.xlu1 %5837, %v5203_v30   ;;  %v5294_v30 = vld [vmem:[%s8321_s4 + $0x528] sm:$0xff] }
 0x261   : > { %1528 = vmatmul.mubr.f32.gmra.mrb[8].mxu0 %v1195_v15  ;;  %1608 = vmatmul.mubr.f32.gmra.mrb[8].mxu1 %v1227_v12  ;;  %v5207_v15 = vld [vmem:[%s8321_s4 + $0x270] sm:$0xff] }
 0x262   : > { %1532 = vmatprep.mubr.f32.mxu0 %v1198_v31  ;;  %1612 = vmatprep.mubr.f32.mxu1 %v1230_v46  ;;  %v1199_v12 = vld [vmem:[#allocation6 + $0x60] sm:$0xff]  ;;  %v7319_v46 = vpop.permute.xlu0 %2835 }
 0x263   : > { %3875 = vperm.xlu0 %5835, %v5292_v37   ;;  %v7311_v58 = vpop.permute.xlu1 %1345  ;;  %v1231_v31 = vld [vmem:[#allocation6 + $0x160] sm:$0xff]  ;;  %8370 = vst [vmem:[#allocation38_spill] sm:$0xff] %v7319_v46  ;;  %v1204_v46 = vld [vmem:[#allocation6 + $0x88] sm:$0xff] }
 0x264   : > { %2375 = vperm.xlu1 %5837, %v5205_v9   ;;  %v1202_v9 = vld [vmem:[#allocation6 + $0x78] sm:$0xff] }
 0x265   : > { %1533 = vmatmul.mubr.f32.gmra.mrb[10].mxu0 %v1197_v17  ;;  %1613 = vmatmul.mubr.f32.gmra.mrb[10].mxu1 %v1229_v22  ;;  %v5296_v17 = vld [vmem:[%s8321_s4 + $0x538] sm:$0xff]  ;;  %v5209_v22 = vld [vmem:[%s8321_s4 + $0x280] sm:$0xff] }
 0x266   : > { %1537 = vmatprep.mubr.f32.mxu0 %v1200_v60  ;;  %1617 = vmatprep.mubr.f32.mxu1 %v1232_v11  ;;  %v1201_v60 = vld [vmem:[#allocation6 + $0x70] sm:$0xff] }
 0x267   : > { %3885 = vperm.xlu0 %5835, %v5294_v30   ;;  %v7321_v37 = vpop.permute.xlu1 %1355  ;;  %v1233_v11 = vld [vmem:[#allocation6 + $0x170] sm:$0xff] }
 0x268   : > { %2385 = vperm.xlu1 %5837, %v5207_v15   ;;  %v5298_v15 = vld [vmem:[%s8321_s4 + $0x548] sm:$0xff] }
 0x269   : > { %1538 = vmatmul.mubr.f32.gmra.mrb[12].mxu0 %v1199_v12  ;;  %1618 = vmatmul.mubr.f32.gmra.mrb[12].mxu1 %v1231_v31  ;;  %v7334_v12 = vpop.permute.xlu0 %2845  ;;  %v1203_v31 = vld [vmem:[#allocation6 + $0x80] sm:$0xff] }
 0x26a   : > { %1542 = vmatprep.mubr.f32.mxu0 %v1202_v9  ;;  %1622 = vmatprep.mubr.f32.mxu1 %v1234_v44  ;;  %8371 = vst [vmem:[#allocation39_spill] sm:$0xff] %v7334_v12  ;;  %v5211_v44 = vld [vmem:[%s8321_s4 + $0x290] sm:$0xff]  ;;  %v5300_v12 = vld [vmem:[%s8321_s4 + $0x558] sm:$0xff] }
 0x26b   : > { %3895 = vperm.xlu0 %5835, %v5296_v17   ;;  %v7329_v30 = vpop.permute.xlu1 %1365  ;;  %v1235_v9 = vld [vmem:[#allocation6 + $0x180] sm:$0xff] }
 0x26c   : > { %2395 = vperm.xlu1 %5837, %v5209_v22   ;;  %v1206_v22 = vld [vmem:[#allocation6 + $0x98] sm:$0xff] }
 0x26d   : > { %1543 = vmatmul.mubr.f32.gmra.mrb[14].mxu0 %v1201_v60  ;;  %1623 = vmatmul.mubr.f32.gmra.mrb[14].mxu1 %v1233_v11  ;;  %v5213_v60 = vld [vmem:[%s8321_s4 + $0x2a0] sm:$0xff]  ;;  %v7347_v11 = vpop.permute.xlu0 %2855 }
 0x26e   : > { %1547 = vmatprep.mubr.f32.mxu0 %v1204_v46  ;;  %1627 = vmatprep.mubr.f32.mxu1 %v1236_v3  ;;  %v1205_v3 = vld [vmem:[#allocation6 + $0x90] sm:$0xff]  ;;  %8372 = vst [vmem:[#allocation40_spill] sm:$0xff] %v7347_v11  ;;  %v1210_v11 = vld [vmem:[#allocation6 + $0xb8] sm:$0xff] }
 0x26f   : > { %3905 = vperm.xlu0 %5835, %v5298_v15   ;;  %v7339_v17 = vpop.permute.xlu1 %1375  ;;  %v1237_v46 = vld [vmem:[#allocation6 + $0x190] sm:$0xff] }
 0x270   : > { %2405 = vperm.xlu1 %5837, %v5211_v44   ;;  %v1208_v44 = vld [vmem:[#allocation6 + $0xa8] sm:$0xff] }
 0x271   : > { %1548 = vmatmul.mubr.f32.gmra.mrb[16].mxu0 %v1203_v31  ;;  %1628 = vmatmul.mubr.f32.gmra.mrb[16].mxu1 %v1235_v9  ;;  %v5302_v31 = vld [vmem:[%s8321_s4 + $0x568] sm:$0xff] }
 0x272   : > { %1552 = vmatprep.mubr.f32.mxu0 %v1206_v22  ;;  %1632 = vmatprep.mubr.f32.mxu1 %v1238_v13  ;;  %v5215_v13 = vld [vmem:[%s8321_s4 + $0x2b0] sm:$0xff] }
 0x273   : > { %3915 = vperm.xlu0 %5835, %v5300_v12   ;;  %v7349_v15 = vpop.permute.xlu1 %1385  ;;  %v1207_v9 = vld [vmem:[#allocation6 + $0xa0] sm:$0xff] }
 0x274   : > { %2415 = vperm.xlu1 %5837, %v5213_v60   ;;  %v1239_v22 = vld [vmem:[#allocation6 + $0x1a0] sm:$0xff]  ;;  %v5304_v60 = vld [vmem:[%s8321_s4 + $0x578] sm:$0xff] }
 0x275   : > { %1553 = vmatmul.mubr.f32.gmra.mrb[18].mxu0 %v1205_v3  ;;  %1633 = vmatmul.mubr.f32.gmra.mrb[18].mxu1 %v1237_v46  ;;  %v7362_v3 = vpop.permute.xlu0 %2865  ;;  %v1209_v46 = vld [vmem:[#allocation6 + $0xb0] sm:$0xff] }
 0x276   : > { %1557 = vmatprep.mubr.f32.mxu0 %v1208_v44  ;;  %1637 = vmatprep.mubr.f32.mxu1 %v1240_v38  ;;  %8373 = vst [vmem:[#allocation41_spill] sm:$0xff] %v7362_v3  ;;  %v5217_v38 = vld [vmem:[%s8321_s4 + $0x2c0] sm:$0xff]  ;;  %v5306_v3 = vld [vmem:[%s8321_s4 + $0x588] sm:$0xff] }
 0x277   : > { %3925 = vperm.xlu0 %5835, %v5302_v31   ;;  %v7357_v12 = vpop.permute.xlu1 %1395  ;;  %v1241_v44 = vld [vmem:[#allocation6 + $0x1b0] sm:$0xff] }
 0x278   : > { %2425 = vperm.xlu1 %5837, %v5215_v13   ;;  %v1212_v13 = vld [vmem:[#allocation6 + $0xc8] sm:$0xff] }
 0x279   : > { %1558 = vmatmul.mubr.f32.gmra.mrb[20].mxu0 %v1207_v9  ;;  %1638 = vmatmul.mubr.f32.gmra.mrb[20].mxu1 %v1239_v22  ;;  %v5219_v9 = vld [vmem:[%s8321_s4 + $0x2d0] sm:$0xff]  ;;  %v7375_v22 = vpop.permute.xlu0 %2875 }
 0x27a   : > { %1562 = vmatprep.mubr.f32.mxu0 %v1210_v11  ;;  %1642 = vmatprep.mubr.f32.mxu1 %v1242_v57  ;;  %v1211_v57 = vld [vmem:[#allocation6 + $0xc0] sm:$0xff]  ;;  %8374 = vst [vmem:[#allocation42_spill] sm:$0xff] %v7375_v22  ;;  %v1216_v22 = vld [vmem:[#allocation6 + $0xe8] sm:$0xff] }
 0x27b   : > { %3935 = vperm.xlu0 %5835, %v5304_v60   ;;  %v7367_v31 = vpop.permute.xlu1 %1405  ;;  %v1243_v11 = vld [vmem:[#allocation6 + $0x1c0] sm:$0xff] }
 0x27c   : > { %2435 = vperm.xlu1 %5837, %v5217_v38   ;;  %v1214_v38 = vld [vmem:[#allocation6 + $0xd8] sm:$0xff] }
 0x27d   : > { %1563 = vmatmul.mubr.f32.gmra.mrb[22].mxu0 %v1209_v46  ;;  %1643 = vmatmul.mubr.f32.gmra.mrb[22].mxu1 %v1241_v44  ;;  %v5308_v46 = vld [vmem:[%s8321_s4 + $0x598] sm:$0xff] }
 0x27e   : > { %1567 = vmatprep.mubr.f32.mxu0 %v1212_v13  ;;  %1647 = vmatprep.mubr.f32.mxu1 %v1244_v0  ;;  %v5221_v0 = vld [vmem:[%s8321_s4 + $0x2e0] sm:$0xff] }
 0x27f   : > { %3945 = vperm.xlu0 %5835, %v5306_v3   ;;  %v7377_v60 = vpop.permute.xlu1 %1415  ;;  %v1213_v44 = vld [vmem:[#allocation6 + $0xd0] sm:$0xff] }
 0x280   : > { %2445 = vperm.xlu1 %5837, %v5219_v9   ;;  %v1245_v13 = vld [vmem:[#allocation6 + $0x1d0] sm:$0xff]  ;;  %v5310_v9 = vld [vmem:[%s8321_s4 + $0x5a8] sm:$0xff] }
 0x281   : > { %1568 = vmatmul.mubr.f32.gmra.mrb[24].mxu0 %v1211_v57  ;;  %1648 = vmatmul.mubr.f32.gmra.mrb[24].mxu1 %v1243_v11  ;;  %v7390_v57 = vpop.permute.xlu0 %2885  ;;  %v1215_v11 = vld [vmem:[#allocation6 + $0xe0] sm:$0xff] }
 0x282   : > { %1572 = vmatprep.mubr.f32.mxu0 %v1214_v38  ;;  %1652 = vmatprep.mubr.f32.mxu1 %v1246_v14  ;;  %8375 = vst [vmem:[#allocation43_spill] sm:$0xff] %v7390_v57  ;;  %v5223_v14 = vld [vmem:[%s8321_s4 + $0x2f0] sm:$0xff]  ;;  %v5312_v57 = vld [vmem:[%s8321_s4 + $0x5b8] sm:$0xff] }
 0x283   : > { %3955 = vperm.xlu0 %5835, %v5308_v46   ;;  %v7385_v3 = vpop.permute.xlu1 %1425  ;;  %v1247_v38 = vld [vmem:[#allocation6 + $0x1e0] sm:$0xff] }
 0x284   : > { %2455 = vperm.xlu1 %5837, %v5221_v0   ;;  %v1218_v0 = vld [vmem:[#allocation6 + $0xf8] sm:$0xff] }
 0x285   : > { %1573 = vmatmul.mubr.f32.gmra.mrb[26].mxu0 %v1213_v44  ;;  %1653 = vmatmul.mubr.f32.gmra.mrb[26].mxu1 %v1245_v13  ;;  %v5225_v44 = vld [vmem:[%s8321_s4 + $0x300] sm:$0xff]  ;;  %v7403_v13 = vpop.permute.xlu0 %2895 }
 0x286   : > { %1577 = vmatprep.mubr.f32.mxu0 %v1216_v22  ;;  %1657 = vmatprep.mubr.f32.mxu1 %v1248_v27  ;;  %v1217_v27 = vld [vmem:[#allocation6 + $0xf0] sm:$0xff]  ;;  %8376 = vst [vmem:[#allocation44_spill] sm:$0xff] %v7403_v13 }
 0x287   : > { %3965 = vperm.xlu0 %5835, %v5310_v9   ;;  %v7395_v46 = vpop.permute.xlu1 %1435  ;;  %v1249_v22 = vld [vmem:[#allocation6 + $0x1f0] sm:$0xff] }
 0x288   : > { %2465 = vperm.xlu1 %5837, %v5223_v14   ;;  %v5314_v14 = vld [vmem:[%s8321_s4 + $0x5c8] sm:$0xff] }
 0x289   : > { %1578 = vmatmul.mubr.f32.gmra.mrb[28].mxu0 %v1215_v11  ;;  %1658 = vmatmul.mubr.f32.gmra.mrb[28].mxu1 %v1247_v38  ;;  %v5227_v11 = vld [vmem:[%s8321_s4 + $0x310] sm:$0xff]  ;;  %v7418_v38 = vpop.permute.xlu0 %2905 }
 0x28a   : > { %1582 = vmatprep.mubr.f32.mxu0 %v1218_v0  ;;  %1662 = vmatprep.mubr.f32.mxu1 %v1250_v25  ;;  %8377 = vst [vmem:[#allocation45_spill] sm:$0xff] %v7418_v38  ;;  %v5229_v0 = vld [vmem:[%s8321_s4 + $0x320] sm:$0xff] }
 0x28b   : > { %3975 = vperm.xlu0 %5835, %v5312_v57   ;;  %v7405_v9 = vpop.permute.xlu1 %1800  ;;  %v5316_v57 = vld [vmem:[%s8321_s4 + $0x5d8] sm:$0xff] }
 0x28c   : > { %2830 = vperm.xlu1 %5837, %v5225_v44  }
 0x28d   : > { %1583 = vmatmul.mubr.f32.gmra.mrb[30].mxu0 %v1217_v27  ;;  %1663 = vmatmul.mubr.f32.gmra.mrb[30].mxu1 %v1249_v22  ;;  %v5318_v27 = vld [vmem:[%s8321_s4 + $0x5e8] sm:$0xff]  ;;  %v5231_v22 = vld [vmem:[%s8321_s4 + $0x330] sm:$0xff] }
 0x28f   : > { %3985 = vperm.xlu0 %5835, %v5314_v14   ;;  %v7413_v25 = vpop.permute.xlu1 %1810  ;;  %v7431_v14 = vpop.permute.xlu0 %2915 }
 0x290   : > { %2840 = vperm.xlu1 %5837, %v5227_v11   ;;  %8378 = vst [vmem:[#allocation46_spill] sm:$0xff] %v7431_v14  ;;  %v5322_v14 = vld [vmem:[%s8321_s4 + $0x608] sm:$0xff] }
 0x293   : > { %3995 = vperm.xlu0 %5835, %v5316_v57   ;;  %v7423_v44 = vpop.permute.xlu1 %1820  ;;  %v5320_v57 = vld [vmem:[%s8321_s4 + $0x5f8] sm:$0xff] }
 0x294   : > { %2850 = vperm.xlu1 %5837, %v5229_v0   ;;  %v5233_v0 = vld [vmem:[%s8321_s4 + $0x340] sm:$0xff] }
 0x297   : > { %4005 = vperm.xlu0 %5835, %v5318_v27   ;;  %v7433_v11 = vpop.permute.xlu1 %1830  ;;  %v7446_v27 = vpop.permute.xlu0 %2925 }
 0x298   : > { %2860 = vperm.xlu1 %5837, %v5231_v22   ;;  %8379 = vst [vmem:[#allocation47_spill] sm:$0xff] %v7446_v27  ;;  %v5235_v22 = vld [vmem:[%s8321_s4 + $0x350] sm:$0xff] }
 0x29b   : > { %4015 = vperm.xlu0 %5835, %v5320_v57   ;;  %v7441_v38 = vpop.permute.xlu1 %1840  ;;  %v5324_v57 = vld [vmem:[%s8321_s4 + $0x618] sm:$0xff]  ;;  %v7459_v47 = vpop.permute.xlu0 %2935 }
 0x29c   : > { %2870 = vperm.xlu1 %5837, %v5233_v0   ;;  %v5237_v0 = vld [vmem:[%s8321_s4 + $0x360] sm:$0xff]  ;;  %8380 = vst [vmem:[#allocation48_spill] sm:$0xff] %v7459_v47  ;;  %v5328_v47 = vld [vmem:[%s8321_s4 + $0x638] sm:$0xff] }
 0x29f   : > { %4380 = vperm.xlu0 %5835, %v5322_v14   ;;  %v7451_v13 = vpop.permute.xlu1 %1850  ;;  %v5326_v14 = vld [vmem:[%s8321_s4 + $0x628] sm:$0xff] }
 0x2a0   : > { %2880 = vperm.xlu1 %5837, %v5235_v22   ;;  %v5239_v22 = vld [vmem:[%s8321_s4 + $0x370] sm:$0xff] }
 0x2a3   : > { %4390 = vperm.xlu0 %5835, %v5324_v57   ;;  %v7461_v27 = vpop.permute.xlu1 %1860  ;;  %v7474_v57 = vpop.permute.xlu0 %2945 }
 0x2a4   : > { %2890 = vperm.xlu1 %5837, %v5237_v0   ;;  %8381 = vst [vmem:[#allocation49_spill] sm:$0xff] %v7474_v57  ;;  %v5241_v0 = vld [vmem:[%s8321_s4 + $0x380] sm:$0xff] }
 0x2a7   : > { %4400 = vperm.xlu0 %5835, %v5326_v14   ;;  %v7469_v8 = vpop.permute.xlu1 %1870  ;;  %v5330_v14 = vld [vmem:[%s8321_s4 + $0x648] sm:$0xff]  ;;  %v7487_v26 = vpop.permute.xlu0 %2955 }
 0x2a8   : > { %2900 = vperm.xlu1 %5837, %v5239_v22   ;;  %v5243_v22 = vld [vmem:[%s8321_s4 + $0x390] sm:$0xff]  ;;  %8383 = vst [vmem:[#allocation51_spill] sm:$0xff] %v7487_v26  ;;  %v5334_v26 = vld [vmem:[%s8321_s4 + $0x668] sm:$0xff] }
 0x2ab   : > { %4410 = vperm.xlu0 %5835, %v5328_v47   ;;  %v7479_v55 = vpop.permute.xlu1 %1880  ;;  %v5332_v47 = vld [vmem:[%s8321_s4 + $0x658] sm:$0xff] }
 0x2ac   : > { %8382 = vst [vmem:[#allocation50_spill] sm:$0xff] %v7479_v55  ;;  %2910 = vperm.xlu1 %5837, %v5241_v0   ;;  %v5245_v0 = vld [vmem:[%s8321_s4 + $0x3a0] sm:$0xff] }
 0x2af   : > { %4420 = vperm.xlu0 %5835, %v5330_v14   ;;  %v7489_v57 = vpop.permute.xlu1 %1890  ;;  %v7502_v14 = vpop.permute.xlu0 %2965 }
 0x2b0   : > { %8384 = vst [vmem:[#allocation52_spill] sm:$0xff] %v7489_v57  ;;  %2920 = vperm.xlu1 %5837, %v5243_v22   ;;  %8386 = vst [vmem:[#allocation54_spill] sm:$0xff] %v7502_v14  ;;  %v5247_v22 = vld [vmem:[%s8321_s4 + $0x3b0] sm:$0xff] }
 0x2b3   : > { %4430 = vperm.xlu0 %5835, %v5332_v47   ;;  %v7497_v45 = vpop.permute.xlu1 %1900  ;;  %v5336_v47 = vld [vmem:[%s8321_s4 + $0x678] sm:$0xff]  ;;  %v7515_v36 = vpop.permute.xlu0 %2975 }
 0x2b4   : > { %8385 = vst [vmem:[#allocation53_spill] sm:$0xff] %v7497_v45  ;;  %2930 = vperm.xlu1 %5837, %v5245_v0   ;;  %v5249_v0 = vld [vmem:[%s8321_s4 + $0x3c0] sm:$0xff]  ;;  %8388 = vst [vmem:[#allocation56_spill] sm:$0xff] %v7515_v36  ;;  %v5340_v36 = vld [vmem:[%s8321_s4 + $0x698] sm:$0xff] }
 0x2b7   : > { %4440 = vperm.xlu0 %5835, %v5334_v26   ;;  %v7507_v19 = vpop.permute.xlu1 %1910  ;;  %v5338_v26 = vld [vmem:[%s8321_s4 + $0x688] sm:$0xff] }
 0x2b8   : > { %8387 = vst [vmem:[#allocation55_spill] sm:$0xff] %v7507_v19  ;;  %2940 = vperm.xlu1 %5837, %v5247_v22   ;;  %v5251_v22 = vld [vmem:[%s8321_s4 + $0x3d0] sm:$0xff] }
 0x2bb   : > { %4450 = vperm.xlu0 %5835, %v5336_v47   ;;  %v7517_v14 = vpop.permute.xlu1 %1920  ;;  %v7530_v47 = vpop.permute.xlu0 %2985 }
 0x2bc   : > { %8389 = vst [vmem:[#allocation57_spill] sm:$0xff] %v7517_v14  ;;  %2950 = vperm.xlu1 %5837, %v5249_v0   ;;  %8391 = vst [vmem:[#allocation59_spill] sm:$0xff] %v7530_v47  ;;  %v5253_v0 = vld [vmem:[%s8321_s4 + $0x3e0] sm:$0xff] }
 0x2bf   : > { %4460 = vperm.xlu0 %5835, %v5338_v26   ;;  %v7525_v34 = vpop.permute.xlu1 %1930  ;;  %v5342_v26 = vld [vmem:[%s8321_s4 + $0x6a8] sm:$0xff] }
 0x2c0   : > { %8390 = vst [vmem:[#allocation58_spill] sm:$0xff] %v7525_v34  ;;  %2960 = vperm.xlu1 %5837, %v5251_v22   ;;  %v5255_v22 = vld [vmem:[%s8321_s4 + $0x3f0] sm:$0xff]  ;;  %v7543_v34 = vpop.permute.xlu0 %3350 }
 0x2c1   : > { %8393 = vst [vmem:[#allocation61_spill] sm:$0xff] %v7543_v34  ;;  %v5346_v34 = vld [vmem:[%s8321_s4 + $0x6c8] sm:$0xff] }
 0x2c3   : > { %4470 = vperm.xlu0 %5835, %v5340_v36   ;;  %v7535_v14 = vpop.permute.xlu1 %1940  ;;  %v5344_v36 = vld [vmem:[%s8321_s4 + $0x6b8] sm:$0xff] }
 0x2c4   : > { %8392 = vst [vmem:[#allocation60_spill] sm:$0xff] %v7535_v14  ;;  %2970 = vperm.xlu1 %5837, %v5253_v0   ;;  %v5257_v0 = vld [vmem:[%s8321_s4 + $0x400] sm:$0xff] }
 0x2c7   : > { %4480 = vperm.xlu0 %5835, %v5342_v26   ;;  %v7545_v47 = vpop.permute.xlu1 %1950  ;;  %v7558_v26 = vpop.permute.xlu0 %3360 }
 0x2c8   : > { %8394 = vst [vmem:[#allocation62_spill] sm:$0xff] %v7545_v47  ;;  %2980 = vperm.xlu1 %5837, %v5255_v22   ;;  %8396 = vst [vmem:[#allocation64_spill] sm:$0xff] %v7558_v26  ;;  %v5259_v22 = vld [vmem:[%s8321_s4 + $0x410] sm:$0xff] }
 0x2cb   : > { %4490 = vperm.xlu0 %5835, %v5344_v36   ;;  %v7553_v14 = vpop.permute.xlu1 %2315  ;;  %v5348_v36 = vld [vmem:[%s8321_s4 + $0x6d8] sm:$0xff] }
 0x2cc   : > { %8395 = vst [vmem:[#allocation63_spill] sm:$0xff] %v7553_v14  ;;  %3345 = vperm.xlu1 %5837, %v5257_v0   ;;  %v5261_v0 = vld [vmem:[%s8321_s4 + $0x420] sm:$0xff]  ;;  %v7571_v14 = vpop.permute.xlu0 %3370 }
 0x2cd   : > { %8398 = vst [vmem:[#allocation66_spill] sm:$0xff] %v7571_v14  ;;  %v4792_v14 = vld [vmem:[%s8322_s5 + $0x10] sm:$0xff] }
 0x2cf   : > { %4500 = vperm.xlu0 %5835, %v5346_v34   ;;  %v7563_v47 = vpop.permute.xlu1 %2325  ;;  %v4790_v34 = vld [vmem:[%s8322_s5] sm:$0xff] }
 0x2d0   : > { %8397 = vst [vmem:[#allocation65_spill] sm:$0xff] %v7563_v47  ;;  %3355 = vperm.xlu1 %5837, %v5259_v22   ;;  %v5263_v22 = vld [vmem:[%s8321_s4 + $0x430] sm:$0xff] }
 0x2d3   : > { %4510 = vperm.xlu0 %5835, %v5348_v36   ;;  %v7573_v26 = vpop.permute.xlu1 %2335  ;;  %v7586_v36 = vpop.permute.xlu0 %3380 }
 0x2d4   : > { %8399 = vst [vmem:[#allocation67_spill] sm:$0xff] %v7573_v26  ;;  %3365 = vperm.xlu1 %5837, %v5261_v0   ;;  %8401 = vst [vmem:[#allocation69_spill] sm:$0xff] %v7586_v36  ;;  %v5265_v0 = vld [vmem:[%s8321_s4 + $0x440] sm:$0xff] }
 0x2d7   : > { %4824 = vperm.xlu0 %5835, %v4790_v34   ;;  %v7581_v47 = vpop.permute.xlu1 %2345  ;;  %v4794_v34 = vld [vmem:[%s8322_s5 + $0x20] sm:$0xff] }
 0x2d8   : > { %8400 = vst [vmem:[#allocation68_spill] sm:$0xff] %v7581_v47  ;;  %3375 = vperm.xlu1 %5837, %v5263_v22   ;;  %v5267_v22 = vld [vmem:[%s8321_s4 + $0x450] sm:$0xff]  ;;  %v7599_v47 = vpop.permute.xlu0 %3390 }
 0x2d9   : > { %8403 = vst [vmem:[#allocation71_spill] sm:$0xff] %v7599_v47  ;;  %v4798_v47 = vld [vmem:[%s8322_s5 + $0x40] sm:$0xff] }
 0x2db   : > { %4834 = vperm.xlu0 %5835, %v4792_v14   ;;  %v7591_v26 = vpop.permute.xlu1 %2355  ;;  %v4796_v14 = vld [vmem:[%s8322_s5 + $0x30] sm:$0xff] }
 0x2dc   : > { %8402 = vst [vmem:[#allocation70_spill] sm:$0xff] %v7591_v26  ;;  %3385 = vperm.xlu1 %5837, %v5265_v0   ;;  %v5269_v0 = vld [vmem:[%s8321_s4 + $0x460] sm:$0xff] }
 0x2df   : > { %4844 = vperm.xlu0 %5835, %v4794_v34   ;;  %v7601_v36 = vpop.permute.xlu1 %2365  ;;  %v7614_v34 = vpop.permute.xlu0 %3400 }
 0x2e0   : > { %8404 = vst [vmem:[#allocation72_spill] sm:$0xff] %v7601_v36  ;;  %3395 = vperm.xlu1 %5837, %v5267_v22   ;;  %8406 = vst [vmem:[#allocation74_spill] sm:$0xff] %v7614_v34  ;;  %v5271_v22 = vld [vmem:[%s8321_s4 + $0x470] sm:$0xff] }
 0x2e3   : > { %4854 = vperm.xlu0 %5835, %v4796_v14   ;;  %v7609_v26 = vpop.permute.xlu1 %2375  ;;  %v4800_v14 = vld [vmem:[%s8322_s5 + $0x50] sm:$0xff] }
 0x2e4   : > { %8405 = vst [vmem:[#allocation73_spill] sm:$0xff] %v7609_v26  ;;  %3405 = vperm.xlu1 %5837, %v5269_v0   ;;  %v5273_v0 = vld [vmem:[%s8321_s4 + $0x480] sm:$0xff]  ;;  %v7627_v26 = vpop.permute.xlu0 %3410 }
 0x2e5   : > { %8408 = vst [vmem:[#allocation76_spill] sm:$0xff] %v7627_v26  ;;  %v4804_v26 = vld [vmem:[%s8322_s5 + $0x70] sm:$0xff] }
 0x2e7   : > { %4864 = vperm.xlu0 %5835, %v4798_v47   ;;  %v7619_v36 = vpop.permute.xlu1 %2385  ;;  %v4802_v47 = vld [vmem:[%s8322_s5 + $0x60] sm:$0xff] }
 0x2e8   : > { %8407 = vst [vmem:[#allocation75_spill] sm:$0xff] %v7619_v36  ;;  %3415 = vperm.xlu1 %5837, %v5271_v22   ;;  %v5275_v22 = vld [vmem:[%s8321_s4 + $0x490] sm:$0xff] }
 0x2eb   : > { %4874 = vperm.xlu0 %5835, %v4800_v14   ;;  %v7629_v34 = vpop.permute.xlu1 %2395  ;;  %v7642_v14 = vpop.permute.xlu0 %3420 }
 0x2ec   : > { %8409 = vst [vmem:[#allocation77_spill] sm:$0xff] %v7629_v34  ;;  %3425 = vperm.xlu1 %5837, %v5273_v0   ;;  %8411 = vst [vmem:[#allocation79_spill] sm:$0xff] %v7642_v14  ;;  %v5277_v0 = vld [vmem:[%s8321_s4 + $0x4a0] sm:$0xff] }
 0x2ef   : > { %4884 = vperm.xlu0 %5835, %v4802_v47   ;;  %v7637_v36 = vpop.permute.xlu1 %2405  ;;  %v4806_v47 = vld [vmem:[%s8322_s5 + $0x80] sm:$0xff] }
 0x2f0   : > { %8410 = vst [vmem:[#allocation78_spill] sm:$0xff] %v7637_v36  ;;  %3435 = vperm.xlu1 %5837, %v5275_v22   ;;  %v5279_v22 = vld [vmem:[%s8321_s4 + $0x4b0] sm:$0xff]  ;;  %v7655_v36 = vpop.permute.xlu0 %3430 }
 0x2f1   : > { %8413 = vst [vmem:[#allocation81_spill] sm:$0xff] %v7655_v36  ;;  %v4810_v36 = vld [vmem:[%s8322_s5 + $0xa0] sm:$0xff] }
 0x2f3   : > { %4894 = vperm.xlu0 %5835, %v4804_v26   ;;  %v7647_v34 = vpop.permute.xlu1 %2415  ;;  %v4808_v26 = vld [vmem:[%s8322_s5 + $0x90] sm:$0xff] }
 0x2f4   : > { %8412 = vst [vmem:[#allocation80_spill] sm:$0xff] %v7647_v34  ;;  %3445 = vperm.xlu1 %5837, %v5277_v0   ;;  %v5281_v0 = vld [vmem:[%s8321_s4 + $0x4c0] sm:$0xff] }
 0x2f7   : > { %4904 = vperm.xlu0 %5835, %v4806_v47   ;;  %v7657_v14 = vpop.permute.xlu1 %2425  ;;  %v7670_v47 = vpop.permute.xlu0 %3440 }
 0x2f8   : > { %8414 = vst [vmem:[#allocation82_spill] sm:$0xff] %v7657_v14  ;;  %3455 = vperm.xlu1 %5837, %v5279_v22   ;;  %8416 = vst [vmem:[#allocation84_spill] sm:$0xff] %v7670_v47  ;;  %v5283_v22 = vld [vmem:[%s8321_s4 + $0x4d0] sm:$0xff] }
 0x2fb   : > { %4914 = vperm.xlu0 %5835, %v4808_v26   ;;  %v7665_v34 = vpop.permute.xlu1 %2435  ;;  %v4812_v26 = vld [vmem:[%s8322_s5 + $0xb0] sm:$0xff] }
 0x2fc   : > { %8415 = vst [vmem:[#allocation83_spill] sm:$0xff] %v7665_v34  ;;  %3465 = vperm.xlu1 %5837, %v5281_v0   ;;  %v5285_v0 = vld [vmem:[%s8321_s4 + $0x4e0] sm:$0xff]  ;;  %v7683_v34 = vpop.permute.xlu0 %3450 }
 0x2fd   : > { %8418 = vst [vmem:[#allocation86_spill] sm:$0xff] %v7683_v34  ;;  %v4816_v34 = vld [vmem:[%s8322_s5 + $0xd0] sm:$0xff] }
 0x2ff   : > { %4924 = vperm.xlu0 %5835, %v4810_v36   ;;  %v7675_v14 = vpop.permute.xlu1 %2445  ;;  %v4814_v36 = vld [vmem:[%s8322_s5 + $0xc0] sm:$0xff] }
 0x300   : > { %8417 = vst [vmem:[#allocation85_spill] sm:$0xff] %v7675_v14  ;;  %3475 = vperm.xlu1 %5837, %v5283_v22   ;;  %v5287_v22 = vld [vmem:[%s8321_s4 + $0x4f0] sm:$0xff]  ;;  %v7698_v63 = vpop.permute.xlu0 %3460 }
 0x301   : > { %8421 = vst [vmem:[#allocation89_spill] sm:$0xff] %v7698_v63 }
 0x303   : > { %4934 = vperm.xlu0 %5835, %v4812_v26   ;;  %v7685_v47 = vpop.permute.xlu1 %2455  ;;  %v1702_v26 = vld [vmem:[#allocation6 + $0x208] sm:$0xff] }
 0x304   : > { %8419 = vst [vmem:[#allocation87_spill] sm:$0xff] %v7685_v47  ;;  %3485 = vperm.xlu1 %5837, %v5285_v0   ;;  %v5289_v0 = vld [vmem:[%s8321_s4 + $0x500] sm:$0xff]  ;;  %2022 = vmatprep.mubr.f32.mxu1 %v1702_v26 }
 0x305   : > { %v5293_v26 = vld [vmem:[%s8321_s4 + $0x520] sm:$0xff] }
 0x307   : > { %4944 = vperm.xlu0 %5835, %v4814_v36   ;;  %v7693_v14 = vpop.permute.xlu1 %2465  ;;  %v4817_v36 = vld [vmem:[%s8322_s5 + $0xd8] sm:$0xff] }
 0x308   : > { %8420 = vst [vmem:[#allocation88_spill] sm:$0xff] %v7693_v14  ;;  %3495 = vperm.xlu1 %5837, %v5287_v22   ;;  %v5291_v22 = vld [vmem:[%s8321_s4 + $0x510] sm:$0xff]  ;;  %v7711_v14 = vpop.permute.xlu0 %3470 }
 0x309   : > { %8423 = vst [vmem:[#allocation91_spill] sm:$0xff] %v7711_v14  ;;  %v4819_v14 = vld [vmem:[%s8322_s5 + $0xe8] sm:$0xff] }
 0x30b   : > { %4954 = vperm.xlu0 %5835, %v4816_v34   ;;  %v7703_v47 = vpop.permute.xlu1 %2830  ;;  %v4818_v34 = vld [vmem:[%s8322_s5 + $0xe0] sm:$0xff] }
 0x30c   : > { %8422 = vst [vmem:[#allocation90_spill] sm:$0xff] %v7703_v47  ;;  %3860 = vperm.xlu1 %5837, %v5289_v0  }
 0x30f   : > { %4959 = vperm.xlu0 %5835, %v4817_v36   ;;  %v7713_v63 = vpop.permute.xlu1 %2840  ;;  %v7726_v36 = vpop.permute.xlu0 %3480 }
 0x310   : > { %8424 = vst [vmem:[#allocation92_spill] sm:$0xff] %v7713_v63  ;;  %3870 = vperm.xlu1 %5837, %v5291_v22   ;;  %8426 = vst [vmem:[#allocation94_spill] sm:$0xff] %v7726_v36  ;;  %v5295_v22 = vld [vmem:[%s8321_s4 + $0x530] sm:$0xff] }
 0x313   : > { %4964 = vperm.xlu0 %5835, %v4818_v34   ;;  %v7721_v0 = vpop.permute.xlu1 %2850  ;;  %v4821_v34 = vld [vmem:[%s8322_s5 + $0xf8] sm:$0xff] }
 0x314   : > { %8425 = vst [vmem:[#allocation93_spill] sm:$0xff] %v7721_v0  ;;  %3880 = vperm.xlu1 %5837, %v5293_v26   ;;  %v5297_v26 = vld [vmem:[%s8321_s4 + $0x540] sm:$0xff]  ;;  %v7739_v0 = vpop.permute.xlu0 %3490 }
 0x315   : > { %8428 = vst [vmem:[#allocation96_spill] sm:$0xff] %v7739_v0 }
 0x317   : > { %4969 = vperm.xlu0 %5835, %v4819_v14   ;;  %v7731_v63 = vpop.permute.xlu1 %2860  ;;  %v5299_v14 = vld [vmem:[%s8321_s4 + $0x550] sm:$0xff] }
 0x318   : > { %8427 = vst [vmem:[#allocation95_spill] sm:$0xff] %v7731_v63  ;;  %3890 = vperm.xlu1 %5837, %v5295_v22   ;;  %v5301_v63 = vld [vmem:[%s8321_s4 + $0x560] sm:$0xff] }
 0x31b   : > { %4979 = vperm.xlu0 %5835, %v4821_v34   ;;  %v7741_v36 = vpop.permute.xlu1 %2870  ;;  %v5303_v34 = vld [vmem:[%s8321_s4 + $0x570] sm:$0xff] }
 0x31c   : > { %8429 = vst [vmem:[#allocation97_spill] sm:$0xff] %v7741_v36  ;;  %3900 = vperm.xlu1 %5837, %v5297_v26  }
 0x31f   : > { %v7746_v22 = vpop.permute.xlu1 %2880 }
 0x320   : > { %3910 = vperm.xlu1 %5837, %v5299_v14   ;;  %8430 = vst [vmem:[#allocation98_spill] sm:$0xff] %v7746_v22 }
 0x323   : > { %v7754_v26 = vpop.permute.xlu1 %2890 }
 0x324   : > { %3920 = vperm.xlu1 %5837, %v5301_v63   ;;  %v1509_v47 = vpop.f32.mrb[0].mxu0  ;;  %v1589_v19 = vpop.f32.mrb[0].mxu1  ;;  %8431 = vst [vmem:[#allocation99_spill] sm:$0xff] %v7754_v26 }
 0x325   : > { %v1511_v59 = vpop.f32.mrb[1].mxu0  ;;  %v1591_v0 = vpop.f32.mrb[1].mxu1  ;;  %v1510_v36 = vadd.f32 %v1509_v47, %v7251_v4  ;;  %v1590_v14 = vadd.f32 %v1589_v19, %v7329_v30 }
 0x326   : > { %v5305_v0 = vld [vmem:[%s8321_s4 + $0x580] sm:$0xff] }
 0x327   : > { %v1668_v10 = vmax.f32 %v1510_v36, 0.0  ;;  %v1684_v55 = vmax.f32 %v1590_v14, 0.0  ;;  %v5309_v14 = vld [vmem:[%s8321_s4 + $0x5a0] sm:$0xff] }
 0x328   : > { %3930 = vperm.xlu1 %5837, %v5303_v34   ;;  %v1514_v22 = vpop.f32.mrb[2].mxu0  ;;  %v1594_v45 = vpop.f32.mrb[2].mxu1 }
 0x329   : > { %v1515_v51 = vadd.f32 %v1514_v22, %v6807_v54  ;;  %v1595_v63 = vadd.f32 %v1594_v45, %v6876_v39  ;;  %v1516_v57 = vpop.f32.mrb[3].mxu0  ;;  %v1596_v59 = vpop.f32.mrb[3].mxu1  ;;  %v5307_v39 = vld [vmem:[%s8321_s4 + $0x590] sm:$0xff] }
 0x32a   : > { %v7768_v45 = vpop.permute.xlu1 %2900 }
 0x32b   : > { %v1669_v26 = vmax.f32 %v1515_v51, 0.0  ;;  %v1685_v1 = vmax.f32 %v1595_v63, 0.0 }
 0x32c   : > { %3940 = vperm.xlu1 %5837, %v5305_v0   ;;  %v1519_v4 = vpop.f32.mrb[4].mxu0  ;;  %v1599_v19 = vpop.f32.mrb[4].mxu1 }
 0x32d   : > { %v5405_v30 = vpack.c.bf16 %v1669_v26, %v1668_v10  ;;  %v7763_v47 = vpack.c.bf16 %v1685_v1, %v1684_v55  ;;  %v1521_v34 = vpop.f32.mrb[5].mxu0  ;;  %v1601_v54 = vpop.f32.mrb[5].mxu1  ;;  %v1520_v57 = vadd.f32 %v1519_v4, %v7263_v29  ;;  %v1600_v36 = vadd.f32 %v1599_v19, %v7339_v17 }
 0x32e   : > { %v7783_v54 = vpop.permute.xlu1 %2910 }
 0x32f   : > { %5406 = vmatpush1.bf16.msra.mxu1 %v5405_v30  ;;  %v1670_v63 = vmax.f32 %v1520_v57, 0.0  ;;  %v1686_v29 = vmax.f32 %v1600_v36, 0.0 }
 0x330   : > { %3950 = vperm.xlu1 %5837, %v5307_v39   ;;  %v1524_v51 = vpop.f32.mrb[6].mxu0  ;;  %v1604_v22 = vpop.f32.mrb[6].mxu1  ;;  %5407 = vmatprep.subr.bf16.mxu1 %v8359_v28 }
 0x331   : > { %v1525_v1 = vadd.f32 %v1524_v51, %v6814_v48  ;;  %v1605_v10 = vadd.f32 %v1604_v22, %v6889_v61  ;;  %v1526_v55 = vpop.f32.mrb[7].mxu0  ;;  %v1606_v26 = vpop.f32.mrb[7].mxu1  ;;  %v5311_v61 = vld [vmem:[%s8321_s4 + $0x5b0] sm:$0xff] }
 0x332   : > { %v5313_v26 = vld [vmem:[%s8321_s4 + $0x5c0] sm:$0xff] }
 0x333   : > { %v1671_v59 = vmax.f32 %v1525_v1, 0.0  ;;  %v1687_v17 = vmax.f32 %v1605_v10, 0.0 }
 0x334   : > { %3960 = vperm.xlu1 %5837, %v5309_v14   ;;  %v1529_v0 = vpop.f32.mrb[8].mxu0  ;;  %v1609_v4 = vpop.f32.mrb[8].mxu1 }
 0x335   : > { %v5408_v19 = vpack.c.bf16 %v1671_v59, %v1670_v63  ;;  %v7778_v30 = vpack.c.bf16 %v1687_v17, %v1686_v29  ;;  %v1531_v34 = vpop.f32.mrb[9].mxu0  ;;  %v1611_v48 = vpop.f32.mrb[9].mxu1  ;;  %v1530_v39 = vadd.f32 %v1529_v0, %v7273_v49  ;;  %v1610_v57 = vadd.f32 %v1609_v4, %v7349_v15 }
 0x337   : > { %5409 = vmatpush1.bf16.msra.mxu1 %v5408_v19  ;;  %v1672_v14 = vmax.f32 %v1530_v39, 0.0  ;;  %v1688_v49 = vmax.f32 %v1610_v57, 0.0  ;;  %v7798_v19 = vpop.permute.xlu1 %2920 }
 0x338   : > { %3970 = vperm.xlu1 %5837, %v5311_v61   ;;  %v1534_v36 = vpop.f32.mrb[10].mxu0  ;;  %v1614_v51 = vpop.f32.mrb[10].mxu1  ;;  %5410 = vmatprep.subr.bf16.mxu1 %v8359_v28 }
 0x339   : > { %v1535_v22 = vadd.f32 %v1534_v36, %v6820_v43  ;;  %v1615_v1 = vadd.f32 %v1614_v51, %v6899_v40  ;;  %v1536_v10 = vpop.f32.mrb[11].mxu0  ;;  %v1616_v55 = vpop.f32.mrb[11].mxu1  ;;  %v5315_v40 = vld [vmem:[%s8321_s4 + $0x5d0] sm:$0xff] }
 0x33b   : > { %v1673_v63 = vmax.f32 %v1535_v22, 0.0  ;;  %v1689_v15 = vmax.f32 %v1615_v1, 0.0  ;;  %v5317_v1 = vld [vmem:[%s8321_s4 + $0x5e0] sm:$0xff] }
 0x33c   : > { %3980 = vperm.xlu1 %5837, %v5313_v26   ;;  %v1539_v29 = vpop.f32.mrb[12].mxu0  ;;  %v1619_v59 = vpop.f32.mrb[12].mxu1 }
 0x33d   : > { %v5411_v17 = vpack.c.bf16 %v1673_v63, %v1672_v14  ;;  %v7793_v0 = vpack.c.bf16 %v1689_v15, %v1688_v49  ;;  %v1541_v4 = vpop.f32.mrb[13].mxu0  ;;  %v1621_v43 = vpop.f32.mrb[13].mxu1  ;;  %v1540_v34 = vadd.f32 %v1539_v29, %v7283_v56  ;;  %v1620_v48 = vadd.f32 %v1619_v59, %v7357_v12 }
 0x33e   : > { %v7813_v29 = vpop.permute.xlu1 %2930 }
 0x33f   : > { %5412 = vmatpush1.bf16.msra.mxu1 %v5411_v17  ;;  %v1674_v10 = vmax.f32 %v1540_v34, 0.0  ;;  %v1690_v56 = vmax.f32 %v1620_v48, 0.0 }
 0x340   : > { %3990 = vperm.xlu1 %5837, %v5315_v40   ;;  %v1544_v61 = vpop.f32.mrb[14].mxu0  ;;  %v1624_v39 = vpop.f32.mrb[14].mxu1  ;;  %5413 = vmatprep.subr.bf16.mxu1 %v8359_v28 }
 0x341   : > { %v1545_v57 = vadd.f32 %v1544_v61, %v6828_v18  ;;  %v1625_v36 = vadd.f32 %v1624_v39, %v6914_v62  ;;  %v1546_v51 = vpop.f32.mrb[15].mxu0  ;;  %v1626_v22 = vpop.f32.mrb[15].mxu1  ;;  %v5319_v62 = vld [vmem:[%s8321_s4 + $0x5f0] sm:$0xff]  ;;  %v5321_v39 = vld [vmem:[%s8321_s4 + $0x600] sm:$0xff] }
 0x343   : > { %v1675_v55 = vmax.f32 %v1545_v57, 0.0  ;;  %v1691_v12 = vmax.f32 %v1625_v36, 0.0 }
 0x344   : > { %4000 = vperm.xlu1 %5837, %v5317_v1   ;;  %v1549_v26 = vpop.f32.mrb[16].mxu0  ;;  %v1629_v14 = vpop.f32.mrb[16].mxu1 }
 0x345   : > { %v5414_v49 = vpack.c.bf16 %v1675_v55, %v1674_v10  ;;  %v7808_v63 = vpack.c.bf16 %v1691_v12, %v1690_v56  ;;  %v1551_v15 = vpop.f32.mrb[17].mxu0  ;;  %v1631_v18 = vpop.f32.mrb[17].mxu1  ;;  %v1550_v59 = vadd.f32 %v1549_v26, %v7293_v50  ;;  %v1630_v17 = vadd.f32 %v1629_v14, %v7367_v31 }
 0x346   : > { %v7828_v55 = vpop.permute.xlu1 %2940 }
 0x347   : > { %5415 = vmatpush1.bf16.msra.mxu1 %v5414_v49  ;;  %v1676_v57 = vmax.f32 %v1550_v59, 0.0  ;;  %v1692_v50 = vmax.f32 %v1630_v17, 0.0  ;;  %v5325_v17 = vld [vmem:[%s8321_s4 + $0x620] sm:$0xff] }
 0x348   : > { %4010 = vperm.xlu1 %5837, %v5319_v62   ;;  %v1554_v4 = vpop.f32.mrb[18].mxu0  ;;  %v1634_v43 = vpop.f32.mrb[18].mxu1  ;;  %5416 = vmatprep.subr.bf16.mxu1 %v8359_v28 }
 0x349   : > { %v1555_v40 = vadd.f32 %v1554_v4, %v6840_v32  ;;  %v1635_v34 = vadd.f32 %v1634_v43, %v6923_v2  ;;  %v1556_v48 = vpop.f32.mrb[19].mxu0  ;;  %v1636_v61 = vpop.f32.mrb[19].mxu1  ;;  %v5323_v2 = vld [vmem:[%s8321_s4 + $0x610] sm:$0xff] }
 0x34b   : > { %v1677_v36 = vmax.f32 %v1555_v40, 0.0  ;;  %v1693_v31 = vmax.f32 %v1635_v34, 0.0 }
 0x34c   : > { %4375 = vperm.xlu1 %5837, %v5321_v39   ;;  %v1559_v51 = vpop.f32.mrb[20].mxu0  ;;  %v1639_v22 = vpop.f32.mrb[20].mxu1 }
 0x34d   : > { %v5417_v1 = vpack.c.bf16 %v1677_v36, %v1676_v57  ;;  %v7823_v10 = vpack.c.bf16 %v1693_v31, %v1692_v50  ;;  %v1561_v56 = vpop.f32.mrb[21].mxu0  ;;  %v1641_v32 = vpop.f32.mrb[21].mxu1  ;;  %v1560_v12 = vadd.f32 %v1559_v51, %v7301_v16  ;;  %v1640_v26 = vadd.f32 %v1639_v22, %v7377_v60 }
 0x34e   : > { %v7843_v57 = vpop.permute.xlu1 %2950 }
 0x34f   : > { %5418 = vmatpush1.bf16.msra.mxu1 %v5417_v1  ;;  %v1678_v4 = vmax.f32 %v1560_v12, 0.0  ;;  %v1694_v16 = vmax.f32 %v1640_v26, 0.0 }
 0x350   : > { %4385 = vperm.xlu1 %5837, %v5323_v2   ;;  %v1564_v14 = vpop.f32.mrb[22].mxu0  ;;  %v1644_v49 = vpop.f32.mrb[22].mxu1  ;;  %5419 = vmatprep.subr.bf16.mxu1 %v8359_v28  ;;  %v5329_v2 = vld [vmem:[%s8321_s4 + $0x640] sm:$0xff] }
 0x351   : > { %v1565_v15 = vadd.f32 %v1564_v14, %v6855_v42  ;;  %v1645_v18 = vadd.f32 %v1644_v49, %v6932_v20  ;;  %v1566_v62 = vpop.f32.mrb[23].mxu0  ;;  %v1646_v59 = vpop.f32.mrb[23].mxu1  ;;  %v5327_v20 = vld [vmem:[%s8321_s4 + $0x630] sm:$0xff] }
 0x353   : > { %v1679_v43 = vmax.f32 %v1565_v15, 0.0  ;;  %v1695_v60 = vmax.f32 %v1645_v18, 0.0 }
 0x354   : > { %4395 = vperm.xlu1 %5837, %v5325_v17   ;;  %v1569_v40 = vpop.f32.mrb[24].mxu0  ;;  %v1649_v34 = vpop.f32.mrb[24].mxu1 }
 0x355   : > { %v5420_v48 = vpack.c.bf16 %v1679_v43, %v1678_v4  ;;  %v7838_v61 = vpack.c.bf16 %v1695_v60, %v1694_v16  ;;  %v1571_v39 = vpop.f32.mrb[25].mxu0  ;;  %v1651_v42 = vpop.f32.mrb[25].mxu1  ;;  %v1570_v50 = vadd.f32 %v1569_v40, %v7311_v58  ;;  %v1650_v36 = vadd.f32 %v1649_v34, %v7385_v3 }
 0x357   : > { %5421 = vmatpush1.bf16.msra.mxu1 %v5420_v48  ;;  %v1680_v12 = vmax.f32 %v1570_v50, 0.0  ;;  %v1696_v58 = vmax.f32 %v1650_v36, 0.0  ;;  %v5333_v48 = vld [vmem:[%s8321_s4 + $0x660] sm:$0xff] }
 0x358   : > { %4405 = vperm.xlu1 %5837, %v5327_v20   ;;  %v1574_v31 = vpop.f32.mrb[26].mxu0  ;;  %v1654_v51 = vpop.f32.mrb[26].mxu1  ;;  %5422 = vmatprep.subr.bf16.mxu1 %v8359_v28 }
 0x359   : > { %v1575_v22 = vadd.f32 %v1574_v31, %v6862_v33  ;;  %v1655_v1 = vadd.f32 %v1654_v51, %v6942_v35  ;;  %v1576_v56 = vpop.f32.mrb[27].mxu0  ;;  %v1656_v32 = vpop.f32.mrb[27].mxu1  ;;  %v5331_v33 = vld [vmem:[%s8321_s4 + $0x650] sm:$0xff] }
 0x35a   : > { %v7856_v35 = vpop.permute.xlu1 %2960  ;;  %v5335_v31 = vld [vmem:[%s8321_s4 + $0x670] sm:$0xff]  ;;  %v5345_v32 = vld [vmem:[%s8321_s4 + $0x6c0] sm:$0xff] }
 0x35b   : > { %v1681_v26 = vmax.f32 %v1575_v22, 0.0  ;;  %v1697_v3 = vmax.f32 %v1655_v1, 0.0  ;;  %v5339_v22 = vld [vmem:[%s8321_s4 + $0x690] sm:$0xff]  ;;  %v5341_v1 = vld [vmem:[%s8321_s4 + $0x6a0] sm:$0xff] }
 0x35c   : > { %4415 = vperm.xlu1 %5837, %v5329_v2   ;;  %v1579_v14 = vpop.f32.mrb[28].mxu0  ;;  %v1659_v49 = vpop.f32.mrb[28].mxu1 }
 0x35d   : > { %v5423_v15 = vpack.c.bf16 %v1681_v26, %v1680_v12  ;;  %v5447_v18 = vpack.c.bf16 %v1697_v3, %v1696_v58  ;;  %v1581_v62 = vpop.f32.mrb[29].mxu0  ;;  %v1661_v59 = vpop.f32.mrb[29].mxu1  ;;  %v1580_v17 = vadd.f32 %v1579_v14, %v7321_v37  ;;  %v1660_v4 = vadd.f32 %v1659_v49, %v7395_v46  ;;  %v4791_v12 = vld [vmem:[%s8322_s5 + $0x8] sm:$0xff]  ;;  %v4793_v26 = vld [vmem:[%s8322_s5 + $0x18] sm:$0xff] }
 0x35e   : > { %v1701_v58 = vld [vmem:[#allocation6 + $0x200] sm:$0xff]  ;;  %v1703_v14 = vld [vmem:[#allocation6 + $0x210] sm:$0xff]  ;;  %v1706_v49 = vld [vmem:[#allocation6 + $0x228] sm:$0xff] }
 0x35f   : > { %5424 = vmatpush1.bf16.msra.mxu1 %v5423_v15  ;;  %v1682_v42 = vmax.f32 %v1580_v17, 0.0  ;;  %v1698_v37 = vmax.f32 %v1660_v4, 0.0  ;;  %v4795_v15 = vld [vmem:[%s8322_s5 + $0x28] sm:$0xff]  ;;  %v1707_v17 = vld [vmem:[#allocation6 + $0x230] sm:$0xff]  ;;  %v1710_v4 = vld [vmem:[#allocation6 + $0x248] sm:$0xff] }
 0x360   : > { %4425 = vperm.xlu1 %5837, %v5331_v33   ;;  %v1584_v16 = vpop.f32.mrb[30].mxu0  ;;  %v1664_v43 = vpop.f32.mrb[30].mxu1  ;;  %5425 = vmatprep.subr.bf16.mxu1 %v8359_v28  ;;  %v1708_v59 = vld [vmem:[#allocation6 + $0x238] sm:$0xff]  ;;  %v4797_v33 = vld [vmem:[%s8322_s5 + $0x38] sm:$0xff] }
 0x361   : > { %v1585_v60 = vadd.f32 %v1584_v16, %v6868_v41  ;;  %v1665_v40 = vadd.f32 %v1664_v43, %v6952_v23  ;;  %v1586_v34 = vpop.f32.mrb[31].mxu0  ;;  %v1666_v39 = vpop.f32.mrb[31].mxu1  ;;  %v5337_v23 = vld [vmem:[%s8321_s4 + $0x680] sm:$0xff]  ;;  %v4799_v16 = vld [vmem:[%s8322_s5 + $0x48] sm:$0xff] }
 0x362   : > { %v7869_v41 = vpop.permute.xlu1 %2970  ;;  %v4801_v34 = vld [vmem:[%s8322_s5 + $0x58] sm:$0xff] }
 0x363   : > { %v1683_v20 = vmax.f32 %v1585_v60, 0.0  ;;  %v1699_v46 = vmax.f32 %v1665_v40, 0.0  ;;  %v1709_v60 = vld [vmem:[#allocation6 + $0x240] sm:$0xff]  ;;  %v1712_v40 = vld [vmem:[#allocation6 + $0x258] sm:$0xff] }
 0x364   : > { %4435 = vperm.xlu1 %5837, %v5333_v48   ;;  %v1711_v48 = vld [vmem:[#allocation6 + $0x250] sm:$0xff] }
 0x365   : > { %v5426_v50 = vpack.c.bf16 %v1683_v20, %v1682_v42  ;;  %v5450_v36 = vpack.c.bf16 %v1699_v46, %v1698_v37  ;;  %v1714_v42 = vld [vmem:[#allocation6 + $0x268] sm:$0xff]  ;;  %v4803_v37 = vld [vmem:[%s8322_s5 + $0x68] sm:$0xff] }
 0x366   : > { %v7876_v51 = vpop.permute.xlu1 %2980  ;;  %v1713_v20 = vld [vmem:[#allocation6 + $0x260] sm:$0xff]  ;;  %v1716_v46 = vld [vmem:[#allocation6 + $0x278] sm:$0xff] }
 0x367   : > { %5427 = vmatpush1.bf16.msra.mxu1 %v5426_v50  ;;  %v4805_v50 = vld [vmem:[%s8322_s5 + $0x78] sm:$0xff] }
 0x368   : > { %4445 = vperm.xlu1 %5837, %v5335_v31   ;;  %5428 = vmatprep.subr.bf16.mxu1 %v8359_v28  ;;  %v1715_v31 = vld [vmem:[#allocation6 + $0x270] sm:$0xff] }
 0x36a   : > { %v7887_v56 = vpop.permute.xlu1 %3345 }
 0x36b   : > { %5430 = vmatpush1.bf16.msra.mxu1 %v7763_v47  ;;  %v5343_v47 = vld [vmem:[%s8321_s4 + $0x6b0] sm:$0xff] }
 0x36c   : > { %4455 = vperm.xlu1 %5837, %v5337_v23   ;;  %5431 = vmatprep.subr.bf16.mxu1 %v8359_v28  ;;  %v1718_v23 = vld [vmem:[#allocation6 + $0x288] sm:$0xff] }
 0x36f   : > { %5433 = vmatpush1.bf16.msra.mxu1 %v7778_v30  ;;  %v7895_v30 = vpop.permute.xlu1 %3355 }
 0x370   : > { %4465 = vperm.xlu1 %5837, %v5339_v22   ;;  %5434 = vmatprep.subr.bf16.mxu1 %v8359_v28  ;;  %v4807_v22 = vld [vmem:[%s8322_s5 + $0x88] sm:$0xff] }
 0x373   : > { %5436 = vmatpush1.bf16.msra.mxu1 %v7793_v0  ;;  %v5347_v0 = vld [vmem:[%s8321_s4 + $0x6d0] sm:$0xff]  ;;  %v7906_v2 = vpop.permute.xlu1 %3365 }
 0x374   : > { %4475 = vperm.xlu1 %5837, %v5341_v1   ;;  %5437 = vmatprep.subr.bf16.mxu1 %v8359_v28  ;;  %v1717_v1 = vld [vmem:[#allocation6 + $0x280] sm:$0xff] }
 0x377   : > { %5439 = vmatpush1.bf16.msra.mxu1 %v7808_v63  ;;  %v5349_v63 = vld [vmem:[%s8321_s4 + $0x6e0] sm:$0xff] }
 0x378   : > { %4485 = vperm.xlu1 %5837, %v5343_v47   ;;  %5440 = vmatprep.subr.bf16.mxu1 %v8359_v28 }
 0x37b   : > { %5442 = vmatpush1.bf16.msra.mxu1 %v7823_v10  ;;  %v7913_v10 = vpop.permute.xlu1 %3375 }
 0x37c   : > { %4495 = vperm.xlu1 %5837, %v5345_v32   ;;  %5443 = vmatprep.subr.bf16.mxu1 %v8359_v28  ;;  %v1720_v32 = vld [vmem:[#allocation6 + $0x298] sm:$0xff] }
 0x37f   : > { %5445 = vmatpush1.bf16.msra.mxu1 %v7838_v61  ;;  %v1704_v61 = vld [vmem:[#allocation6 + $0x218] sm:$0xff]  ;;  %v7923_v3 = vpop.permute.xlu1 %3385 }
 0x380   : > { %4505 = vperm.xlu1 %5837, %v5347_v0   ;;  %5446 = vmatprep.subr.bf16.mxu1 %v8359_v28  ;;  %v4809_v0 = vld [vmem:[%s8322_s5 + $0x98] sm:$0xff] }
 0x383   : > { %5448 = vmatpush1.bf16.msra.mxu1 %v5447_v18  ;;  %v1705_v18 = vld [vmem:[#allocation6 + $0x220] sm:$0xff]  ;;  %v7928_v62 = vpop.permute.xlu1 %3395 }
 0x384   : > { %4515 = vperm.xlu1 %5837, %v5349_v63   ;;  %5449 = vmatprep.subr.bf16.mxu1 %v8359_v28  ;;  %v1719_v63 = vld [vmem:[#allocation6 + $0x290] sm:$0xff] }
 0x387   : > { %5451 = vmatpush1.bf16.msra.mxu1 %v5450_v36  ;;  %v7936_v43 = vpop.permute.xlu1 %3405 }
 0x388   : > { %4829 = vperm.xlu1 %5837, %v4791_v12   ;;  %5500 = vmatprep.subr.bf16.mxu1 %v8359_v28  ;;  %v1722_v12 = vld [vmem:[#allocation6 + $0x2a8] sm:$0xff] }
 0x38a   : > { %2023 = vmatmul.mubr.f32.vlgmr.msra.gmra.mrb[32].mxu1 %v1701_v58  ;;  %v4811_v58 = vld [vmem:[%s8322_s5 + $0xa8] sm:$0xff] }
 0x38b   : > { %2027 = vmatprep.mubr.f32.mxu1 %v1704_v61  ;;  %v7941_v39 = vpop.permute.xlu1 %3415 }
 0x38c   : > { %4839 = vperm.xlu1 %5837, %v4793_v26   ;;  %v1721_v26 = vld [vmem:[#allocation6 + $0x2a0] sm:$0xff] }
 0x38e   : > { %2028 = vmatmul.mubr.f32.gmra.mrb[34].mxu1 %v1703_v14  ;;  %v1724_v14 = vld [vmem:[#allocation6 + $0x2b8] sm:$0xff] }
 0x38f   : > { %2032 = vmatprep.mubr.f32.mxu1 %v1706_v49  ;;  %v7949_v36 = vpop.permute.xlu1 %3425  ;;  %v4813_v49 = vld [vmem:[%s8322_s5 + $0xb8] sm:$0xff] }
 0x390   : > { %4849 = vperm.xlu1 %5837, %v4795_v15   ;;  %v1723_v15 = vld [vmem:[#allocation6 + $0x2b0] sm:$0xff] }
 0x392   : > { %2033 = vmatmul.mubr.f32.gmra.mrb[36].mxu1 %v1705_v18 }
 0x393   : > { %2037 = vmatprep.mubr.f32.mxu1 %v1708_v59  ;;  %v7954_v47 = vpop.permute.xlu1 %3435  ;;  %v1726_v59 = vld [vmem:[#allocation6 + $0x2c8] sm:$0xff] }
 0x394   : > { %4859 = vperm.xlu1 %5837, %v4797_v33   ;;  %v4815_v33 = vld [vmem:[%s8322_s5 + $0xc8] sm:$0xff] }
 0x396   : > { %2038 = vmatmul.mubr.f32.gmra.mrb[38].mxu1 %v1707_v17  ;;  %v1725_v17 = vld [vmem:[#allocation6 + $0x2c0] sm:$0xff] }
 0x397   : > { %2042 = vmatprep.mubr.f32.mxu1 %v1710_v4  ;;  %v7962_v61 = vpop.permute.xlu1 %3445  ;;  %v1728_v4 = vld [vmem:[#allocation6 + $0x2d8] sm:$0xff] }
 0x398   : > { %4869 = vperm.xlu1 %5837, %v4799_v16   ;;  %v5350_v16 = vld [vmem:[%s8321_s4 + $0x6e8] sm:$0xff] }
 0x39a   : > { %2043 = vmatmul.mubr.f32.gmra.mrb[40].mxu1 %v1709_v60 }
 0x39b   : > { %2047 = vmatprep.mubr.f32.mxu1 %v1712_v40  ;;  %v7967_v18 = vpop.permute.xlu1 %3455  ;;  %v1727_v40 = vld [vmem:[#allocation6 + $0x2d0] sm:$0xff] }
 0x39c   : > { %4879 = vperm.xlu1 %5837, %v4801_v34   ;;  %v1730_v34 = vld [vmem:[#allocation6 + $0x2e8] sm:$0xff] }
 0x39e   : > { %2048 = vmatmul.mubr.f32.gmra.mrb[42].mxu1 %v1711_v48  ;;  %v5351_v48 = vld [vmem:[%s8321_s4 + $0x6f0] sm:$0xff] }
 0x39f   : > { %2052 = vmatprep.mubr.f32.mxu1 %v1714_v42  ;;  %v7975_v60 = vpop.permute.xlu1 %3465  ;;  %v1729_v42 = vld [vmem:[#allocation6 + $0x2e0] sm:$0xff] }
 0x3a0   : > { %4889 = vperm.xlu1 %5837, %v4803_v37  }
 0x3a2   : > { %2053 = vmatmul.mubr.f32.gmra.mrb[44].mxu1 %v1713_v20  ;;  %v1732_v20 = vld [vmem:[#allocation6 + $0x2f8] sm:$0xff] }
 0x3a3   : > { %2057 = vmatprep.mubr.f32.mxu1 %v1716_v46  ;;  %v7980_v37 = vpop.permute.xlu1 %3475  ;;  %v5352_v46 = vld [vmem:[%s8321_s4 + $0x6f8] sm:$0xff] }
 0x3a4   : > { %4899 = vperm.xlu1 %5837, %v4805_v50   ;;  %v1731_v50 = vld [vmem:[#allocation6 + $0x2f0] sm:$0xff] }
 0x3a6   : > { %2058 = vmatmul.mubr.f32.gmra.mrb[46].mxu1 %v1715_v31  ;;  %v1734_v31 = vld [vmem:[#allocation6 + $0x308] sm:$0xff] }
 0x3a7   : > { %2062 = vmatprep.mubr.f32.mxu1 %v1718_v23  ;;  %v4820_v23 = vld [vmem:[%s8322_s5 + $0xf0] sm:$0xff] }
 0x3a8   : > { %4909 = vperm.xlu1 %5837, %v4807_v22   ;;  %v7988_v22 = vpop.permute.xlu1 %3485 }
 0x3aa   : > { %2063 = vmatmul.mubr.f32.gmra.mrb[48].mxu1 %v1717_v1  ;;  %v1733_v1 = vld [vmem:[#allocation6 + $0x300] sm:$0xff] }
 0x3ab   : > { %2067 = vmatprep.mubr.f32.mxu1 %v1720_v32  ;;  %v1736_v32 = vld [vmem:[#allocation6 + $0x318] sm:$0xff] }
 0x3ac   : > { %4919 = vperm.xlu1 %5837, %v4809_v0   ;;  %v5051_v0 = vld [vmem:[#allocation2] sm:$0x1] }
 0x3ae   : > { %2068 = vmatmul.mubr.f32.gmra.mrb[50].mxu1 %v1719_v63  ;;  %v1735_v63 = vld [vmem:[#allocation6 + $0x310] sm:$0xff] }
 0x3af   : > { %2072 = vmatprep.mubr.f32.mxu1 %v1722_v12  ;;  %v7990_v12 = vpop.permute.xlu1 %3495 }
 0x3b0   : > { %4929 = vperm.xlu1 %5837, %v4811_v58   ;;  %v1738_v58 = vld [vmem:[#allocation6 + $0x328] sm:$0xff] }
 0x3b2   : > { %2073 = vmatmul.mubr.f32.gmra.mrb[52].mxu1 %v1721_v26  ;;  %v1737_v26 = vld [vmem:[#allocation6 + $0x320] sm:$0xff] }
 0x3b3   : > { %2077 = vmatprep.mubr.f32.mxu1 %v1724_v14  ;;  %v1740_v14 = vld [vmem:[#allocation6 + $0x338] sm:$0xff] }
 0x3b4   : > { %4939 = vperm.xlu1 %5837, %v4813_v49   ;;  %v1739_v49 = vld [vmem:[#allocation6 + $0x330] sm:$0xff] }
 0x3b6   : > { %2078 = vmatmul.mubr.f32.gmra.mrb[54].mxu1 %v1723_v15  ;;  %v1742_v15 = vld [vmem:[#allocation6 + $0x348] sm:$0xff] }
 0x3b7   : > { %2082 = vmatprep.mubr.f32.mxu1 %v1726_v59  ;;  %v1741_v59 = vld [vmem:[#allocation6 + $0x340] sm:$0xff] }
 0x3b8   : > { %4949 = vperm.xlu1 %5837, %v4815_v33   ;;  %v1744_v33 = vld [vmem:[#allocation6 + $0x358] sm:$0xff] }
 0x3ba   : > { %2083 = vmatmul.mubr.f32.gmra.mrb[56].mxu1 %v1725_v17  ;;  %v1743_v17 = vld [vmem:[#allocation6 + $0x350] sm:$0xff] }
 0x3bb   : > { %2087 = vmatprep.mubr.f32.mxu1 %v1728_v4  ;;  %v1746_v4 = vld [vmem:[#allocation6 + $0x368] sm:$0xff] }
 0x3bc   : > { %4520 = vperm.xlu1 %5837, %v5350_v16   ;;  %v1745_v16 = vld [vmem:[#allocation6 + $0x360] sm:$0xff] }
 0x3be   : > { %2088 = vmatmul.mubr.f32.gmra.mrb[58].mxu1 %v1727_v40  ;;  %v1748_v40 = vld [vmem:[#allocation6 + $0x378] sm:$0xff] }
 0x3bf   : > { %2092 = vmatprep.mubr.f32.mxu1 %v1730_v34  ;;  %v1747_v34 = vld [vmem:[#allocation6 + $0x370] sm:$0xff] }
 0x3c0   : > { %4525 = vperm.xlu1 %5837, %v5351_v48   ;;  %v1750_v48 = vld [vmem:[#allocation6 + $0x388] sm:$0xff] }
 0x3c2   : > { %2093 = vmatmul.mubr.f32.gmra.mrb[60].mxu1 %v1729_v42  ;;  %v1749_v42 = vld [vmem:[#allocation6 + $0x380] sm:$0xff] }
 0x3c3   : > { %2097 = vmatprep.mubr.f32.mxu1 %v1732_v20  ;;  %v1752_v20 = vld [vmem:[#allocation6 + $0x398] sm:$0xff] }
 0x3c4   : > { %4530 = vperm.xlu1 %5837, %v5352_v46   ;;  %v1751_v46 = vld [vmem:[#allocation6 + $0x390] sm:$0xff] }
 0x3c6   : > { %2098 = vmatmul.mubr.f32.gmra.mrb[62].mxu1 %v1731_v50  ;;  %v1754_v50 = vld [vmem:[#allocation6 + $0x3a8] sm:$0xff] }
 0x3c7   : > { %2102 = vmatprep.mubr.f32.mxu1 %v1734_v31  ;;  %v1753_v31 = vld [vmem:[#allocation6 + $0x3a0] sm:$0xff] }
 0x3c8   : > { %4974 = vperm.xlu1 %5837, %v4820_v23   ;;  %v1756_v23 = vld [vmem:[#allocation6 + $0x3b8] sm:$0xff] }
 0x3ca   : > { %2103 = vmatmul.mubr.f32.gmra.mrb[64].mxu1 %v1733_v1  ;;  %v1755_v1 = vld [vmem:[#allocation6 + $0x3b0] sm:$0xff] }
 0x3cb   : > { %2107 = vmatprep.mubr.f32.mxu1 %v1736_v32  ;;  %v1758_v32 = vld [vmem:[#allocation6 + $0x3c8] sm:$0xff] }
 0x3cc   : > { %5054 = vperm.xlu1 %5837, %v5051_v0   ;;  %v1757_v0 = vld [vmem:[#allocation6 + $0x3c0] sm:$0xff] }
 0x3ce   : > { %2108 = vmatmul.mubr.f32.gmra.mrb[66].mxu1 %v1735_v63  ;;  %v1760_v63 = vld [vmem:[#allocation6 + $0x3d8] sm:$0xff] }
 0x3cf   : > { %2112 = vmatprep.mubr.f32.mxu1 %v1738_v58  ;;  %v1759_v58 = vld [vmem:[#allocation6 + $0x3d0] sm:$0xff] }
 0x3d2   : > { %2113 = vmatmul.mubr.f32.gmra.mrb[68].mxu1 %v1737_v26  ;;  %v1762_v26 = vld [vmem:[#allocation6 + $0x3e8] sm:$0xff] }
 0x3d3   : > { %2117 = vmatprep.mubr.f32.mxu1 %v1740_v14  ;;  %v1761_v14 = vld [vmem:[#allocation6 + $0x3e0] sm:$0xff] }
 0x3d6   : > { %2118 = vmatmul.mubr.f32.gmra.mrb[70].mxu1 %v1739_v49  ;;  %v1764_v49 = vld [vmem:[#allocation6 + $0x3f8] sm:$0xff] }
 0x3d7   : > { %2122 = vmatprep.mubr.f32.mxu1 %v1742_v15  ;;  %v1763_v15 = vld [vmem:[#allocation6 + $0x3f0] sm:$0xff] }
 0x3da   : > { %2123 = vmatmul.mubr.f32.gmra.mrb[72].mxu1 %v1741_v59 }
 0x3db   : > { %2127 = vmatprep.mubr.f32.mxu1 %v1744_v33 }
 0x3de   : > { %2128 = vmatmul.mubr.f32.gmra.mrb[74].mxu1 %v1743_v17 }
 0x3df   : > { %2132 = vmatprep.mubr.f32.mxu1 %v1746_v4  ;;  %v2217_v4 = vld [vmem:[#allocation6 + $0x408] sm:$0xff] }
 0x3e0   : > { %2537 = vmatprep.mubr.f32.mxu0 %v2217_v4 }
 0x3e2   : > { %2133 = vmatmul.mubr.f32.gmra.mrb[76].mxu1 %v1745_v16 }
 0x3e3   : > { %2137 = vmatprep.mubr.f32.mxu1 %v1748_v40 }
 0x3e6   : > { %2138 = vmatmul.mubr.f32.gmra.mrb[78].mxu1 %v1747_v34 }
 0x3e7   : > { %2142 = vmatprep.mubr.f32.mxu1 %v1750_v48 }
 0x3ea   : > { %2143 = vmatmul.mubr.f32.gmra.mrb[80].mxu1 %v1749_v42 }
 0x3eb   : > { %2147 = vmatprep.mubr.f32.mxu1 %v1752_v20 }
 0x3ee   : > { %2148 = vmatmul.mubr.f32.gmra.mrb[82].mxu1 %v1751_v46 }
 0x3ef   : > { %2152 = vmatprep.mubr.f32.mxu1 %v1754_v50 }
 0x3f2   : > { %2153 = vmatmul.mubr.f32.gmra.mrb[84].mxu1 %v1753_v31 }
 0x3f3   : > { %2157 = vmatprep.mubr.f32.mxu1 %v1756_v23 }
 0x3f6   : > { %2158 = vmatmul.mubr.f32.gmra.mrb[86].mxu1 %v1755_v1 }
 0x3f7   : > { %2162 = vmatprep.mubr.f32.mxu1 %v1758_v32 }
 0x3fa   : > { %2163 = vmatmul.mubr.f32.gmra.mrb[88].mxu1 %v1757_v0 }
 0x3fb   : > { %2167 = vmatprep.mubr.f32.mxu1 %v1760_v63 }
 0x3fe   : > { %2168 = vmatmul.mubr.f32.gmra.mrb[90].mxu1 %v1759_v58 }
 0x3ff   : > { %2172 = vmatprep.mubr.f32.mxu1 %v1762_v26 }
 0x402   : > { %2173 = vmatmul.mubr.f32.gmra.mrb[92].mxu1 %v1761_v14 }
 0x403   : > { %2177 = vmatprep.mubr.f32.mxu1 %v1764_v49 }
 0x406   : > { %2178 = vmatmul.mubr.f32.gmra.mrb[94].mxu1 %v1763_v15 }
 0x45d   : > { %v2024_v59 = vpop.f32.mrb[32].mxu1 }
 0x45e   : > { %v2026_v33 = vpop.f32.mrb[33].mxu1  ;;  %v2025_v17 = vadd.f32 %v2024_v59, %v7405_v9 }
 0x460   : > { %v2183_v48 = vmax.f32 %v2025_v17, 0.0 }
 0x461   : > { %v2029_v16 = vpop.f32.mrb[34].mxu1 }
 0x462   : > { %v2030_v40 = vadd.f32 %v2029_v16, %v6964_v24  ;;  %v2031_v34 = vpop.f32.mrb[35].mxu1 }
 0x464   : > { %v2184_v42 = vmax.f32 %v2030_v40, 0.0 }
 0x465   : > { %v2034_v20 = vpop.f32.mrb[36].mxu1 }
 0x466   : > { %v5453_v46 = vpack.c.bf16 %v2184_v42, %v2183_v48  ;;  %v2036_v50 = vpop.f32.mrb[37].mxu1  ;;  %v2035_v31 = vadd.f32 %v2034_v20, %v7413_v25 }
 0x468   : > { %5454 = vmatpush1.bf16.msra.mxu0 %v5453_v46  ;;  %v2185_v32 = vmax.f32 %v2035_v31, 0.0 }
 0x469   : > { %v2039_v23 = vpop.f32.mrb[38].mxu1  ;;  %5455 = vmatprep.subr.bf16.mxu0 %v8359_v28 }
 0x46a   : > { %v2040_v1 = vadd.f32 %v2039_v23, %v6977_v53  ;;  %v2041_v9 = vpop.f32.mrb[39].mxu1 }
 0x46c   : > { %v2186_v0 = vmax.f32 %v2040_v1, 0.0 }
 0x46d   : > { %v2044_v63 = vpop.f32.mrb[40].mxu1 }
 0x46e   : > { %v5456_v58 = vpack.c.bf16 %v2186_v0, %v2185_v32  ;;  %v2046_v24 = vpop.f32.mrb[41].mxu1  ;;  %v2045_v26 = vadd.f32 %v2044_v63, %v7423_v44 }
 0x470   : > { %5457 = vmatpush1.bf16.msra.mxu0 %v5456_v58  ;;  %v2187_v15 = vmax.f32 %v2045_v26, 0.0 }
 0x471   : > { %v2049_v14 = vpop.f32.mrb[42].mxu1  ;;  %5458 = vmatprep.subr.bf16.mxu0 %v8359_v28 }
 0x472   : > { %v2050_v25 = vadd.f32 %v2049_v14, %v6986_v21  ;;  %v2051_v49 = vpop.f32.mrb[43].mxu1 }
 0x474   : > { %v2188_v59 = vmax.f32 %v2050_v25, 0.0 }
 0x475   : > { %v2054_v33 = vpop.f32.mrb[44].mxu1 }
 0x476   : > { %v5459_v17 = vpack.c.bf16 %v2188_v59, %v2187_v15  ;;  %v2056_v53 = vpop.f32.mrb[45].mxu1  ;;  %v2055_v4 = vadd.f32 %v2054_v33, %v7433_v11 }
 0x478   : > { %5460 = vmatpush1.bf16.msra.mxu0 %v5459_v17  ;;  %v2189_v34 = vmax.f32 %v2055_v4, 0.0 }
 0x479   : > { %v2059_v16 = vpop.f32.mrb[46].mxu1  ;;  %5461 = vmatprep.subr.bf16.mxu0 %v8359_v28 }
 0x47a   : > { %v2060_v44 = vadd.f32 %v2059_v16, %v6994_v52  ;;  %v2061_v40 = vpop.f32.mrb[47].mxu1 }
 0x47b   : > { %v8432_v40 = vld [vmem:[#allocation13_spill] sm:$0xff] }
 0x47c   : > { %v2190_v48 = vmax.f32 %v2060_v44, 0.0 }
 0x47d   : > { %v2064_v42 = vpop.f32.mrb[48].mxu1 }
 0x47e   : > { %v5462_v20 = vpack.c.bf16 %v2190_v48, %v2189_v34  ;;  %v2066_v21 = vpop.f32.mrb[49].mxu1  ;;  %v2065_v46 = vadd.f32 %v2064_v42, %v7441_v38 }
 0x480   : > { %5463 = vmatpush1.bf16.msra.mxu0 %v5462_v20  ;;  %v2191_v23 = vmax.f32 %v2065_v46, 0.0  ;;  %v8433_v46 = vld [vmem:[#allocation50_spill] sm:$0xff] }
 0x481   : > { %v2069_v50 = vpop.f32.mrb[50].mxu1  ;;  %5464 = vmatprep.subr.bf16.mxu0 %v8359_v28 }
 0x482   : > { %v2070_v11 = vadd.f32 %v2069_v50, %v7004_v5  ;;  %v2071_v31 = vpop.f32.mrb[51].mxu1 }
 0x483   : > { %v8434_v31 = vld [vmem:[#allocation14_spill] sm:$0xff] }
 0x484   : > { %v2192_v1 = vmax.f32 %v2070_v11, 0.0 }
 0x485   : > { %v2074_v9 = vpop.f32.mrb[52].mxu1 }
 0x486   : > { %v5465_v32 = vpack.c.bf16 %v2192_v1, %v2191_v23  ;;  %v2076_v52 = vpop.f32.mrb[53].mxu1  ;;  %v2075_v0 = vadd.f32 %v2074_v9, %v7451_v13 }
 0x488   : > { %5466 = vmatpush1.bf16.msra.mxu0 %v5465_v32  ;;  %v2193_v24 = vmax.f32 %v2075_v0, 0.0 }
 0x489   : > { %v2079_v63 = vpop.f32.mrb[54].mxu1  ;;  %5467 = vmatprep.subr.bf16.mxu0 %v8359_v28 }
 0x48a   : > { %v2080_v38 = vadd.f32 %v2079_v63, %v7014_v7  ;;  %v2081_v58 = vpop.f32.mrb[55].mxu1  ;;  %v8435_v63 = vld [vmem:[#allocation52_spill] sm:$0xff] }
 0x48c   : > { %v2194_v26 = vmax.f32 %v2080_v38, 0.0 }
 0x48d   : > { %v2084_v14 = vpop.f32.mrb[56].mxu1 }
 0x48e   : > { %v5468_v25 = vpack.c.bf16 %v2194_v26, %v2193_v24  ;;  %v2086_v5 = vpop.f32.mrb[57].mxu1  ;;  %v2085_v49 = vadd.f32 %v2084_v14, %v7461_v27  ;;  %v8436_v24 = vld [vmem:[#allocation15_spill] sm:$0xff] }
 0x490   : > { %5469 = vmatpush1.bf16.msra.mxu0 %v5468_v25  ;;  %v2195_v33 = vmax.f32 %v2085_v49, 0.0 }
 0x491   : > { %v2089_v15 = vpop.f32.mrb[58].mxu1  ;;  %5470 = vmatprep.subr.bf16.mxu0 %v8359_v28 }
 0x492   : > { %v2090_v13 = vadd.f32 %v2089_v15, %v7026_v6  ;;  %v2091_v59 = vpop.f32.mrb[59].mxu1 }
 0x493   : > { %v8437_v59 = vld [vmem:[#allocation53_spill] sm:$0xff] }
 0x494   : > { %v2196_v17 = vmax.f32 %v2090_v13, 0.0 }
 0x495   : > { %v2094_v53 = vpop.f32.mrb[60].mxu1 }
 0x496   : > { %v5471_v4 = vpack.c.bf16 %v2196_v17, %v2195_v33  ;;  %v2096_v7 = vpop.f32.mrb[61].mxu1  ;;  %v2095_v16 = vadd.f32 %v2094_v53, %v7469_v8  ;;  %v8438_v53 = vld [vmem:[#allocation16_spill] sm:$0xff] }
 0x498   : > { %5472 = vmatpush1.bf16.msra.mxu0 %v5471_v4  ;;  %v2197_v48 = vmax.f32 %v2095_v16, 0.0 }
 0x499   : > { %v2099_v44 = vpop.f32.mrb[62].mxu1  ;;  %5473 = vmatprep.subr.bf16.mxu0 %v8359_v28 }
 0x49a   : > { %v2100_v27 = vadd.f32 %v2099_v44, %v8432_v40  ;;  %v2101_v34 = vpop.f32.mrb[63].mxu1 }
 0x49c   : > { %v2198_v42 = vmax.f32 %v2100_v27, 0.0 }
 0x49d   : > { %v2104_v20 = vpop.f32.mrb[64].mxu1 }
 0x49e   : > { %v5474_v21 = vpack.c.bf16 %v2198_v42, %v2197_v48  ;;  %v2106_v6 = vpop.f32.mrb[65].mxu1  ;;  %v2105_v50 = vadd.f32 %v2104_v20, %v8433_v46  ;;  %v8439_v48 = vld [vmem:[#allocation55_spill] sm:$0xff] }
 0x4a0   : > { %5475 = vmatpush1.bf16.msra.mxu0 %v5474_v21  ;;  %v2199_v1 = vmax.f32 %v2105_v50, 0.0  ;;  %v8440_v21 = vld [vmem:[#allocation17_spill] sm:$0xff] }
 0x4a1   : > { %v2109_v11 = vpop.f32.mrb[66].mxu1  ;;  %5476 = vmatprep.subr.bf16.mxu0 %v8359_v28 }
 0x4a2   : > { %v2110_v8 = vadd.f32 %v2109_v11, %v8434_v31  ;;  %v2111_v23 = vpop.f32.mrb[67].mxu1 }
 0x4a4   : > { %v2200_v9 = vmax.f32 %v2110_v8, 0.0 }
 0x4a5   : > { %v2114_v32 = vpop.f32.mrb[68].mxu1 }
 0x4a6   : > { %v5477_v52 = vpack.c.bf16 %v2200_v9, %v2199_v1  ;;  %v2116_v0 = vpop.f32.mrb[69].mxu1  ;;  %v2115_v38 = vadd.f32 %v2114_v32, %v8435_v63  ;;  %v8441_v1 = vld [vmem:[#allocation57_spill] sm:$0xff] }
 0x4a8   : > { %5478 = vmatpush1.bf16.msra.mxu0 %v5477_v52  ;;  %v2201_v25 = vmax.f32 %v2115_v38, 0.0  ;;  %v8442_v52 = vld [vmem:[#allocation18_spill] sm:$0xff] }
 0x4a9   : > { %v2119_v58 = vpop.f32.mrb[70].mxu1  ;;  %5479 = vmatprep.subr.bf16.mxu0 %v8359_v28 }
 0x4aa   : > { %v2120_v26 = vadd.f32 %v2119_v58, %v8436_v24  ;;  %v2121_v14 = vpop.f32.mrb[71].mxu1 }
 0x4ac   : > { %v2202_v5 = vmax.f32 %v2120_v26, 0.0 }
 0x4ad   : > { %v2124_v49 = vpop.f32.mrb[72].mxu1 }
 0x4ae   : > { %v5480_v15 = vpack.c.bf16 %v2202_v5, %v2201_v25  ;;  %v2126_v13 = vpop.f32.mrb[73].mxu1  ;;  %v2125_v33 = vadd.f32 %v2124_v49, %v8437_v59  ;;  %v8443_v25 = vld [vmem:[#allocation58_spill] sm:$0xff] }
 0x4b0   : > { %5481 = vmatpush1.bf16.msra.mxu0 %v5480_v15  ;;  %v2203_v16 = vmax.f32 %v2125_v33, 0.0  ;;  %v8444_v15 = vld [vmem:[#allocation19_spill] sm:$0xff] }
 0x4b1   : > { %v2129_v17 = vpop.f32.mrb[74].mxu1  ;;  %5482 = vmatprep.subr.bf16.mxu0 %v8359_v28 }
 0x4b2   : > { %v2130_v4 = vadd.f32 %v2129_v17, %v8438_v53  ;;  %v2131_v7 = vpop.f32.mrb[75].mxu1 }
 0x4b4   : > { %v2204_v44 = vmax.f32 %v2130_v4, 0.0 }
 0x4b5   : > { %v2134_v40 = vpop.f32.mrb[76].mxu1 }
 0x4b6   : > { %v5483_v27 = vpack.c.bf16 %v2204_v44, %v2203_v16  ;;  %v2136_v34 = vpop.f32.mrb[77].mxu1  ;;  %v2135_v42 = vadd.f32 %v2134_v40, %v8439_v48  ;;  %v8445_v16 = vld [vmem:[#allocation60_spill] sm:$0xff] }
 0x4b8   : > { %5484 = vmatpush1.bf16.msra.mxu0 %v5483_v27  ;;  %v2205_v50 = vmax.f32 %v2135_v42, 0.0  ;;  %v8446_v27 = vld [vmem:[#allocation20_spill] sm:$0xff] }
 0x4b9   : > { %v2139_v20 = vpop.f32.mrb[78].mxu1  ;;  %5485 = vmatprep.subr.bf16.mxu0 %v8359_v28 }
 0x4ba   : > { %v2140_v6 = vadd.f32 %v2139_v20, %v8440_v21  ;;  %v2141_v46 = vpop.f32.mrb[79].mxu1 }
 0x4bc   : > { %v2206_v11 = vmax.f32 %v2140_v6, 0.0 }
 0x4bd   : > { %v2144_v31 = vpop.f32.mrb[80].mxu1 }
 0x4be   : > { %v5486_v8 = vpack.c.bf16 %v2206_v11, %v2205_v50  ;;  %v2146_v23 = vpop.f32.mrb[81].mxu1  ;;  %v2145_v9 = vadd.f32 %v2144_v31, %v8441_v1  ;;  %v8447_v50 = vld [vmem:[#allocation62_spill] sm:$0xff] }
 0x4c0   : > { %5487 = vmatpush1.bf16.msra.mxu0 %v5486_v8  ;;  %v2207_v38 = vmax.f32 %v2145_v9, 0.0  ;;  %v8448_v8 = vld [vmem:[#allocation21_spill] sm:$0xff] }
 0x4c1   : > { %v2149_v32 = vpop.f32.mrb[82].mxu1  ;;  %5488 = vmatprep.subr.bf16.mxu0 %v8359_v28 }
 0x4c2   : > { %v2150_v0 = vadd.f32 %v2149_v32, %v8442_v52  ;;  %v2151_v63 = vpop.f32.mrb[83].mxu1 }
 0x4c3   : > { %v2219_v63 = vld [vmem:[#allocation6 + $0x418] sm:$0xff] }
 0x4c4   : > { %v2208_v58 = vmax.f32 %v2150_v0, 0.0  ;;  %v2216_v0 = vld [vmem:[#allocation6 + $0x400] sm:$0xff] }
 0x4c5   : > { %v2154_v24 = vpop.f32.mrb[84].mxu1 }
 0x4c6   : > { %v5489_v26 = vpack.c.bf16 %v2208_v58, %v2207_v38  ;;  %v2156_v14 = vpop.f32.mrb[85].mxu1  ;;  %v2155_v5 = vadd.f32 %v2154_v24, %v8443_v25  ;;  %v2218_v38 = vld [vmem:[#allocation6 + $0x410] sm:$0xff]  ;;  %v2221_v58 = vld [vmem:[#allocation6 + $0x428] sm:$0xff]  ;;  %v2220_v24 = vld [vmem:[#allocation6 + $0x420] sm:$0xff] }
 0x4c7   : > { %v2222_v14 = vld [vmem:[#allocation6 + $0x430] sm:$0xff]  ;;  %v2225_v25 = vld [vmem:[#allocation6 + $0x448] sm:$0xff] }
 0x4c8   : > { %5490 = vmatpush1.bf16.msra.mxu0 %v5489_v26  ;;  %v2209_v33 = vmax.f32 %v2155_v5, 0.0  ;;  %v2223_v26 = vld [vmem:[#allocation6 + $0x438] sm:$0xff]  ;;  %v2224_v5 = vld [vmem:[#allocation6 + $0x440] sm:$0xff] }
 0x4c9   : > { %v2159_v49 = vpop.f32.mrb[86].mxu1  ;;  %5491 = vmatprep.subr.bf16.mxu0 %v8359_v28 }
 0x4ca   : > { %v2160_v13 = vadd.f32 %v2159_v49, %v8444_v15  ;;  %v2161_v59 = vpop.f32.mrb[87].mxu1  ;;  %v2227_v49 = vld [vmem:[#allocation6 + $0x458] sm:$0xff]  ;;  %v2226_v15 = vld [vmem:[#allocation6 + $0x450] sm:$0xff] }
 0x4cb   : > { %v2228_v59 = vld [vmem:[#allocation6 + $0x460] sm:$0xff] }
 0x4cc   : > { %v2210_v17 = vmax.f32 %v2160_v13, 0.0  ;;  %v2229_v13 = vld [vmem:[#allocation6 + $0x468] sm:$0xff] }
 0x4cd   : > { %v2164_v53 = vpop.f32.mrb[88].mxu1 }
 0x4ce   : > { %v5492_v4 = vpack.c.bf16 %v2210_v17, %v2209_v33  ;;  %v2166_v7 = vpop.f32.mrb[89].mxu1  ;;  %v2165_v44 = vadd.f32 %v2164_v53, %v8445_v16  ;;  %v2231_v33 = vld [vmem:[#allocation6 + $0x478] sm:$0xff]  ;;  %v2230_v17 = vld [vmem:[#allocation6 + $0x470] sm:$0xff]  ;;  %v2233_v53 = vld [vmem:[#allocation6 + $0x488] sm:$0xff] }
 0x4cf   : > { %v2235_v7 = vld [vmem:[#allocation6 + $0x498] sm:$0xff]  ;;  %v2234_v16 = vld [vmem:[#allocation6 + $0x490] sm:$0xff] }
 0x4d0   : > { %5493 = vmatpush1.bf16.msra.mxu0 %v5492_v4  ;;  %v2211_v42 = vmax.f32 %v2165_v44, 0.0  ;;  %v2232_v4 = vld [vmem:[#allocation6 + $0x480] sm:$0xff]  ;;  %v2237_v44 = vld [vmem:[#allocation6 + $0x4a8] sm:$0xff] }
 0x4d1   : > { %v2169_v40 = vpop.f32.mrb[90].mxu1  ;;  %5494 = vmatprep.subr.bf16.mxu0 %v8359_v28 }
 0x4d2   : > { %v2170_v34 = vadd.f32 %v2169_v40, %v8446_v27  ;;  %v2171_v48 = vpop.f32.mrb[91].mxu1  ;;  %v2236_v40 = vld [vmem:[#allocation6 + $0x4a0] sm:$0xff]  ;;  %v2239_v27 = vld [vmem:[#allocation6 + $0x4b8] sm:$0xff] }
 0x4d3   : > { %v2241_v48 = vld [vmem:[#allocation6 + $0x4c8] sm:$0xff] }
 0x4d4   : > { %v2212_v20 = vmax.f32 %v2170_v34, 0.0  ;;  %v2238_v34 = vld [vmem:[#allocation6 + $0x4b0] sm:$0xff] }
 0x4d5   : > { %v2174_v21 = vpop.f32.mrb[92].mxu1 }
 0x4d6   : > { %v5495_v6 = vpack.c.bf16 %v2212_v20, %v2211_v42  ;;  %v2176_v46 = vpop.f32.mrb[93].mxu1  ;;  %v2175_v11 = vadd.f32 %v2174_v21, %v8447_v50  ;;  %v2240_v42 = vld [vmem:[#allocation6 + $0x4c0] sm:$0xff]  ;;  %v2243_v20 = vld [vmem:[#allocation6 + $0x4d8] sm:$0xff]  ;;  %v2242_v21 = vld [vmem:[#allocation6 + $0x4d0] sm:$0xff] }
 0x4d7   : > { %v2244_v46 = vld [vmem:[#allocation6 + $0x4e0] sm:$0xff]  ;;  %v2247_v50 = vld [vmem:[#allocation6 + $0x4f8] sm:$0xff] }
 0x4d8   : > { %5496 = vmatpush1.bf16.msra.mxu0 %v5495_v6  ;;  %v2213_v9 = vmax.f32 %v2175_v11, 0.0  ;;  %v2245_v6 = vld [vmem:[#allocation6 + $0x4e8] sm:$0xff]  ;;  %v2246_v11 = vld [vmem:[#allocation6 + $0x4f0] sm:$0xff] }
 0x4d9   : > { %v2179_v31 = vpop.f32.mrb[94].mxu1  ;;  %5497 = vmatprep.subr.bf16.mxu0 %v8359_v28 }
 0x4da   : > { %v2180_v23 = vadd.f32 %v2179_v31, %v8448_v8  ;;  %v2181_v1 = vpop.f32.mrb[95].mxu1  ;;  %v2249_v31 = vld [vmem:[#allocation6 + $0x508] sm:$0xff]  ;;  %v2248_v8 = vld [vmem:[#allocation6 + $0x500] sm:$0xff] }
 0x4db   : > { %v2250_v1 = vld [vmem:[#allocation6 + $0x510] sm:$0xff] }
 0x4dc   : > { %v2214_v32 = vmax.f32 %v2180_v23, 0.0  ;;  %v2251_v23 = vld [vmem:[#allocation6 + $0x518] sm:$0xff] }
 0x4de   : > { %v5498_v52 = vpack.c.bf16 %v2214_v32, %v2213_v9  ;;  %v2253_v9 = vld [vmem:[#allocation6 + $0x528] sm:$0xff]  ;;  %v2252_v32 = vld [vmem:[#allocation6 + $0x520] sm:$0xff] }
 0x4e0   : > { %5499 = vmatpush1.bf16.msra.mxu0 %v5498_v52  ;;  %v2255_v52 = vld [vmem:[#allocation6 + $0x538] sm:$0xff] }
 0x4e1   : > { %5548 = vmatprep.subr.bf16.mxu0 %v8359_v28 }
 0x4e3   : > { %2538 = vmatmul.mubr.f32.vlgmr.msra.gmra.mrb[32].mxu0 %v2216_v0  ;;  %v2254_v0 = vld [vmem:[#allocation6 + $0x530] sm:$0xff] }
 0x4e4   : > { %2542 = vmatprep.mubr.f32.mxu0 %v2219_v63  ;;  %v2257_v63 = vld [vmem:[#allocation6 + $0x548] sm:$0xff] }
 0x4e7   : > { %2543 = vmatmul.mubr.f32.gmra.mrb[34].mxu0 %v2218_v38  ;;  %v2256_v38 = vld [vmem:[#allocation6 + $0x540] sm:$0xff] }
 0x4e8   : > { %2547 = vmatprep.mubr.f32.mxu0 %v2221_v58  ;;  %v2259_v58 = vld [vmem:[#allocation6 + $0x558] sm:$0xff] }
 0x4eb   : > { %2548 = vmatmul.mubr.f32.gmra.mrb[36].mxu0 %v2220_v24  ;;  %v2258_v24 = vld [vmem:[#allocation6 + $0x550] sm:$0xff] }
 0x4ec   : > { %2552 = vmatprep.mubr.f32.mxu0 %v2223_v26  ;;  %v2261_v26 = vld [vmem:[#allocation6 + $0x568] sm:$0xff] }
 0x4ef   : > { %2553 = vmatmul.mubr.f32.gmra.mrb[38].mxu0 %v2222_v14  ;;  %v2260_v14 = vld [vmem:[#allocation6 + $0x560] sm:$0xff] }
 0x4f0   : > { %2557 = vmatprep.mubr.f32.mxu0 %v2225_v25  ;;  %v2263_v25 = vld [vmem:[#allocation6 + $0x578] sm:$0xff] }
 0x4f3   : > { %2558 = vmatmul.mubr.f32.gmra.mrb[40].mxu0 %v2224_v5  ;;  %v2262_v5 = vld [vmem:[#allocation6 + $0x570] sm:$0xff] }
 0x4f4   : > { %2562 = vmatprep.mubr.f32.mxu0 %v2227_v49  ;;  %v2265_v49 = vld [vmem:[#allocation6 + $0x588] sm:$0xff] }
 0x4f7   : > { %2563 = vmatmul.mubr.f32.gmra.mrb[42].mxu0 %v2226_v15  ;;  %v2264_v15 = vld [vmem:[#allocation6 + $0x580] sm:$0xff] }
 0x4f8   : > { %2567 = vmatprep.mubr.f32.mxu0 %v2229_v13  ;;  %v2267_v13 = vld [vmem:[#allocation6 + $0x598] sm:$0xff] }
 0x4fb   : > { %2568 = vmatmul.mubr.f32.gmra.mrb[44].mxu0 %v2228_v59  ;;  %v2266_v59 = vld [vmem:[#allocation6 + $0x590] sm:$0xff] }
 0x4fc   : > { %2572 = vmatprep.mubr.f32.mxu0 %v2231_v33  ;;  %v2269_v33 = vld [vmem:[#allocation6 + $0x5a8] sm:$0xff] }
 0x4ff   : > { %2573 = vmatmul.mubr.f32.gmra.mrb[46].mxu0 %v2230_v17  ;;  %v2268_v17 = vld [vmem:[#allocation6 + $0x5a0] sm:$0xff] }
 0x500   : > { %2577 = vmatprep.mubr.f32.mxu0 %v2233_v53  ;;  %v2271_v53 = vld [vmem:[#allocation6 + $0x5b8] sm:$0xff] }
 0x503   : > { %2578 = vmatmul.mubr.f32.gmra.mrb[48].mxu0 %v2232_v4  ;;  %v2270_v4 = vld [vmem:[#allocation6 + $0x5b0] sm:$0xff] }
 0x504   : > { %2582 = vmatprep.mubr.f32.mxu0 %v2235_v7  ;;  %v2273_v7 = vld [vmem:[#allocation6 + $0x5c8] sm:$0xff] }
 0x507   : > { %2583 = vmatmul.mubr.f32.gmra.mrb[50].mxu0 %v2234_v16  ;;  %v2272_v16 = vld [vmem:[#allocation6 + $0x5c0] sm:$0xff] }
 0x508   : > { %2587 = vmatprep.mubr.f32.mxu0 %v2237_v44  ;;  %v2275_v44 = vld [vmem:[#allocation6 + $0x5d8] sm:$0xff] }
 0x50b   : > { %2588 = vmatmul.mubr.f32.gmra.mrb[52].mxu0 %v2236_v40  ;;  %v2274_v40 = vld [vmem:[#allocation6 + $0x5d0] sm:$0xff] }
 0x50c   : > { %2592 = vmatprep.mubr.f32.mxu0 %v2239_v27  ;;  %v2277_v27 = vld [vmem:[#allocation6 + $0x5e8] sm:$0xff] }
 0x50f   : > { %2593 = vmatmul.mubr.f32.gmra.mrb[54].mxu0 %v2238_v34  ;;  %v2276_v34 = vld [vmem:[#allocation6 + $0x5e0] sm:$0xff] }
 0x510   : > { %2597 = vmatprep.mubr.f32.mxu0 %v2241_v48  ;;  %v2279_v48 = vld [vmem:[#allocation6 + $0x5f8] sm:$0xff] }
 0x513   : > { %2598 = vmatmul.mubr.f32.gmra.mrb[56].mxu0 %v2240_v42  ;;  %v2278_v42 = vld [vmem:[#allocation6 + $0x5f0] sm:$0xff] }
 0x514   : > { %2602 = vmatprep.mubr.f32.mxu0 %v2243_v20 }
 0x517   : > { %2603 = vmatmul.mubr.f32.gmra.mrb[58].mxu0 %v2242_v21 }
 0x518   : > { %2607 = vmatprep.mubr.f32.mxu0 %v2245_v6  ;;  %v8449_v6 = vld [vmem:[#allocation63_spill] sm:$0xff] }
 0x51b   : > { %2608 = vmatmul.mubr.f32.gmra.mrb[60].mxu0 %v2244_v46 }
 0x51c   : > { %2612 = vmatprep.mubr.f32.mxu0 %v2247_v50  ;;  %v2732_v50 = vld [vmem:[#allocation6 + $0x608] sm:$0xff] }
 0x51d   : > { %3052 = vmatprep.mubr.f32.mxu1 %v2732_v50 }
 0x51f   : > { %2613 = vmatmul.mubr.f32.gmra.mrb[62].mxu0 %v2246_v11 }
 0x520   : > { %2617 = vmatprep.mubr.f32.mxu0 %v2249_v31  ;;  %v8450_v31 = vld [vmem:[#allocation22_spill] sm:$0xff] }
 0x523   : > { %2618 = vmatmul.mubr.f32.gmra.mrb[64].mxu0 %v2248_v8 }
 0x524   : > { %2622 = vmatprep.mubr.f32.mxu0 %v2251_v23 }
 0x527   : > { %2623 = vmatmul.mubr.f32.gmra.mrb[66].mxu0 %v2250_v1 }
 0x528   : > { %2627 = vmatprep.mubr.f32.mxu0 %v2253_v9 }
 0x52b   : > { %2628 = vmatmul.mubr.f32.gmra.mrb[68].mxu0 %v2252_v32 }
 0x52c   : > { %2632 = vmatprep.mubr.f32.mxu0 %v2255_v52 }
 0x52f   : > { %2633 = vmatmul.mubr.f32.gmra.mrb[70].mxu0 %v2254_v0 }
 0x530   : > { %2637 = vmatprep.mubr.f32.mxu0 %v2257_v63  ;;  %v8451_v63 = vld [vmem:[#allocation65_spill] sm:$0xff] }
 0x533   : > { %2638 = vmatmul.mubr.f32.gmra.mrb[72].mxu0 %v2256_v38 }
 0x534   : > { %2642 = vmatprep.mubr.f32.mxu0 %v2259_v58 }
 0x537   : > { %2643 = vmatmul.mubr.f32.gmra.mrb[74].mxu0 %v2258_v24  ;;  %v8452_v24 = vld [vmem:[#allocation23_spill] sm:$0xff] }
 0x538   : > { %2647 = vmatprep.mubr.f32.mxu0 %v2261_v26 }
 0x53b   : > { %2648 = vmatmul.mubr.f32.gmra.mrb[76].mxu0 %v2260_v14 }
 0x53c   : > { %2652 = vmatprep.mubr.f32.mxu0 %v2263_v25 }
 0x53f   : > { %2653 = vmatmul.mubr.f32.gmra.mrb[78].mxu0 %v2262_v5 }
 0x540   : > { %2657 = vmatprep.mubr.f32.mxu0 %v2265_v49 }
 0x543   : > { %2658 = vmatmul.mubr.f32.gmra.mrb[80].mxu0 %v2264_v15 }
 0x544   : > { %2662 = vmatprep.mubr.f32.mxu0 %v2267_v13 }
 0x547   : > { %2663 = vmatmul.mubr.f32.gmra.mrb[82].mxu0 %v2266_v59  ;;  %v8453_v59 = vld [vmem:[#allocation67_spill] sm:$0xff] }
 0x548   : > { %2667 = vmatprep.mubr.f32.mxu0 %v2269_v33 }
 0x54b   : > { %2668 = vmatmul.mubr.f32.gmra.mrb[84].mxu0 %v2268_v17 }
 0x54c   : > { %2672 = vmatprep.mubr.f32.mxu0 %v2271_v53  ;;  %v8454_v53 = vld [vmem:[#allocation24_spill] sm:$0xff] }
 0x54f   : > { %2673 = vmatmul.mubr.f32.gmra.mrb[86].mxu0 %v2270_v4 }
 0x550   : > { %2677 = vmatprep.mubr.f32.mxu0 %v2273_v7 }
 0x553   : > { %2678 = vmatmul.mubr.f32.gmra.mrb[88].mxu0 %v2272_v16 }
 0x554   : > { %2682 = vmatprep.mubr.f32.mxu0 %v2275_v44 }
 0x557   : > { %2683 = vmatmul.mubr.f32.gmra.mrb[90].mxu0 %v2274_v40 }
 0x558   : > { %2687 = vmatprep.mubr.f32.mxu0 %v2277_v27 }
 0x55b   : > { %2688 = vmatmul.mubr.f32.gmra.mrb[92].mxu0 %v2276_v34 }
 0x55c   : > { %2692 = vmatprep.mubr.f32.mxu0 %v2279_v48  ;;  %v8455_v48 = vld [vmem:[#allocation68_spill] sm:$0xff] }
 0x55f   : > { %2693 = vmatmul.mubr.f32.gmra.mrb[94].mxu0 %v2278_v42 }
 0x5b6   : > { %v2539_v20 = vpop.f32.mrb[32].mxu0 }
 0x5b7   : > { %v2541_v21 = vpop.f32.mrb[33].mxu0  ;;  %v2540_v46 = vadd.f32 %v2539_v20, %v8449_v6 }
 0x5b8   : > { %v8456_v21 = vld [vmem:[#allocation25_spill] sm:$0xff] }
 0x5b9   : > { %v2698_v1 = vmax.f32 %v2540_v46, 0.0 }
 0x5ba   : > { %v2544_v11 = vpop.f32.mrb[34].mxu0 }
 0x5bb   : > { %v2545_v8 = vadd.f32 %v2544_v11, %v8450_v31  ;;  %v2546_v23 = vpop.f32.mrb[35].mxu0 }
 0x5bd   : > { %v2699_v9 = vmax.f32 %v2545_v8, 0.0 }
 0x5be   : > { %v2549_v32 = vpop.f32.mrb[36].mxu0 }
 0x5bf   : > { %v5501_v52 = vpack.c.bf16 %v2699_v9, %v2698_v1  ;;  %v2551_v0 = vpop.f32.mrb[37].mxu0  ;;  %v2550_v38 = vadd.f32 %v2549_v32, %v8451_v63  ;;  %v8457_v1 = vld [vmem:[#allocation70_spill] sm:$0xff] }
 0x5c1   : > { %5502 = vmatpush1.bf16.msra.mxu1 %v5501_v52  ;;  %v2700_v25 = vmax.f32 %v2550_v38, 0.0  ;;  %v8458_v52 = vld [vmem:[#allocation26_spill] sm:$0xff] }
 0x5c2   : > { %v2554_v58 = vpop.f32.mrb[38].mxu0  ;;  %5503 = vmatprep.subr.bf16.mxu1 %v8359_v28 }
 0x5c3   : > { %v2555_v26 = vadd.f32 %v2554_v58, %v8452_v24  ;;  %v2556_v14 = vpop.f32.mrb[39].mxu0 }
 0x5c5   : > { %v2701_v5 = vmax.f32 %v2555_v26, 0.0 }
 0x5c6   : > { %v2559_v49 = vpop.f32.mrb[40].mxu0 }
 0x5c7   : > { %v5504_v15 = vpack.c.bf16 %v2701_v5, %v2700_v25  ;;  %v2561_v13 = vpop.f32.mrb[41].mxu0  ;;  %v2560_v33 = vadd.f32 %v2559_v49, %v8453_v59  ;;  %v8459_v25 = vld [vmem:[#allocation72_spill] sm:$0xff] }
 0x5c9   : > { %5505 = vmatpush1.bf16.msra.mxu1 %v5504_v15  ;;  %v2702_v16 = vmax.f32 %v2560_v33, 0.0  ;;  %v8460_v15 = vld [vmem:[#allocation27_spill] sm:$0xff] }
 0x5ca   : > { %v2564_v17 = vpop.f32.mrb[42].mxu0  ;;  %5506 = vmatprep.subr.bf16.mxu1 %v8359_v28 }
 0x5cb   : > { %v2565_v4 = vadd.f32 %v2564_v17, %v8454_v53  ;;  %v2566_v7 = vpop.f32.mrb[43].mxu0 }
 0x5cd   : > { %v2703_v44 = vmax.f32 %v2565_v4, 0.0 }
 0x5ce   : > { %v2569_v40 = vpop.f32.mrb[44].mxu0 }
 0x5cf   : > { %v5507_v27 = vpack.c.bf16 %v2703_v44, %v2702_v16  ;;  %v2571_v34 = vpop.f32.mrb[45].mxu0  ;;  %v2570_v42 = vadd.f32 %v2569_v40, %v8455_v48  ;;  %v8461_v16 = vld [vmem:[#allocation73_spill] sm:$0xff] }
 0x5d1   : > { %5508 = vmatpush1.bf16.msra.mxu1 %v5507_v27  ;;  %v2704_v50 = vmax.f32 %v2570_v42, 0.0  ;;  %v8462_v27 = vld [vmem:[#allocation28_spill] sm:$0xff] }
 0x5d2   : > { %v2574_v20 = vpop.f32.mrb[46].mxu0  ;;  %5509 = vmatprep.subr.bf16.mxu1 %v8359_v28 }
 0x5d3   : > { %v2575_v6 = vadd.f32 %v2574_v20, %v8456_v21  ;;  %v2576_v46 = vpop.f32.mrb[47].mxu0 }
 0x5d5   : > { %v2705_v11 = vmax.f32 %v2575_v6, 0.0 }
 0x5d6   : > { %v2579_v31 = vpop.f32.mrb[48].mxu0 }
 0x5d7   : > { %v5510_v8 = vpack.c.bf16 %v2705_v11, %v2704_v50  ;;  %v2581_v23 = vpop.f32.mrb[49].mxu0  ;;  %v2580_v9 = vadd.f32 %v2579_v31, %v8457_v1  ;;  %v8463_v50 = vld [vmem:[#allocation75_spill] sm:$0xff] }
 0x5d9   : > { %5511 = vmatpush1.bf16.msra.mxu1 %v5510_v8  ;;  %v2706_v38 = vmax.f32 %v2580_v9, 0.0  ;;  %v8464_v8 = vld [vmem:[#allocation29_spill] sm:$0xff] }
 0x5da   : > { %v2584_v32 = vpop.f32.mrb[50].mxu0  ;;  %5512 = vmatprep.subr.bf16.mxu1 %v8359_v28 }
 0x5db   : > { %v2585_v0 = vadd.f32 %v2584_v32, %v8458_v52  ;;  %v2586_v63 = vpop.f32.mrb[51].mxu0 }
 0x5dd   : > { %v2707_v58 = vmax.f32 %v2585_v0, 0.0 }
 0x5de   : > { %v2589_v24 = vpop.f32.mrb[52].mxu0 }
 0x5df   : > { %v5513_v26 = vpack.c.bf16 %v2707_v58, %v2706_v38  ;;  %v2591_v14 = vpop.f32.mrb[53].mxu0  ;;  %v2590_v5 = vadd.f32 %v2589_v24, %v8459_v25  ;;  %v8465_v38 = vld [vmem:[#allocation77_spill] sm:$0xff] }
 0x5e1   : > { %5514 = vmatpush1.bf16.msra.mxu1 %v5513_v26  ;;  %v2708_v33 = vmax.f32 %v2590_v5, 0.0  ;;  %v8466_v26 = vld [vmem:[#allocation30_spill] sm:$0xff] }
 0x5e2   : > { %v2594_v49 = vpop.f32.mrb[54].mxu0  ;;  %5515 = vmatprep.subr.bf16.mxu1 %v8359_v28 }
 0x5e3   : > { %v2595_v13 = vadd.f32 %v2594_v49, %v8460_v15  ;;  %v2596_v59 = vpop.f32.mrb[55].mxu0 }
 0x5e5   : > { %v2709_v17 = vmax.f32 %v2595_v13, 0.0 }
 0x5e6   : > { %v2599_v53 = vpop.f32.mrb[56].mxu0 }
 0x5e7   : > { %v5516_v4 = vpack.c.bf16 %v2709_v17, %v2708_v33  ;;  %v2601_v7 = vpop.f32.mrb[57].mxu0  ;;  %v2600_v44 = vadd.f32 %v2599_v53, %v8461_v16  ;;  %v8467_v33 = vld [vmem:[#allocation78_spill] sm:$0xff] }
 0x5e9   : > { %5517 = vmatpush1.bf16.msra.mxu1 %v5516_v4  ;;  %v2710_v42 = vmax.f32 %v2600_v44, 0.0  ;;  %v8468_v4 = vld [vmem:[#allocation31_spill] sm:$0xff] }
 0x5ea   : > { %v2604_v40 = vpop.f32.mrb[58].mxu0  ;;  %5518 = vmatprep.subr.bf16.mxu1 %v8359_v28 }
 0x5eb   : > { %v2605_v34 = vadd.f32 %v2604_v40, %v8462_v27  ;;  %v2606_v48 = vpop.f32.mrb[59].mxu0 }
 0x5ed   : > { %v2711_v20 = vmax.f32 %v2605_v34, 0.0 }
 0x5ee   : > { %v2609_v21 = vpop.f32.mrb[60].mxu0 }
 0x5ef   : > { %v5519_v6 = vpack.c.bf16 %v2711_v20, %v2710_v42  ;;  %v2611_v46 = vpop.f32.mrb[61].mxu0  ;;  %v2610_v11 = vadd.f32 %v2609_v21, %v8463_v50  ;;  %v8469_v42 = vld [vmem:[#allocation80_spill] sm:$0xff] }
 0x5f1   : > { %5520 = vmatpush1.bf16.msra.mxu1 %v5519_v6  ;;  %v2712_v9 = vmax.f32 %v2610_v11, 0.0  ;;  %v8470_v6 = vld [vmem:[#allocation32_spill] sm:$0xff] }
 0x5f2   : > { %v2614_v31 = vpop.f32.mrb[62].mxu0  ;;  %5521 = vmatprep.subr.bf16.mxu1 %v8359_v28 }
 0x5f3   : > { %v2615_v23 = vadd.f32 %v2614_v31, %v8464_v8  ;;  %v2616_v1 = vpop.f32.mrb[63].mxu0 }
 0x5f5   : > { %v2713_v32 = vmax.f32 %v2615_v23, 0.0 }
 0x5f6   : > { %v2619_v52 = vpop.f32.mrb[64].mxu0 }
 0x5f7   : > { %v5522_v0 = vpack.c.bf16 %v2713_v32, %v2712_v9  ;;  %v2621_v63 = vpop.f32.mrb[65].mxu0  ;;  %v2620_v58 = vadd.f32 %v2619_v52, %v8465_v38  ;;  %v8471_v9 = vld [vmem:[#allocation82_spill] sm:$0xff] }
 0x5f9   : > { %5523 = vmatpush1.bf16.msra.mxu1 %v5522_v0  ;;  %v2714_v5 = vmax.f32 %v2620_v58, 0.0  ;;  %v8472_v0 = vld [vmem:[#allocation33_spill] sm:$0xff] }
 0x5fa   : > { %v2624_v24 = vpop.f32.mrb[66].mxu0  ;;  %5524 = vmatprep.subr.bf16.mxu1 %v8359_v28 }
 0x5fb   : > { %v2625_v14 = vadd.f32 %v2624_v24, %v8466_v26  ;;  %v2626_v25 = vpop.f32.mrb[67].mxu0 }
 0x5fd   : > { %v2715_v49 = vmax.f32 %v2625_v14, 0.0 }
 0x5fe   : > { %v2629_v15 = vpop.f32.mrb[68].mxu0 }
 0x5ff   : > { %v5525_v13 = vpack.c.bf16 %v2715_v49, %v2714_v5  ;;  %v2631_v59 = vpop.f32.mrb[69].mxu0  ;;  %v2630_v17 = vadd.f32 %v2629_v15, %v8467_v33  ;;  %v8473_v5 = vld [vmem:[#allocation83_spill] sm:$0xff] }
 0x601   : > { %5526 = vmatpush1.bf16.msra.mxu1 %v5525_v13  ;;  %v2716_v44 = vmax.f32 %v2630_v17, 0.0  ;;  %v8474_v13 = vld [vmem:[#allocation34_spill] sm:$0xff] }
 0x602   : > { %v2634_v53 = vpop.f32.mrb[70].mxu0  ;;  %5527 = vmatprep.subr.bf16.mxu1 %v8359_v28 }
 0x603   : > { %v2635_v7 = vadd.f32 %v2634_v53, %v8468_v4  ;;  %v2636_v16 = vpop.f32.mrb[71].mxu0 }
 0x605   : > { %v2717_v40 = vmax.f32 %v2635_v7, 0.0 }
 0x606   : > { %v2639_v27 = vpop.f32.mrb[72].mxu0 }
 0x607   : > { %v5528_v34 = vpack.c.bf16 %v2717_v40, %v2716_v44  ;;  %v2641_v48 = vpop.f32.mrb[73].mxu0  ;;  %v2640_v20 = vadd.f32 %v2639_v27, %v8469_v42  ;;  %v8475_v44 = vld [vmem:[#allocation85_spill] sm:$0xff] }
 0x609   : > { %5529 = vmatpush1.bf16.msra.mxu1 %v5528_v34  ;;  %v2718_v11 = vmax.f32 %v2640_v20, 0.0  ;;  %v8476_v34 = vld [vmem:[#allocation35_spill] sm:$0xff] }
 0x60a   : > { %v2644_v21 = vpop.f32.mrb[74].mxu0  ;;  %5530 = vmatprep.subr.bf16.mxu1 %v8359_v28 }
 0x60b   : > { %v2645_v46 = vadd.f32 %v2644_v21, %v8470_v6  ;;  %v2646_v50 = vpop.f32.mrb[75].mxu0 }
 0x60d   : > { %v2719_v31 = vmax.f32 %v2645_v46, 0.0 }
 0x60e   : > { %v2649_v8 = vpop.f32.mrb[76].mxu0 }
 0x60f   : > { %v5531_v23 = vpack.c.bf16 %v2719_v31, %v2718_v11  ;;  %v2651_v1 = vpop.f32.mrb[77].mxu0  ;;  %v2650_v32 = vadd.f32 %v2649_v8, %v8471_v9  ;;  %v8477_v11 = vld [vmem:[#allocation87_spill] sm:$0xff] }
 0x611   : > { %5532 = vmatpush1.bf16.msra.mxu1 %v5531_v23  ;;  %v2720_v58 = vmax.f32 %v2650_v32, 0.0  ;;  %v8478_v23 = vld [vmem:[#allocation36_spill] sm:$0xff] }
 0x612   : > { %v2654_v52 = vpop.f32.mrb[78].mxu0  ;;  %5533 = vmatprep.subr.bf16.mxu1 %v8359_v28 }
 0x613   : > { %v2655_v63 = vadd.f32 %v2654_v52, %v8472_v0  ;;  %v2656_v38 = vpop.f32.mrb[79].mxu0 }
 0x615   : > { %v2721_v24 = vmax.f32 %v2655_v63, 0.0 }
 0x616   : > { %v2659_v26 = vpop.f32.mrb[80].mxu0 }
 0x617   : > { %v5534_v14 = vpack.c.bf16 %v2721_v24, %v2720_v58  ;;  %v2661_v25 = vpop.f32.mrb[81].mxu0  ;;  %v2660_v49 = vadd.f32 %v2659_v26, %v8473_v5  ;;  %v8479_v58 = vld [vmem:[#allocation88_spill] sm:$0xff] }
 0x619   : > { %5535 = vmatpush1.bf16.msra.mxu1 %v5534_v14  ;;  %v2722_v17 = vmax.f32 %v2660_v49, 0.0  ;;  %v8480_v14 = vld [vmem:[#allocation37_spill] sm:$0xff] }
 0x61a   : > { %v2664_v15 = vpop.f32.mrb[82].mxu0  ;;  %5536 = vmatprep.subr.bf16.mxu1 %v8359_v28 }
 0x61b   : > { %v2665_v59 = vadd.f32 %v2664_v15, %v8474_v13  ;;  %v2666_v33 = vpop.f32.mrb[83].mxu0 }
 0x61c   : > { %v2734_v33 = vld [vmem:[#allocation6 + $0x618] sm:$0xff] }
 0x61d   : > { %v2723_v53 = vmax.f32 %v2665_v59, 0.0  ;;  %v2731_v59 = vld [vmem:[#allocation6 + $0x600] sm:$0xff] }
 0x61e   : > { %v2669_v4 = vpop.f32.mrb[84].mxu0 }
 0x61f   : > { %v5537_v7 = vpack.c.bf16 %v2723_v53, %v2722_v17  ;;  %v2671_v16 = vpop.f32.mrb[85].mxu0  ;;  %v2670_v40 = vadd.f32 %v2669_v4, %v8475_v44  ;;  %v2733_v17 = vld [vmem:[#allocation6 + $0x610] sm:$0xff]  ;;  %v2736_v53 = vld [vmem:[#allocation6 + $0x628] sm:$0xff]  ;;  %v2735_v4 = vld [vmem:[#allocation6 + $0x620] sm:$0xff] }
 0x620   : > { %v2737_v16 = vld [vmem:[#allocation6 + $0x630] sm:$0xff]  ;;  %v2740_v44 = vld [vmem:[#allocation6 + $0x648] sm:$0xff] }
 0x621   : > { %5538 = vmatpush1.bf16.msra.mxu1 %v5537_v7  ;;  %v2724_v20 = vmax.f32 %v2670_v40, 0.0  ;;  %v2738_v7 = vld [vmem:[#allocation6 + $0x638] sm:$0xff]  ;;  %v2739_v40 = vld [vmem:[#allocation6 + $0x640] sm:$0xff] }
 0x622   : > { %v2674_v27 = vpop.f32.mrb[86].mxu0  ;;  %5539 = vmatprep.subr.bf16.mxu1 %v8359_v28 }
 0x623   : > { %v2675_v48 = vadd.f32 %v2674_v27, %v8476_v34  ;;  %v2676_v42 = vpop.f32.mrb[87].mxu0  ;;  %v2742_v27 = vld [vmem:[#allocation6 + $0x658] sm:$0xff]  ;;  %v2741_v34 = vld [vmem:[#allocation6 + $0x650] sm:$0xff] }
 0x624   : > { %v2743_v42 = vld [vmem:[#allocation6 + $0x660] sm:$0xff] }
 0x625   : > { %v2725_v21 = vmax.f32 %v2675_v48, 0.0  ;;  %v2744_v48 = vld [vmem:[#allocation6 + $0x668] sm:$0xff] }
 0x626   : > { %v2679_v6 = vpop.f32.mrb[88].mxu0 }
 0x627   : > { %v5540_v46 = vpack.c.bf16 %v2725_v21, %v2724_v20  ;;  %v2681_v50 = vpop.f32.mrb[89].mxu0  ;;  %v2680_v31 = vadd.f32 %v2679_v6, %v8477_v11  ;;  %v2746_v20 = vld [vmem:[#allocation6 + $0x678] sm:$0xff]  ;;  %v2745_v21 = vld [vmem:[#allocation6 + $0x670] sm:$0xff]  ;;  %v2748_v6 = vld [vmem:[#allocation6 + $0x688] sm:$0xff] }
 0x628   : > { %v2750_v50 = vld [vmem:[#allocation6 + $0x698] sm:$0xff]  ;;  %v2749_v11 = vld [vmem:[#allocation6 + $0x690] sm:$0xff] }
 0x629   : > { %5541 = vmatpush1.bf16.msra.mxu1 %v5540_v46  ;;  %v2726_v32 = vmax.f32 %v2680_v31, 0.0  ;;  %v2747_v46 = vld [vmem:[#allocation6 + $0x680] sm:$0xff]  ;;  %v2752_v31 = vld [vmem:[#allocation6 + $0x6a8] sm:$0xff] }
 0x62a   : > { %v2684_v8 = vpop.f32.mrb[90].mxu0  ;;  %5542 = vmatprep.subr.bf16.mxu1 %v8359_v28 }
 0x62b   : > { %v2685_v1 = vadd.f32 %v2684_v8, %v8478_v23  ;;  %v2686_v9 = vpop.f32.mrb[91].mxu0  ;;  %v2751_v8 = vld [vmem:[#allocation6 + $0x6a0] sm:$0xff]  ;;  %v2754_v23 = vld [vmem:[#allocation6 + $0x6b8] sm:$0xff] }
 0x62c   : > { %v2756_v9 = vld [vmem:[#allocation6 + $0x6c8] sm:$0xff] }
 0x62d   : > { %v2727_v52 = vmax.f32 %v2685_v1, 0.0  ;;  %v2753_v1 = vld [vmem:[#allocation6 + $0x6b0] sm:$0xff] }
 0x62e   : > { %v2689_v0 = vpop.f32.mrb[92].mxu0 }
 0x62f   : > { %v5543_v63 = vpack.c.bf16 %v2727_v52, %v2726_v32  ;;  %v2691_v38 = vpop.f32.mrb[93].mxu0  ;;  %v2690_v24 = vadd.f32 %v2689_v0, %v8479_v58  ;;  %v2755_v32 = vld [vmem:[#allocation6 + $0x6c0] sm:$0xff]  ;;  %v2758_v52 = vld [vmem:[#allocation6 + $0x6d8] sm:$0xff]  ;;  %v2757_v0 = vld [vmem:[#allocation6 + $0x6d0] sm:$0xff] }
 0x630   : > { %v2759_v38 = vld [vmem:[#allocation6 + $0x6e0] sm:$0xff]  ;;  %v2762_v58 = vld [vmem:[#allocation6 + $0x6f8] sm:$0xff] }
 0x631   : > { %5544 = vmatpush1.bf16.msra.mxu1 %v5543_v63  ;;  %v2728_v49 = vmax.f32 %v2690_v24, 0.0  ;;  %v2760_v63 = vld [vmem:[#allocation6 + $0x6e8] sm:$0xff]  ;;  %v2761_v24 = vld [vmem:[#allocation6 + $0x6f0] sm:$0xff] }
 0x632   : > { %v2694_v26 = vpop.f32.mrb[94].mxu0  ;;  %5545 = vmatprep.subr.bf16.mxu1 %v8359_v28 }
 0x633   : > { %v2695_v25 = vadd.f32 %v2694_v26, %v8480_v14  ;;  %v2696_v5 = vpop.f32.mrb[95].mxu0  ;;  %v2764_v26 = vld [vmem:[#allocation6 + $0x708] sm:$0xff]  ;;  %v2763_v14 = vld [vmem:[#allocation6 + $0x700] sm:$0xff] }
 0x634   : > { %v2765_v5 = vld [vmem:[#allocation6 + $0x710] sm:$0xff] }
 0x635   : > { %v2729_v15 = vmax.f32 %v2695_v25, 0.0  ;;  %v2766_v25 = vld [vmem:[#allocation6 + $0x718] sm:$0xff] }
 0x637   : > { %v5546_v13 = vpack.c.bf16 %v2729_v15, %v2728_v49  ;;  %v2768_v49 = vld [vmem:[#allocation6 + $0x728] sm:$0xff]  ;;  %v2767_v15 = vld [vmem:[#allocation6 + $0x720] sm:$0xff] }
 0x639   : > { %5547 = vmatpush1.bf16.msra.mxu1 %v5546_v13  ;;  %v2770_v13 = vld [vmem:[#allocation6 + $0x738] sm:$0xff] }
 0x63a   : > { %5596 = vmatprep.subr.bf16.mxu1 %v8359_v28 }
 0x63c   : > { %3053 = vmatmul.mubr.f32.vlgmr.msra.gmra.mrb[96].mxu1 %v2731_v59  ;;  %v2769_v59 = vld [vmem:[#allocation6 + $0x730] sm:$0xff] }
 0x63d   : > { %3057 = vmatprep.mubr.f32.mxu1 %v2734_v33  ;;  %v2772_v33 = vld [vmem:[#allocation6 + $0x748] sm:$0xff] }
 0x640   : > { %3058 = vmatmul.mubr.f32.gmra.mrb[98].mxu1 %v2733_v17  ;;  %v2771_v17 = vld [vmem:[#allocation6 + $0x740] sm:$0xff] }
 0x641   : > { %3062 = vmatprep.mubr.f32.mxu1 %v2736_v53  ;;  %v2774_v53 = vld [vmem:[#allocation6 + $0x758] sm:$0xff] }
 0x644   : > { %3063 = vmatmul.mubr.f32.gmra.mrb[100].mxu1 %v2735_v4  ;;  %v2773_v4 = vld [vmem:[#allocation6 + $0x750] sm:$0xff] }
 0x645   : > { %3067 = vmatprep.mubr.f32.mxu1 %v2738_v7  ;;  %v2776_v7 = vld [vmem:[#allocation6 + $0x768] sm:$0xff] }
 0x648   : > { %3068 = vmatmul.mubr.f32.gmra.mrb[102].mxu1 %v2737_v16  ;;  %v2775_v16 = vld [vmem:[#allocation6 + $0x760] sm:$0xff] }
 0x649   : > { %3072 = vmatprep.mubr.f32.mxu1 %v2740_v44  ;;  %v2778_v44 = vld [vmem:[#allocation6 + $0x778] sm:$0xff] }
 0x64c   : > { %3073 = vmatmul.mubr.f32.gmra.mrb[104].mxu1 %v2739_v40  ;;  %v2777_v40 = vld [vmem:[#allocation6 + $0x770] sm:$0xff] }
 0x64d   : > { %3077 = vmatprep.mubr.f32.mxu1 %v2742_v27  ;;  %v2780_v27 = vld [vmem:[#allocation6 + $0x788] sm:$0xff] }
 0x650   : > { %3078 = vmatmul.mubr.f32.gmra.mrb[106].mxu1 %v2741_v34  ;;  %v2779_v34 = vld [vmem:[#allocation6 + $0x780] sm:$0xff] }
 0x651   : > { %3082 = vmatprep.mubr.f32.mxu1 %v2744_v48  ;;  %v2782_v48 = vld [vmem:[#allocation6 + $0x798] sm:$0xff] }
 0x654   : > { %3083 = vmatmul.mubr.f32.gmra.mrb[108].mxu1 %v2743_v42  ;;  %v2781_v42 = vld [vmem:[#allocation6 + $0x790] sm:$0xff] }
 0x655   : > { %3087 = vmatprep.mubr.f32.mxu1 %v2746_v20  ;;  %v2784_v20 = vld [vmem:[#allocation6 + $0x7a8] sm:$0xff] }
 0x658   : > { %3088 = vmatmul.mubr.f32.gmra.mrb[110].mxu1 %v2745_v21  ;;  %v2783_v21 = vld [vmem:[#allocation6 + $0x7a0] sm:$0xff] }
 0x659   : > { %3092 = vmatprep.mubr.f32.mxu1 %v2748_v6  ;;  %v2786_v6 = vld [vmem:[#allocation6 + $0x7b8] sm:$0xff] }
 0x65c   : > { %3093 = vmatmul.mubr.f32.gmra.mrb[112].mxu1 %v2747_v46  ;;  %v2785_v46 = vld [vmem:[#allocation6 + $0x7b0] sm:$0xff] }
 0x65d   : > { %3097 = vmatprep.mubr.f32.mxu1 %v2750_v50  ;;  %v2788_v50 = vld [vmem:[#allocation6 + $0x7c8] sm:$0xff] }
 0x660   : > { %3098 = vmatmul.mubr.f32.gmra.mrb[114].mxu1 %v2749_v11  ;;  %v2787_v11 = vld [vmem:[#allocation6 + $0x7c0] sm:$0xff] }
 0x661   : > { %3102 = vmatprep.mubr.f32.mxu1 %v2752_v31  ;;  %v2790_v31 = vld [vmem:[#allocation6 + $0x7d8] sm:$0xff] }
 0x664   : > { %3103 = vmatmul.mubr.f32.gmra.mrb[116].mxu1 %v2751_v8  ;;  %v2789_v8 = vld [vmem:[#allocation6 + $0x7d0] sm:$0xff] }
 0x665   : > { %3107 = vmatprep.mubr.f32.mxu1 %v2754_v23  ;;  %v2792_v23 = vld [vmem:[#allocation6 + $0x7e8] sm:$0xff] }
 0x668   : > { %3108 = vmatmul.mubr.f32.gmra.mrb[118].mxu1 %v2753_v1  ;;  %v2791_v1 = vld [vmem:[#allocation6 + $0x7e0] sm:$0xff] }
 0x669   : > { %3112 = vmatprep.mubr.f32.mxu1 %v2756_v9  ;;  %v2794_v9 = vld [vmem:[#allocation6 + $0x7f8] sm:$0xff] }
 0x66c   : > { %3113 = vmatmul.mubr.f32.gmra.mrb[120].mxu1 %v2755_v32  ;;  %v2793_v32 = vld [vmem:[#allocation6 + $0x7f0] sm:$0xff] }
 0x66d   : > { %3117 = vmatprep.mubr.f32.mxu1 %v2758_v52 }
 0x670   : > { %3118 = vmatmul.mubr.f32.gmra.mrb[122].mxu1 %v2757_v0 }
 0x671   : > { %3122 = vmatprep.mubr.f32.mxu1 %v2760_v63  ;;  %v8481_v63 = vld [vmem:[#allocation90_spill] sm:$0xff] }
 0x674   : > { %3123 = vmatmul.mubr.f32.gmra.mrb[124].mxu1 %v2759_v38 }
 0x675   : > { %3127 = vmatprep.mubr.f32.mxu1 %v2762_v58  ;;  %v3247_v58 = vld [vmem:[#allocation6 + $0x808] sm:$0xff] }
 0x676   : > { %3567 = vmatprep.mubr.f32.mxu0 %v3247_v58 }
 0x678   : > { %3128 = vmatmul.mubr.f32.gmra.mrb[126].mxu1 %v2761_v24 }
 0x679   : > { %3132 = vmatprep.mubr.f32.mxu1 %v2764_v26  ;;  %v8482_v26 = vld [vmem:[#allocation38_spill] sm:$0xff] }
 0x67c   : > { %3133 = vmatmul.mubr.f32.gmra.mrb[128].mxu1 %v2763_v14 }
 0x67d   : > { %3137 = vmatprep.mubr.f32.mxu1 %v2766_v25 }
 0x680   : > { %3138 = vmatmul.mubr.f32.gmra.mrb[130].mxu1 %v2765_v5 }
 0x681   : > { %3142 = vmatprep.mubr.f32.mxu1 %v2768_v49 }
 0x684   : > { %3143 = vmatmul.mubr.f32.gmra.mrb[132].mxu1 %v2767_v15 }
 0x685   : > { %3147 = vmatprep.mubr.f32.mxu1 %v2770_v13 }
 0x688   : > { %3148 = vmatmul.mubr.f32.gmra.mrb[134].mxu1 %v2769_v59 }
 0x689   : > { %3152 = vmatprep.mubr.f32.mxu1 %v2772_v33  ;;  %v8483_v33 = vld [vmem:[#allocation92_spill] sm:$0xff] }
 0x68c   : > { %3153 = vmatmul.mubr.f32.gmra.mrb[136].mxu1 %v2771_v17 }
 0x68d   : > { %3157 = vmatprep.mubr.f32.mxu1 %v2774_v53 }
 0x690   : > { %3158 = vmatmul.mubr.f32.gmra.mrb[138].mxu1 %v2773_v4  ;;  %v8484_v4 = vld [vmem:[#allocation39_spill] sm:$0xff] }
 0x691   : > { %3162 = vmatprep.mubr.f32.mxu1 %v2776_v7 }
 0x694   : > { %3163 = vmatmul.mubr.f32.gmra.mrb[140].mxu1 %v2775_v16 }
 0x695   : > { %3167 = vmatprep.mubr.f32.mxu1 %v2778_v44 }
 0x698   : > { %3168 = vmatmul.mubr.f32.gmra.mrb[142].mxu1 %v2777_v40 }
 0x699   : > { %3172 = vmatprep.mubr.f32.mxu1 %v2780_v27 }
 0x69c   : > { %3173 = vmatmul.mubr.f32.gmra.mrb[144].mxu1 %v2779_v34 }
 0x69d   : > { %3177 = vmatprep.mubr.f32.mxu1 %v2782_v48 }
 0x6a0   : > { %3178 = vmatmul.mubr.f32.gmra.mrb[146].mxu1 %v2781_v42  ;;  %v8485_v42 = vld [vmem:[#allocation93_spill] sm:$0xff] }
 0x6a1   : > { %3182 = vmatprep.mubr.f32.mxu1 %v2784_v20 }
 0x6a4   : > { %3183 = vmatmul.mubr.f32.gmra.mrb[148].mxu1 %v2783_v21 }
 0x6a5   : > { %3187 = vmatprep.mubr.f32.mxu1 %v2786_v6  ;;  %v8486_v6 = vld [vmem:[#allocation40_spill] sm:$0xff] }
 0x6a8   : > { %3188 = vmatmul.mubr.f32.gmra.mrb[150].mxu1 %v2785_v46 }
 0x6a9   : > { %3192 = vmatprep.mubr.f32.mxu1 %v2788_v50 }
 0x6ac   : > { %3193 = vmatmul.mubr.f32.gmra.mrb[152].mxu1 %v2787_v11 }
 0x6ad   : > { %3197 = vmatprep.mubr.f32.mxu1 %v2790_v31 }
 0x6b0   : > { %3198 = vmatmul.mubr.f32.gmra.mrb[154].mxu1 %v2789_v8 }
 0x6b1   : > { %3202 = vmatprep.mubr.f32.mxu1 %v2792_v23 }
 0x6b4   : > { %3203 = vmatmul.mubr.f32.gmra.mrb[156].mxu1 %v2791_v1 }
 0x6b5   : > { %3207 = vmatprep.mubr.f32.mxu1 %v2794_v9  ;;  %v8487_v9 = vld [vmem:[#allocation95_spill] sm:$0xff] }
 0x6b8   : > { %3208 = vmatmul.mubr.f32.gmra.mrb[158].mxu1 %v2793_v32 }
 0x70f   : > { %v3054_v52 = vpop.f32.mrb[96].mxu1 }
 0x710   : > { %v3056_v0 = vpop.f32.mrb[97].mxu1  ;;  %v3055_v38 = vadd.f32 %v3054_v52, %v8481_v63 }
 0x711   : > { %v8488_v0 = vld [vmem:[#allocation41_spill] sm:$0xff] }
 0x712   : > { %v3213_v5 = vmax.f32 %v3055_v38, 0.0 }
 0x713   : > { %v3059_v24 = vpop.f32.mrb[98].mxu1 }
 0x714   : > { %v3060_v14 = vadd.f32 %v3059_v24, %v8482_v26  ;;  %v3061_v25 = vpop.f32.mrb[99].mxu1 }
 0x716   : > { %v3214_v49 = vmax.f32 %v3060_v14, 0.0 }
 0x717   : > { %v3064_v15 = vpop.f32.mrb[100].mxu1 }
 0x718   : > { %v5549_v13 = vpack.c.bf16 %v3214_v49, %v3213_v5  ;;  %v3066_v59 = vpop.f32.mrb[101].mxu1  ;;  %v3065_v17 = vadd.f32 %v3064_v15, %v8483_v33  ;;  %v8489_v5 = vld [vmem:[#allocation97_spill] sm:$0xff] }
 0x71a   : > { %5550 = vmatpush1.bf16.msra.mxu0 %v5549_v13  ;;  %v3215_v44 = vmax.f32 %v3065_v17, 0.0  ;;  %v8490_v13 = vld [vmem:[#allocation42_spill] sm:$0xff] }
 0x71b   : > { %v3069_v53 = vpop.f32.mrb[102].mxu1  ;;  %5551 = vmatprep.subr.bf16.mxu0 %v8359_v28 }
 0x71c   : > { %v3070_v7 = vadd.f32 %v3069_v53, %v8484_v4  ;;  %v3071_v16 = vpop.f32.mrb[103].mxu1 }
 0x71e   : > { %v3216_v40 = vmax.f32 %v3070_v7, 0.0 }
 0x71f   : > { %v3074_v27 = vpop.f32.mrb[104].mxu1 }
 0x720   : > { %v5552_v34 = vpack.c.bf16 %v3216_v40, %v3215_v44  ;;  %v3076_v48 = vpop.f32.mrb[105].mxu1  ;;  %v3075_v20 = vadd.f32 %v3074_v27, %v8485_v42  ;;  %v8491_v44 = vld [vmem:[#allocation98_spill] sm:$0xff] }
 0x722   : > { %5553 = vmatpush1.bf16.msra.mxu0 %v5552_v34  ;;  %v3217_v11 = vmax.f32 %v3075_v20, 0.0  ;;  %v8492_v34 = vld [vmem:[#allocation43_spill] sm:$0xff] }
 0x723   : > { %v3079_v21 = vpop.f32.mrb[106].mxu1  ;;  %5554 = vmatprep.subr.bf16.mxu0 %v8359_v28 }
 0x724   : > { %v3080_v46 = vadd.f32 %v3079_v21, %v8486_v6  ;;  %v3081_v50 = vpop.f32.mrb[107].mxu1 }
 0x726   : > { %v3218_v31 = vmax.f32 %v3080_v46, 0.0 }
 0x727   : > { %v3084_v8 = vpop.f32.mrb[108].mxu1 }
 0x728   : > { %v5555_v23 = vpack.c.bf16 %v3218_v31, %v3217_v11  ;;  %v3086_v1 = vpop.f32.mrb[109].mxu1  ;;  %v3085_v32 = vadd.f32 %v3084_v8, %v8487_v9  ;;  %v8493_v11 = vld [vmem:[#allocation99_spill] sm:$0xff] }
 0x72a   : > { %5556 = vmatpush1.bf16.msra.mxu0 %v5555_v23  ;;  %v3219_v58 = vmax.f32 %v3085_v32, 0.0  ;;  %v8494_v23 = vld [vmem:[#allocation44_spill] sm:$0xff] }
 0x72b   : > { %v3089_v52 = vpop.f32.mrb[110].mxu1  ;;  %5557 = vmatprep.subr.bf16.mxu0 %v8359_v28 }
 0x72c   : > { %v3090_v63 = vadd.f32 %v3089_v52, %v8488_v0  ;;  %v3091_v38 = vpop.f32.mrb[111].mxu1 }
 0x72e   : > { %v3220_v24 = vmax.f32 %v3090_v63, 0.0 }
 0x72f   : > { %v3094_v26 = vpop.f32.mrb[112].mxu1 }
 0x730   : > { %v5558_v14 = vpack.c.bf16 %v3220_v24, %v3219_v58  ;;  %v3096_v25 = vpop.f32.mrb[113].mxu1  ;;  %v3095_v49 = vadd.f32 %v3094_v26, %v8489_v5  ;;  %v8495_v26 = vld [vmem:[#allocation45_spill] sm:$0xff] }
 0x732   : > { %5559 = vmatpush1.bf16.msra.mxu0 %v5558_v14  ;;  %v3221_v17 = vmax.f32 %v3095_v49, 0.0 }
 0x733   : > { %v3099_v15 = vpop.f32.mrb[114].mxu1  ;;  %5560 = vmatprep.subr.bf16.mxu0 %v8359_v28 }
 0x734   : > { %v3100_v59 = vadd.f32 %v3099_v15, %v8490_v13  ;;  %v3101_v33 = vpop.f32.mrb[115].mxu1 }
 0x736   : > { %v3222_v53 = vmax.f32 %v3100_v59, 0.0 }
 0x737   : > { %v3104_v4 = vpop.f32.mrb[116].mxu1 }
 0x738   : > { %v5561_v7 = vpack.c.bf16 %v3222_v53, %v3221_v17  ;;  %v3106_v16 = vpop.f32.mrb[117].mxu1  ;;  %v3105_v40 = vadd.f32 %v3104_v4, %v8491_v44  ;;  %v8496_v53 = vld [vmem:[#allocation46_spill] sm:$0xff] }
 0x73a   : > { %5562 = vmatpush1.bf16.msra.mxu0 %v5561_v7  ;;  %v3223_v20 = vmax.f32 %v3105_v40, 0.0 }
 0x73b   : > { %v3109_v27 = vpop.f32.mrb[118].mxu1  ;;  %5563 = vmatprep.subr.bf16.mxu0 %v8359_v28 }
 0x73c   : > { %v3110_v48 = vadd.f32 %v3109_v27, %v8492_v34  ;;  %v3111_v42 = vpop.f32.mrb[119].mxu1 }
 0x73d   : > { %v8497_v42 = vld [vmem:[#allocation47_spill] sm:$0xff] }
 0x73e   : > { %v3224_v21 = vmax.f32 %v3110_v48, 0.0 }
 0x73f   : > { %v3114_v6 = vpop.f32.mrb[120].mxu1 }
 0x740   : > { %v5564_v46 = vpack.c.bf16 %v3224_v21, %v3223_v20  ;;  %v3116_v50 = vpop.f32.mrb[121].mxu1  ;;  %v3115_v31 = vadd.f32 %v3114_v6, %v8493_v11 }
 0x742   : > { %5565 = vmatpush1.bf16.msra.mxu0 %v5564_v46  ;;  %v3225_v32 = vmax.f32 %v3115_v31, 0.0 }
 0x743   : > { %v3119_v8 = vpop.f32.mrb[122].mxu1  ;;  %5566 = vmatprep.subr.bf16.mxu0 %v8359_v28 }
 0x744   : > { %v3120_v1 = vadd.f32 %v3119_v8, %v8494_v23  ;;  %v3121_v9 = vpop.f32.mrb[123].mxu1  ;;  %v8498_v23 = vld [vmem:[#allocation48_spill] sm:$0xff] }
 0x746   : > { %v3226_v52 = vmax.f32 %v3120_v1, 0.0 }
 0x747   : > { %v3124_v0 = vpop.f32.mrb[124].mxu1 }
 0x748   : > { %v5567_v63 = vpack.c.bf16 %v3226_v52, %v3225_v32  ;;  %v3126_v38 = vpop.f32.mrb[125].mxu1  ;;  %v3125_v58 = vadd.f32 %v3124_v0, %v7768_v45 }
 0x74a   : > { %5568 = vmatpush1.bf16.msra.mxu0 %v5567_v63  ;;  %v3227_v5 = vmax.f32 %v3125_v58, 0.0 }
 0x74b   : > { %v3129_v24 = vpop.f32.mrb[126].mxu1  ;;  %5569 = vmatprep.subr.bf16.mxu0 %v8359_v28 }
 0x74c   : > { %v3130_v14 = vadd.f32 %v3129_v24, %v8495_v26  ;;  %v3131_v25 = vpop.f32.mrb[127].mxu1  ;;  %v8499_v24 = vld [vmem:[#allocation49_spill] sm:$0xff] }
 0x74e   : > { %v3228_v49 = vmax.f32 %v3130_v14, 0.0 }
 0x74f   : > { %v3134_v15 = vpop.f32.mrb[128].mxu1 }
 0x750   : > { %v5570_v13 = vpack.c.bf16 %v3228_v49, %v3227_v5  ;;  %v3136_v59 = vpop.f32.mrb[129].mxu1  ;;  %v3135_v33 = vadd.f32 %v3134_v15, %v7783_v54 }
 0x752   : > { %5571 = vmatpush1.bf16.msra.mxu0 %v5570_v13  ;;  %v3229_v7 = vmax.f32 %v3135_v33, 0.0  ;;  %v8500_v33 = vld [vmem:[#allocation51_spill] sm:$0xff] }
 0x753   : > { %v3139_v17 = vpop.f32.mrb[130].mxu1  ;;  %5572 = vmatprep.subr.bf16.mxu0 %v8359_v28 }
 0x754   : > { %v3140_v45 = vadd.f32 %v3139_v17, %v8496_v53  ;;  %v3141_v4 = vpop.f32.mrb[131].mxu1 }
 0x756   : > { %v3230_v16 = vmax.f32 %v3140_v45, 0.0 }
 0x757   : > { %v3144_v44 = vpop.f32.mrb[132].mxu1 }
 0x758   : > { %v5573_v40 = vpack.c.bf16 %v3230_v16, %v3229_v7  ;;  %v3146_v27 = vpop.f32.mrb[133].mxu1  ;;  %v3145_v34 = vadd.f32 %v3144_v44, %v7798_v19 }
 0x759   : > { %v8501_v27 = vld [vmem:[#allocation54_spill] sm:$0xff] }
 0x75a   : > { %5574 = vmatpush1.bf16.msra.mxu0 %v5573_v40  ;;  %v3231_v21 = vmax.f32 %v3145_v34, 0.0 }
 0x75b   : > { %v3149_v48 = vpop.f32.mrb[134].mxu1  ;;  %5575 = vmatprep.subr.bf16.mxu0 %v8359_v28 }
 0x75c   : > { %v3150_v54 = vadd.f32 %v3149_v48, %v8497_v42  ;;  %v3151_v20 = vpop.f32.mrb[135].mxu1 }
 0x75e   : > { %v3232_v6 = vmax.f32 %v3150_v54, 0.0 }
 0x75f   : > { %v3154_v46 = vpop.f32.mrb[136].mxu1 }
 0x760   : > { %v5576_v50 = vpack.c.bf16 %v3232_v6, %v3231_v21  ;;  %v3156_v11 = vpop.f32.mrb[137].mxu1  ;;  %v3155_v31 = vadd.f32 %v3154_v46, %v7813_v29 }
 0x762   : > { %5577 = vmatpush1.bf16.msra.mxu0 %v5576_v50  ;;  %v3233_v9 = vmax.f32 %v3155_v31, 0.0  ;;  %v8502_v50 = vld [vmem:[#allocation56_spill] sm:$0xff] }
 0x763   : > { %v3159_v8 = vpop.f32.mrb[138].mxu1  ;;  %5578 = vmatprep.subr.bf16.mxu0 %v8359_v28 }
 0x764   : > { %v3160_v19 = vadd.f32 %v3159_v8, %v8498_v23  ;;  %v3161_v1 = vpop.f32.mrb[139].mxu1 }
 0x766   : > { %v3234_v32 = vmax.f32 %v3160_v19, 0.0 }
 0x767   : > { %v3164_v52 = vpop.f32.mrb[140].mxu1 }
 0x768   : > { %v5579_v0 = vpack.c.bf16 %v3234_v32, %v3233_v9  ;;  %v3166_v63 = vpop.f32.mrb[141].mxu1  ;;  %v3165_v38 = vadd.f32 %v3164_v52, %v7828_v55  ;;  %v8503_v52 = vld [vmem:[#allocation59_spill] sm:$0xff] }
 0x76a   : > { %5580 = vmatpush1.bf16.msra.mxu0 %v5579_v0  ;;  %v3235_v14 = vmax.f32 %v3165_v38, 0.0 }
 0x76b   : > { %v3169_v58 = vpop.f32.mrb[142].mxu1  ;;  %5581 = vmatprep.subr.bf16.mxu0 %v8359_v28 }
 0x76c   : > { %v3170_v29 = vadd.f32 %v3169_v58, %v8499_v24  ;;  %v3171_v26 = vpop.f32.mrb[143].mxu1  ;;  %v3246_v24 = vld [vmem:[#allocation6 + $0x800] sm:$0xff] }
 0x76d   : > { %v3248_v26 = vld [vmem:[#allocation6 + $0x810] sm:$0xff] }
 0x76e   : > { %v3236_v25 = vmax.f32 %v3170_v29, 0.0  ;;  %v3249_v29 = vld [vmem:[#allocation6 + $0x818] sm:$0xff] }
 0x76f   : > { %v3174_v5 = vpop.f32.mrb[144].mxu1 }
 0x770   : > { %v5582_v49 = vpack.c.bf16 %v3236_v25, %v3235_v14  ;;  %v3176_v15 = vpop.f32.mrb[145].mxu1  ;;  %v3175_v13 = vadd.f32 %v3174_v5, %v7843_v57  ;;  %v3251_v14 = vld [vmem:[#allocation6 + $0x828] sm:$0xff]  ;;  %v3253_v25 = vld [vmem:[#allocation6 + $0x838] sm:$0xff]  ;;  %v3252_v5 = vld [vmem:[#allocation6 + $0x830] sm:$0xff] }
 0x771   : > { %v3254_v15 = vld [vmem:[#allocation6 + $0x840] sm:$0xff] }
 0x772   : > { %5583 = vmatpush1.bf16.msra.mxu0 %v5582_v49  ;;  %v3237_v53 = vmax.f32 %v3175_v13, 0.0  ;;  %v3255_v49 = vld [vmem:[#allocation6 + $0x848] sm:$0xff]  ;;  %v3257_v13 = vld [vmem:[#allocation6 + $0x858] sm:$0xff] }
 0x773   : > { %v3179_v59 = vpop.f32.mrb[146].mxu1  ;;  %5584 = vmatprep.subr.bf16.mxu0 %v8359_v28 }
 0x774   : > { %v3180_v55 = vadd.f32 %v3179_v59, %v8500_v33  ;;  %v3181_v17 = vpop.f32.mrb[147].mxu1  ;;  %v3256_v59 = vld [vmem:[#allocation6 + $0x850] sm:$0xff]  ;;  %v3259_v33 = vld [vmem:[#allocation6 + $0x868] sm:$0xff] }
 0x775   : > { %v3261_v17 = vld [vmem:[#allocation6 + $0x878] sm:$0xff] }
 0x776   : > { %v3238_v45 = vmax.f32 %v3180_v55, 0.0  ;;  %v3258_v55 = vld [vmem:[#allocation6 + $0x860] sm:$0xff] }
 0x777   : > { %v3184_v4 = vpop.f32.mrb[148].mxu1 }
 0x778   : > { %v5585_v7 = vpack.c.bf16 %v3238_v45, %v3237_v53  ;;  %v3186_v16 = vpop.f32.mrb[149].mxu1  ;;  %v3185_v44 = vadd.f32 %v3184_v4, %v7856_v35  ;;  %v3260_v53 = vld [vmem:[#allocation6 + $0x870] sm:$0xff]  ;;  %v3263_v45 = vld [vmem:[#allocation6 + $0x888] sm:$0xff]  ;;  %v3262_v4 = vld [vmem:[#allocation6 + $0x880] sm:$0xff] }
 0x779   : > { %v3264_v16 = vld [vmem:[#allocation6 + $0x890] sm:$0xff] }
 0x77a   : > { %5586 = vmatpush1.bf16.msra.mxu0 %v5585_v7  ;;  %v3239_v48 = vmax.f32 %v3185_v44, 0.0  ;;  %v3265_v7 = vld [vmem:[#allocation6 + $0x898] sm:$0xff]  ;;  %v3267_v44 = vld [vmem:[#allocation6 + $0x8a8] sm:$0xff] }
 0x77b   : > { %v3189_v40 = vpop.f32.mrb[150].mxu1  ;;  %5587 = vmatprep.subr.bf16.mxu0 %v8359_v28 }
 0x77c   : > { %v3190_v57 = vadd.f32 %v3189_v40, %v8501_v27  ;;  %v3191_v34 = vpop.f32.mrb[151].mxu1  ;;  %v3266_v40 = vld [vmem:[#allocation6 + $0x8a0] sm:$0xff]  ;;  %v3269_v27 = vld [vmem:[#allocation6 + $0x8b8] sm:$0xff] }
 0x77d   : > { %v3271_v34 = vld [vmem:[#allocation6 + $0x8c8] sm:$0xff] }
 0x77e   : > { %v3240_v42 = vmax.f32 %v3190_v57, 0.0  ;;  %v3268_v57 = vld [vmem:[#allocation6 + $0x8b0] sm:$0xff] }
 0x77f   : > { %v3194_v54 = vpop.f32.mrb[152].mxu1 }
 0x780   : > { %v5588_v20 = vpack.c.bf16 %v3240_v42, %v3239_v48  ;;  %v3196_v21 = vpop.f32.mrb[153].mxu1  ;;  %v3195_v6 = vadd.f32 %v3194_v54, %v7869_v41  ;;  %v3270_v48 = vld [vmem:[#allocation6 + $0x8c0] sm:$0xff]  ;;  %v3273_v42 = vld [vmem:[#allocation6 + $0x8d8] sm:$0xff]  ;;  %v3272_v54 = vld [vmem:[#allocation6 + $0x8d0] sm:$0xff] }
 0x781   : > { %v3274_v21 = vld [vmem:[#allocation6 + $0x8e0] sm:$0xff] }
 0x782   : > { %5589 = vmatpush1.bf16.msra.mxu0 %v5588_v20  ;;  %v3241_v31 = vmax.f32 %v3195_v6, 0.0  ;;  %v3275_v20 = vld [vmem:[#allocation6 + $0x8e8] sm:$0xff]  ;;  %v3277_v6 = vld [vmem:[#allocation6 + $0x8f8] sm:$0xff] }
 0x783   : > { %v3199_v46 = vpop.f32.mrb[154].mxu1  ;;  %5590 = vmatprep.subr.bf16.mxu0 %v8359_v28 }
 0x784   : > { %v3200_v35 = vadd.f32 %v3199_v46, %v8502_v50  ;;  %v3201_v11 = vpop.f32.mrb[155].mxu1  ;;  %v3276_v46 = vld [vmem:[#allocation6 + $0x8f0] sm:$0xff]  ;;  %v3279_v50 = vld [vmem:[#allocation6 + $0x908] sm:$0xff] }
 0x785   : > { %v3281_v11 = vld [vmem:[#allocation6 + $0x918] sm:$0xff] }
 0x786   : > { %v3242_v8 = vmax.f32 %v3200_v35, 0.0  ;;  %v3278_v35 = vld [vmem:[#allocation6 + $0x900] sm:$0xff] }
 0x787   : > { %v3204_v23 = vpop.f32.mrb[156].mxu1 }
 0x788   : > { %v5591_v19 = vpack.c.bf16 %v3242_v8, %v3241_v31  ;;  %v3206_v1 = vpop.f32.mrb[157].mxu1  ;;  %v3205_v9 = vadd.f32 %v3204_v23, %v7876_v51  ;;  %v3250_v51 = vld [vmem:[#allocation6 + $0x820] sm:$0xff]  ;;  %v3280_v31 = vld [vmem:[#allocation6 + $0x910] sm:$0xff]  ;;  %v3283_v8 = vld [vmem:[#allocation6 + $0x928] sm:$0xff] }
 0x789   : > { %v3282_v23 = vld [vmem:[#allocation6 + $0x920] sm:$0xff]  ;;  %v3284_v1 = vld [vmem:[#allocation6 + $0x930] sm:$0xff] }
 0x78a   : > { %5592 = vmatpush1.bf16.msra.mxu0 %v5591_v19  ;;  %v3243_v63 = vmax.f32 %v3205_v9, 0.0  ;;  %v3285_v19 = vld [vmem:[#allocation6 + $0x938] sm:$0xff]  ;;  %v3287_v9 = vld [vmem:[#allocation6 + $0x948] sm:$0xff] }
 0x78b   : > { %v3209_v32 = vpop.f32.mrb[158].mxu1  ;;  %5593 = vmatprep.subr.bf16.mxu0 %v8359_v28 }
 0x78c   : > { %v3210_v41 = vadd.f32 %v3209_v32, %v8503_v52  ;;  %v3211_v0 = vpop.f32.mrb[159].mxu1  ;;  %v3286_v32 = vld [vmem:[#allocation6 + $0x940] sm:$0xff]  ;;  %v3289_v52 = vld [vmem:[#allocation6 + $0x958] sm:$0xff] }
 0x78d   : > { %v3291_v0 = vld [vmem:[#allocation6 + $0x968] sm:$0xff] }
 0x78e   : > { %v3244_v38 = vmax.f32 %v3210_v41, 0.0  ;;  %v3288_v41 = vld [vmem:[#allocation6 + $0x950] sm:$0xff] }
 0x790   : > { %v5594_v58 = vpack.c.bf16 %v3244_v38, %v3243_v63  ;;  %v3290_v63 = vld [vmem:[#allocation6 + $0x960] sm:$0xff]  ;;  %v3293_v38 = vld [vmem:[#allocation6 + $0x978] sm:$0xff] }
 0x792   : > { %5595 = vmatpush1.bf16.msra.mxu0 %v5594_v58  ;;  %v3292_v58 = vld [vmem:[#allocation6 + $0x970] sm:$0xff] }
 0x793   : > { %5644 = vmatprep.subr.bf16.mxu0 %v8359_v28 }
 0x795   : > { %3568 = vmatmul.mubr.f32.vlgmr.msra.gmra.mrb[96].mxu0 %v3246_v24  ;;  %v3295_v24 = vld [vmem:[#allocation6 + $0x988] sm:$0xff] }
 0x796   : > { %3572 = vmatprep.mubr.f32.mxu0 %v3249_v29  ;;  %v3294_v29 = vld [vmem:[#allocation6 + $0x980] sm:$0xff] }
 0x799   : > { %3573 = vmatmul.mubr.f32.gmra.mrb[98].mxu0 %v3248_v26  ;;  %v3297_v26 = vld [vmem:[#allocation6 + $0x998] sm:$0xff] }
 0x79a   : > { %3577 = vmatprep.mubr.f32.mxu0 %v3251_v14  ;;  %v3296_v14 = vld [vmem:[#allocation6 + $0x990] sm:$0xff] }
 0x79d   : > { %3578 = vmatmul.mubr.f32.gmra.mrb[100].mxu0 %v3250_v51  ;;  %v3299_v51 = vld [vmem:[#allocation6 + $0x9a8] sm:$0xff] }
 0x79e   : > { %3582 = vmatprep.mubr.f32.mxu0 %v3253_v25  ;;  %v3298_v25 = vld [vmem:[#allocation6 + $0x9a0] sm:$0xff] }
 0x7a1   : > { %3583 = vmatmul.mubr.f32.gmra.mrb[102].mxu0 %v3252_v5  ;;  %v3301_v5 = vld [vmem:[#allocation6 + $0x9b8] sm:$0xff] }
 0x7a2   : > { %3587 = vmatprep.mubr.f32.mxu0 %v3255_v49  ;;  %v3300_v49 = vld [vmem:[#allocation6 + $0x9b0] sm:$0xff] }
 0x7a5   : > { %3588 = vmatmul.mubr.f32.gmra.mrb[104].mxu0 %v3254_v15  ;;  %v3303_v15 = vld [vmem:[#allocation6 + $0x9c8] sm:$0xff] }
 0x7a6   : > { %3592 = vmatprep.mubr.f32.mxu0 %v3257_v13  ;;  %v3302_v13 = vld [vmem:[#allocation6 + $0x9c0] sm:$0xff] }
 0x7a9   : > { %3593 = vmatmul.mubr.f32.gmra.mrb[106].mxu0 %v3256_v59  ;;  %v3305_v59 = vld [vmem:[#allocation6 + $0x9d8] sm:$0xff] }
 0x7aa   : > { %3597 = vmatprep.mubr.f32.mxu0 %v3259_v33  ;;  %v3304_v33 = vld [vmem:[#allocation6 + $0x9d0] sm:$0xff] }
 0x7ad   : > { %3598 = vmatmul.mubr.f32.gmra.mrb[108].mxu0 %v3258_v55  ;;  %v3307_v55 = vld [vmem:[#allocation6 + $0x9e8] sm:$0xff] }
 0x7ae   : > { %3602 = vmatprep.mubr.f32.mxu0 %v3261_v17  ;;  %v3306_v17 = vld [vmem:[#allocation6 + $0x9e0] sm:$0xff] }
 0x7b1   : > { %3603 = vmatmul.mubr.f32.gmra.mrb[110].mxu0 %v3260_v53  ;;  %v3309_v53 = vld [vmem:[#allocation6 + $0x9f8] sm:$0xff] }
 0x7b2   : > { %3607 = vmatprep.mubr.f32.mxu0 %v3263_v45  ;;  %v3308_v45 = vld [vmem:[#allocation6 + $0x9f0] sm:$0xff] }
 0x7b5   : > { %3608 = vmatmul.mubr.f32.gmra.mrb[112].mxu0 %v3262_v4 }
 0x7b6   : > { %3612 = vmatprep.mubr.f32.mxu0 %v3265_v7 }
 0x7b9   : > { %3613 = vmatmul.mubr.f32.gmra.mrb[114].mxu0 %v3264_v16 }
 0x7ba   : > { %3617 = vmatprep.mubr.f32.mxu0 %v3267_v44  ;;  %v3762_v44 = vld [vmem:[#allocation6 + $0xa08] sm:$0xff] }
 0x7bb   : > { %4082 = vmatprep.mubr.f32.mxu1 %v3762_v44 }
 0x7bd   : > { %3618 = vmatmul.mubr.f32.gmra.mrb[116].mxu0 %v3266_v40 }
 0x7be   : > { %3622 = vmatprep.mubr.f32.mxu0 %v3269_v27  ;;  %v8504_v27 = vld [vmem:[#allocation61_spill] sm:$0xff] }
 0x7c1   : > { %3623 = vmatmul.mubr.f32.gmra.mrb[118].mxu0 %v3268_v57 }
 0x7c2   : > { %3627 = vmatprep.mubr.f32.mxu0 %v3271_v34 }
 0x7c5   : > { %3628 = vmatmul.mubr.f32.gmra.mrb[120].mxu0 %v3270_v48 }
 0x7c6   : > { %3632 = vmatprep.mubr.f32.mxu0 %v3273_v42 }
 0x7c9   : > { %3633 = vmatmul.mubr.f32.gmra.mrb[122].mxu0 %v3272_v54 }
 0x7ca   : > { %3637 = vmatprep.mubr.f32.mxu0 %v3275_v20 }
 0x7cd   : > { %3638 = vmatmul.mubr.f32.gmra.mrb[124].mxu0 %v3274_v21 }
 0x7ce   : > { %3642 = vmatprep.mubr.f32.mxu0 %v3277_v6 }
 0x7d1   : > { %3643 = vmatmul.mubr.f32.gmra.mrb[126].mxu0 %v3276_v46 }
 0x7d2   : > { %3647 = vmatprep.mubr.f32.mxu0 %v3279_v50  ;;  %v8505_v50 = vld [vmem:[#allocation64_spill] sm:$0xff] }
 0x7d5   : > { %3648 = vmatmul.mubr.f32.gmra.mrb[128].mxu0 %v3278_v35 }
 0x7d6   : > { %3652 = vmatprep.mubr.f32.mxu0 %v3281_v11 }
 0x7d9   : > { %3653 = vmatmul.mubr.f32.gmra.mrb[130].mxu0 %v3280_v31 }
 0x7da   : > { %3657 = vmatprep.mubr.f32.mxu0 %v3283_v8 }
 0x7dd   : > { %3658 = vmatmul.mubr.f32.gmra.mrb[132].mxu0 %v3282_v23 }
 0x7de   : > { %3662 = vmatprep.mubr.f32.mxu0 %v3285_v19 }
 0x7e1   : > { %3663 = vmatmul.mubr.f32.gmra.mrb[134].mxu0 %v3284_v1 }
 0x7e2   : > { %3667 = vmatprep.mubr.f32.mxu0 %v3287_v9 }
 0x7e5   : > { %3668 = vmatmul.mubr.f32.gmra.mrb[136].mxu0 %v3286_v32  ;;  %v8506_v32 = vld [vmem:[#allocation66_spill] sm:$0xff] }
 0x7e6   : > { %3672 = vmatprep.mubr.f32.mxu0 %v3289_v52 }
 0x7e9   : > { %3673 = vmatmul.mubr.f32.gmra.mrb[138].mxu0 %v3288_v41 }
 0x7ea   : > { %3677 = vmatprep.mubr.f32.mxu0 %v3291_v0 }
 0x7ed   : > { %3678 = vmatmul.mubr.f32.gmra.mrb[140].mxu0 %v3290_v63 }
 0x7ee   : > { %3682 = vmatprep.mubr.f32.mxu0 %v3293_v38 }
 0x7f1   : > { %3683 = vmatmul.mubr.f32.gmra.mrb[142].mxu0 %v3292_v58 }
 0x7f2   : > { %3687 = vmatprep.mubr.f32.mxu0 %v3295_v24 }
 0x7f5   : > { %3688 = vmatmul.mubr.f32.gmra.mrb[144].mxu0 %v3294_v29 }
 0x7f6   : > { %3692 = vmatprep.mubr.f32.mxu0 %v3297_v26  ;;  %v8507_v26 = vld [vmem:[#allocation69_spill] sm:$0xff] }
 0x7f9   : > { %3693 = vmatmul.mubr.f32.gmra.mrb[146].mxu0 %v3296_v14 }
 0x7fa   : > { %3697 = vmatprep.mubr.f32.mxu0 %v3299_v51 }
 0x7fd   : > { %3698 = vmatmul.mubr.f32.gmra.mrb[148].mxu0 %v3298_v25 }
 0x7fe   : > { %3702 = vmatprep.mubr.f32.mxu0 %v3301_v5 }
 0x801   : > { %3703 = vmatmul.mubr.f32.gmra.mrb[150].mxu0 %v3300_v49 }
 0x802   : > { %3707 = vmatprep.mubr.f32.mxu0 %v3303_v15 }
 0x805   : > { %3708 = vmatmul.mubr.f32.gmra.mrb[152].mxu0 %v3302_v13 }
 0x806   : > { %3712 = vmatprep.mubr.f32.mxu0 %v3305_v59 }
 0x809   : > { %3713 = vmatmul.mubr.f32.gmra.mrb[154].mxu0 %v3304_v33  ;;  %v8508_v33 = vld [vmem:[#allocation71_spill] sm:$0xff] }
 0x80a   : > { %3717 = vmatprep.mubr.f32.mxu0 %v3307_v55 }
 0x80d   : > { %3718 = vmatmul.mubr.f32.gmra.mrb[156].mxu0 %v3306_v17 }
 0x80e   : > { %3722 = vmatprep.mubr.f32.mxu0 %v3309_v53 }
 0x811   : > { %3723 = vmatmul.mubr.f32.gmra.mrb[158].mxu0 %v3308_v45 }
 0x868   : > { %v3569_v4 = vpop.f32.mrb[96].mxu0 }
 0x869   : > { %v3571_v7 = vpop.f32.mrb[97].mxu0  ;;  %v3570_v16 = vadd.f32 %v3569_v4, %v7887_v56 }
 0x86b   : > { %v3728_v48 = vmax.f32 %v3570_v16, 0.0 }
 0x86c   : > { %v3574_v40 = vpop.f32.mrb[98].mxu0 }
 0x86d   : > { %v3575_v57 = vadd.f32 %v3574_v40, %v8504_v27  ;;  %v3576_v34 = vpop.f32.mrb[99].mxu0  ;;  %v8509_v40 = vld [vmem:[#allocation74_spill] sm:$0xff] }
 0x86f   : > { %v3729_v42 = vmax.f32 %v3575_v57, 0.0 }
 0x870   : > { %v3579_v54 = vpop.f32.mrb[100].mxu0 }
 0x871   : > { %v5597_v20 = vpack.c.bf16 %v3729_v42, %v3728_v48  ;;  %v3581_v21 = vpop.f32.mrb[101].mxu0  ;;  %v3580_v6 = vadd.f32 %v3579_v54, %v7895_v30 }
 0x873   : > { %5598 = vmatpush1.bf16.msra.mxu1 %v5597_v20  ;;  %v3730_v11 = vmax.f32 %v3580_v6, 0.0  ;;  %v8510_v6 = vld [vmem:[#allocation76_spill] sm:$0xff] }
 0x874   : > { %v3584_v46 = vpop.f32.mrb[102].mxu0  ;;  %5599 = vmatprep.subr.bf16.mxu1 %v8359_v28 }
 0x875   : > { %v3585_v35 = vadd.f32 %v3584_v46, %v8505_v50  ;;  %v3586_v56 = vpop.f32.mrb[103].mxu0 }
 0x877   : > { %v3731_v31 = vmax.f32 %v3585_v35, 0.0 }
 0x878   : > { %v3589_v8 = vpop.f32.mrb[104].mxu0 }
 0x879   : > { %v5600_v23 = vpack.c.bf16 %v3731_v31, %v3730_v11  ;;  %v3591_v19 = vpop.f32.mrb[105].mxu0  ;;  %v3590_v1 = vadd.f32 %v3589_v8, %v7906_v2 }
 0x87a   : > { %v8511_v19 = vld [vmem:[#allocation79_spill] sm:$0xff] }
 0x87b   : > { %5601 = vmatpush1.bf16.msra.mxu1 %v5600_v23  ;;  %v3732_v41 = vmax.f32 %v3590_v1, 0.0 }
 0x87c   : > { %v3594_v9 = vpop.f32.mrb[106].mxu0  ;;  %5602 = vmatprep.subr.bf16.mxu1 %v8359_v28 }
 0x87d   : > { %v3595_v30 = vadd.f32 %v3594_v9, %v8506_v32  ;;  %v3596_v52 = vpop.f32.mrb[107].mxu0 }
 0x87f   : > { %v3733_v0 = vmax.f32 %v3595_v30, 0.0 }
 0x880   : > { %v3599_v63 = vpop.f32.mrb[108].mxu0 }
 0x881   : > { %v5603_v38 = vpack.c.bf16 %v3733_v0, %v3732_v41  ;;  %v3601_v58 = vpop.f32.mrb[109].mxu0  ;;  %v3600_v24 = vadd.f32 %v3599_v63, %v7913_v10 }
 0x883   : > { %5604 = vmatpush1.bf16.msra.mxu1 %v5603_v38  ;;  %v3734_v51 = vmax.f32 %v3600_v24, 0.0  ;;  %v8512_v38 = vld [vmem:[#allocation81_spill] sm:$0xff] }
 0x884   : > { %v3604_v29 = vpop.f32.mrb[110].mxu0  ;;  %5605 = vmatprep.subr.bf16.mxu1 %v8359_v28 }
 0x885   : > { %v3605_v2 = vadd.f32 %v3604_v29, %v8507_v26  ;;  %v3606_v14 = vpop.f32.mrb[111].mxu0 }
 0x887   : > { %v3735_v25 = vmax.f32 %v3605_v2, 0.0 }
 0x888   : > { %v3609_v5 = vpop.f32.mrb[112].mxu0 }
 0x889   : > { %v5606_v49 = vpack.c.bf16 %v3735_v25, %v3734_v51  ;;  %v3611_v15 = vpop.f32.mrb[113].mxu0  ;;  %v3610_v13 = vadd.f32 %v3609_v5, %v7923_v3  ;;  %v8513_v5 = vld [vmem:[#allocation84_spill] sm:$0xff] }
 0x88b   : > { %5607 = vmatpush1.bf16.msra.mxu1 %v5606_v49  ;;  %v3736_v17 = vmax.f32 %v3610_v13, 0.0 }
 0x88c   : > { %v3614_v59 = vpop.f32.mrb[114].mxu0  ;;  %5608 = vmatprep.subr.bf16.mxu1 %v8359_v28 }
 0x88d   : > { %v3615_v10 = vadd.f32 %v3614_v59, %v8508_v33  ;;  %v3616_v55 = vpop.f32.mrb[115].mxu0 }
 0x88f   : > { %v3737_v53 = vmax.f32 %v3615_v10, 0.0 }
 0x890   : > { %v3619_v45 = vpop.f32.mrb[116].mxu0 }
 0x891   : > { %v5609_v4 = vpack.c.bf16 %v3737_v53, %v3736_v17  ;;  %v3621_v7 = vpop.f32.mrb[117].mxu0  ;;  %v3620_v16 = vadd.f32 %v3619_v45, %v7928_v62  ;;  %v8514_v53 = vld [vmem:[#allocation86_spill] sm:$0xff] }
 0x893   : > { %5610 = vmatpush1.bf16.msra.mxu1 %v5609_v4  ;;  %v3738_v57 = vmax.f32 %v3620_v16, 0.0 }
 0x894   : > { %v3624_v44 = vpop.f32.mrb[118].mxu0  ;;  %5611 = vmatprep.subr.bf16.mxu1 %v8359_v28 }
 0x895   : > { %v3625_v3 = vadd.f32 %v3624_v44, %v8509_v40  ;;  %v3626_v27 = vpop.f32.mrb[119].mxu0 }
 0x897   : > { %v3739_v34 = vmax.f32 %v3625_v3, 0.0 }
 0x898   : > { %v3629_v48 = vpop.f32.mrb[120].mxu0 }
 0x899   : > { %v5612_v42 = vpack.c.bf16 %v3739_v34, %v3738_v57  ;;  %v3631_v54 = vpop.f32.mrb[121].mxu0  ;;  %v3630_v20 = vadd.f32 %v3629_v48, %v7936_v43  ;;  %v8515_v57 = vld [vmem:[#allocation89_spill] sm:$0xff] }
 0x89b   : > { %5613 = vmatpush1.bf16.msra.mxu1 %v5612_v42  ;;  %v3740_v50 = vmax.f32 %v3630_v20, 0.0 }
 0x89c   : > { %v3634_v21 = vpop.f32.mrb[122].mxu0  ;;  %5614 = vmatprep.subr.bf16.mxu1 %v8359_v28 }
 0x89d   : > { %v3635_v62 = vadd.f32 %v3634_v21, %v8510_v6  ;;  %v3636_v46 = vpop.f32.mrb[123].mxu0 }
 0x89e   : > { %v8516_v46 = vld [vmem:[#allocation91_spill] sm:$0xff] }
 0x89f   : > { %v3741_v35 = vmax.f32 %v3635_v62, 0.0 }
 0x8a0   : > { %v3639_v56 = vpop.f32.mrb[124].mxu0 }
 0x8a1   : > { %v5615_v11 = vpack.c.bf16 %v3741_v35, %v3740_v50  ;;  %v3641_v31 = vpop.f32.mrb[125].mxu0  ;;  %v3640_v8 = vadd.f32 %v3639_v56, %v7941_v39 }
 0x8a3   : > { %5616 = vmatpush1.bf16.msra.mxu1 %v5615_v11  ;;  %v3742_v9 = vmax.f32 %v3640_v8, 0.0 }
 0x8a4   : > { %v3644_v23 = vpop.f32.mrb[126].mxu0  ;;  %5617 = vmatprep.subr.bf16.mxu1 %v8359_v28 }
 0x8a5   : > { %v3645_v43 = vadd.f32 %v3644_v23, %v8511_v19  ;;  %v3646_v1 = vpop.f32.mrb[127].mxu0 }
 0x8a7   : > { %v3743_v32 = vmax.f32 %v3645_v43, 0.0  ;;  %v8517_v43 = vld [vmem:[#allocation94_spill] sm:$0xff] }
 0x8a8   : > { %v3649_v30 = vpop.f32.mrb[128].mxu0 }
 0x8a9   : > { %v5618_v52 = vpack.c.bf16 %v3743_v32, %v3742_v9  ;;  %v3651_v41 = vpop.f32.mrb[129].mxu0  ;;  %v3650_v0 = vadd.f32 %v3649_v30, %v7949_v36 }
 0x8ab   : > { %5619 = vmatpush1.bf16.msra.mxu1 %v5618_v52  ;;  %v3744_v24 = vmax.f32 %v3650_v0, 0.0 }
 0x8ac   : > { %v3654_v63 = vpop.f32.mrb[130].mxu0  ;;  %5620 = vmatprep.subr.bf16.mxu1 %v8359_v28 }
 0x8ad   : > { %v3655_v39 = vadd.f32 %v3654_v63, %v8512_v38  ;;  %v3656_v58 = vpop.f32.mrb[131].mxu0  ;;  %v8518_v38 = vld [vmem:[#allocation96_spill] sm:$0xff] }
 0x8af   : > { %v3745_v29 = vmax.f32 %v3655_v39, 0.0 }
 0x8b0   : > { %v3659_v26 = vpop.f32.mrb[132].mxu0 }
 0x8b1   : > { %v5621_v2 = vpack.c.bf16 %v3745_v29, %v3744_v24  ;;  %v3661_v14 = vpop.f32.mrb[133].mxu0  ;;  %v3660_v51 = vadd.f32 %v3659_v26, %v7954_v47 }
 0x8b3   : > { %5622 = vmatpush1.bf16.msra.mxu1 %v5621_v2  ;;  %v3746_v15 = vmax.f32 %v3660_v51, 0.0  ;;  %v3501_v51 = vpop.permute.xlu0 %3500 }
 0x8b4   : > { %v3664_v25 = vpop.f32.mrb[134].mxu0  ;;  %5623 = vmatprep.subr.bf16.mxu1 %v8359_v28 }
 0x8b5   : > { %v3665_v36 = vadd.f32 %v3664_v25, %v8513_v5  ;;  %v3666_v49 = vpop.f32.mrb[135].mxu0 }
 0x8b7   : > { %v3747_v13 = vmax.f32 %v3665_v36, 0.0 }
 0x8b8   : > { %v3669_v59 = vpop.f32.mrb[136].mxu0 }
 0x8b9   : > { %v5624_v33 = vpack.c.bf16 %v3747_v13, %v3746_v15  ;;  %v3671_v10 = vpop.f32.mrb[137].mxu0  ;;  %v3670_v55 = vadd.f32 %v3669_v59, %v7962_v61  ;;  %v3761_v13 = vld [vmem:[#allocation6 + $0xa00] sm:$0xff]  ;;  %v3764_v59 = vld [vmem:[#allocation6 + $0xa18] sm:$0xff] }
 0x8ba   : > { %v3766_v10 = vld [vmem:[#allocation6 + $0xa28] sm:$0xff] }
 0x8bb   : > { %5625 = vmatpush1.bf16.msra.mxu1 %v5624_v33  ;;  %v3748_v4 = vmax.f32 %v3670_v55, 0.0  ;;  %v3763_v33 = vld [vmem:[#allocation6 + $0xa10] sm:$0xff]  ;;  %v3768_v55 = vld [vmem:[#allocation6 + $0xa38] sm:$0xff] }
 0x8bc   : > { %v3674_v17 = vpop.f32.mrb[138].mxu0  ;;  %5626 = vmatprep.subr.bf16.mxu1 %v8359_v28 }
 0x8bd   : > { %v3675_v47 = vadd.f32 %v3674_v17, %v8514_v53  ;;  %v3676_v45 = vpop.f32.mrb[139].mxu0  ;;  %v3767_v17 = vld [vmem:[#allocation6 + $0xa30] sm:$0xff]  ;;  %v3770_v53 = vld [vmem:[#allocation6 + $0xa48] sm:$0xff] }
 0x8be   : > { %v3772_v45 = vld [vmem:[#allocation6 + $0xa58] sm:$0xff] }
 0x8bf   : > { %v3749_v7 = vmax.f32 %v3675_v47, 0.0  ;;  %v3769_v47 = vld [vmem:[#allocation6 + $0xa40] sm:$0xff] }
 0x8c0   : > { %v3679_v16 = vpop.f32.mrb[140].mxu0 }
 0x8c1   : > { %v5627_v44 = vpack.c.bf16 %v3749_v7, %v3748_v4  ;;  %v3681_v40 = vpop.f32.mrb[141].mxu0  ;;  %v3680_v3 = vadd.f32 %v3679_v16, %v7967_v18  ;;  %v3771_v4 = vld [vmem:[#allocation6 + $0xa50] sm:$0xff]  ;;  %v3774_v7 = vld [vmem:[#allocation6 + $0xa68] sm:$0xff]  ;;  %v3773_v16 = vld [vmem:[#allocation6 + $0xa60] sm:$0xff] }
 0x8c2   : > { %v3775_v40 = vld [vmem:[#allocation6 + $0xa70] sm:$0xff] }
 0x8c3   : > { %5628 = vmatpush1.bf16.msra.mxu1 %v5627_v44  ;;  %v3750_v48 = vmax.f32 %v3680_v3, 0.0  ;;  %v3776_v44 = vld [vmem:[#allocation6 + $0xa78] sm:$0xff]  ;;  %v3778_v3 = vld [vmem:[#allocation6 + $0xa88] sm:$0xff] }
 0x8c4   : > { %v3684_v27 = vpop.f32.mrb[142].mxu0  ;;  %5629 = vmatprep.subr.bf16.mxu1 %v8359_v28 }
 0x8c5   : > { %v3685_v61 = vadd.f32 %v3684_v27, %v8515_v57  ;;  %v3686_v34 = vpop.f32.mrb[143].mxu0  ;;  %v3777_v27 = vld [vmem:[#allocation6 + $0xa80] sm:$0xff]  ;;  %v3780_v57 = vld [vmem:[#allocation6 + $0xa98] sm:$0xff] }
 0x8c6   : > { %v3782_v34 = vld [vmem:[#allocation6 + $0xaa8] sm:$0xff] }
 0x8c7   : > { %v3751_v42 = vmax.f32 %v3685_v61, 0.0  ;;  %v3779_v61 = vld [vmem:[#allocation6 + $0xa90] sm:$0xff] }
 0x8c8   : > { %v3689_v54 = vpop.f32.mrb[144].mxu0 }
 0x8c9   : > { %v5630_v20 = vpack.c.bf16 %v3751_v42, %v3750_v48  ;;  %v3691_v21 = vpop.f32.mrb[145].mxu0  ;;  %v3690_v6 = vadd.f32 %v3689_v54, %v7975_v60  ;;  %v3781_v48 = vld [vmem:[#allocation6 + $0xaa0] sm:$0xff]  ;;  %v3784_v42 = vld [vmem:[#allocation6 + $0xab8] sm:$0xff]  ;;  %v3783_v54 = vld [vmem:[#allocation6 + $0xab0] sm:$0xff] }
 0x8ca   : > { %v3785_v21 = vld [vmem:[#allocation6 + $0xac0] sm:$0xff] }
 0x8cb   : > { %5631 = vmatpush1.bf16.msra.mxu1 %v5630_v20  ;;  %v3752_v35 = vmax.f32 %v3690_v6, 0.0  ;;  %v3786_v20 = vld [vmem:[#allocation6 + $0xac8] sm:$0xff]  ;;  %v3788_v6 = vld [vmem:[#allocation6 + $0xad8] sm:$0xff] }
 0x8cc   : > { %v3694_v62 = vpop.f32.mrb[146].mxu0  ;;  %5632 = vmatprep.subr.bf16.mxu1 %v8359_v28 }
 0x8cd   : > { %v3695_v18 = vadd.f32 %v3694_v62, %v8516_v46  ;;  %v3696_v50 = vpop.f32.mrb[147].mxu0  ;;  %v3787_v62 = vld [vmem:[#allocation6 + $0xad0] sm:$0xff]  ;;  %v3790_v46 = vld [vmem:[#allocation6 + $0xae8] sm:$0xff] }
 0x8ce   : > { %v3792_v50 = vld [vmem:[#allocation6 + $0xaf8] sm:$0xff] }
 0x8cf   : > { %v3753_v56 = vmax.f32 %v3695_v18, 0.0  ;;  %v3789_v18 = vld [vmem:[#allocation6 + $0xae0] sm:$0xff] }
 0x8d0   : > { %v3699_v11 = vpop.f32.mrb[148].mxu0 }
 0x8d1   : > { %v5633_v31 = vpack.c.bf16 %v3753_v56, %v3752_v35  ;;  %v3701_v8 = vpop.f32.mrb[149].mxu0  ;;  %v3700_v23 = vadd.f32 %v3699_v11, %v7980_v37  ;;  %v3791_v35 = vld [vmem:[#allocation6 + $0xaf0] sm:$0xff]  ;;  %v3794_v56 = vld [vmem:[#allocation6 + $0xb08] sm:$0xff]  ;;  %v3793_v11 = vld [vmem:[#allocation6 + $0xb00] sm:$0xff] }
 0x8d2   : > { %v3795_v8 = vld [vmem:[#allocation6 + $0xb10] sm:$0xff] }
 0x8d3   : > { %5634 = vmatpush1.bf16.msra.mxu1 %v5633_v31  ;;  %v3754_v9 = vmax.f32 %v3700_v23, 0.0  ;;  %v3796_v31 = vld [vmem:[#allocation6 + $0xb18] sm:$0xff]  ;;  %v3798_v23 = vld [vmem:[#allocation6 + $0xb28] sm:$0xff] }
 0x8d4   : > { %v3704_v19 = vpop.f32.mrb[150].mxu0  ;;  %5635 = vmatprep.subr.bf16.mxu1 %v8359_v28 }
 0x8d5   : > { %v3705_v60 = vadd.f32 %v3704_v19, %v8517_v43  ;;  %v3706_v1 = vpop.f32.mrb[151].mxu0  ;;  %v3797_v19 = vld [vmem:[#allocation6 + $0xb20] sm:$0xff]  ;;  %v3800_v43 = vld [vmem:[#allocation6 + $0xb38] sm:$0xff] }
 0x8d6   : > { %v3802_v1 = vld [vmem:[#allocation6 + $0xb48] sm:$0xff] }
 0x8d7   : > { %v3755_v32 = vmax.f32 %v3705_v60, 0.0  ;;  %v3799_v60 = vld [vmem:[#allocation6 + $0xb30] sm:$0xff] }
 0x8d8   : > { %v3709_v30 = vpop.f32.mrb[152].mxu0 }
 0x8d9   : > { %v5636_v52 = vpack.c.bf16 %v3755_v32, %v3754_v9  ;;  %v3711_v41 = vpop.f32.mrb[153].mxu0  ;;  %v3710_v0 = vadd.f32 %v3709_v30, %v7988_v22  ;;  %v3801_v9 = vld [vmem:[#allocation6 + $0xb40] sm:$0xff]  ;;  %v3804_v32 = vld [vmem:[#allocation6 + $0xb58] sm:$0xff]  ;;  %v3803_v30 = vld [vmem:[#allocation6 + $0xb50] sm:$0xff] }
 0x8da   : > { %v3805_v41 = vld [vmem:[#allocation6 + $0xb60] sm:$0xff] }
 0x8db   : > { %5637 = vmatpush1.bf16.msra.mxu1 %v5636_v52  ;;  %v3756_v58 = vmax.f32 %v3710_v0, 0.0  ;;  %v3806_v52 = vld [vmem:[#allocation6 + $0xb68] sm:$0xff]  ;;  %v3808_v0 = vld [vmem:[#allocation6 + $0xb78] sm:$0xff] }
 0x8dc   : > { %v3714_v63 = vpop.f32.mrb[154].mxu0  ;;  %5638 = vmatprep.subr.bf16.mxu1 %v8359_v28 }
 0x8dd   : > { %v3715_v37 = vadd.f32 %v3714_v63, %v8518_v38  ;;  %v3716_v39 = vpop.f32.mrb[155].mxu0  ;;  %v3807_v63 = vld [vmem:[#allocation6 + $0xb70] sm:$0xff]  ;;  %v3810_v38 = vld [vmem:[#allocation6 + $0xb88] sm:$0xff] }
 0x8de   : > { %v3812_v39 = vld [vmem:[#allocation6 + $0xb98] sm:$0xff] }
 0x8df   : > { %v3757_v24 = vmax.f32 %v3715_v37, 0.0  ;;  %v3809_v37 = vld [vmem:[#allocation6 + $0xb80] sm:$0xff] }
 0x8e0   : > { %v3719_v29 = vpop.f32.mrb[156].mxu0 }
 0x8e1   : > { %v5639_v26 = vpack.c.bf16 %v3757_v24, %v3756_v58  ;;  %v3721_v2 = vpop.f32.mrb[157].mxu0  ;;  %v3720_v14 = vadd.f32 %v3719_v29, %v7990_v12  ;;  %v3765_v12 = vld [vmem:[#allocation6 + $0xa20] sm:$0xff]  ;;  %v3811_v58 = vld [vmem:[#allocation6 + $0xb90] sm:$0xff]  ;;  %v3814_v24 = vld [vmem:[#allocation6 + $0xba8] sm:$0xff] }
 0x8e2   : > { %v3813_v29 = vld [vmem:[#allocation6 + $0xba0] sm:$0xff]  ;;  %v3815_v2 = vld [vmem:[#allocation6 + $0xbb0] sm:$0xff] }
 0x8e3   : > { %5640 = vmatpush1.bf16.msra.mxu1 %v5639_v26  ;;  %v3758_v36 = vmax.f32 %v3720_v14, 0.0  ;;  %v3816_v26 = vld [vmem:[#allocation6 + $0xbb8] sm:$0xff]  ;;  %v3818_v14 = vld [vmem:[#allocation6 + $0xbc8] sm:$0xff] }
 0x8e4   : > { %v3724_v25 = vpop.f32.mrb[158].mxu0  ;;  %5641 = vmatprep.subr.bf16.mxu1 %v8359_v28 }
 0x8e5   : > { %v3725_v22 = vadd.f32 %v3724_v25, %v3501_v51  ;;  %v3726_v5 = vpop.f32.mrb[159].mxu0  ;;  %v3817_v51 = vld [vmem:[#allocation6 + $0xbc0] sm:$0xff]  ;;  %v3820_v25 = vld [vmem:[#allocation6 + $0xbd8] sm:$0xff] }
 0x8e6   : > { %v3822_v5 = vld [vmem:[#allocation6 + $0xbe8] sm:$0xff] }
 0x8e7   : > { %v3759_v49 = vmax.f32 %v3725_v22, 0.0  ;;  %v3819_v22 = vld [vmem:[#allocation6 + $0xbd0] sm:$0xff] }
 0x8e9   : > { %v5642_v15 = vpack.c.bf16 %v3759_v49, %v3758_v36  ;;  %v3821_v36 = vld [vmem:[#allocation6 + $0xbe0] sm:$0xff]  ;;  %v3824_v49 = vld [vmem:[#allocation6 + $0xbf8] sm:$0xff] }
 0x8eb   : > { %5643 = vmatpush1.bf16.msra.mxu1 %v5642_v15  ;;  %v3823_v15 = vld [vmem:[#allocation6 + $0xbf0] sm:$0xff] }
 0x8ee   : > { %4083 = vmatmul.mubr.f32.vlgmr.msra.gmra.mrb[160].mxu1 %v3761_v13 }
 0x8ef   : > { %4087 = vmatprep.mubr.f32.mxu1 %v3764_v59 }
 0x8f2   : > { %4088 = vmatmul.mubr.f32.gmra.mrb[162].mxu1 %v3763_v33  ;;  %v3861_v33 = vpop.permute.xlu1 %3860 }
 0x8f3   : > { %4092 = vmatprep.mubr.f32.mxu1 %v3766_v10 }
 0x8f6   : > { %4093 = vmatmul.mubr.f32.gmra.mrb[164].mxu1 %v3765_v12  ;;  %v4277_v12 = vld [vmem:[#allocation6 + $0xc08] sm:$0xff] }
 0x8f7   : > { %4097 = vmatprep.mubr.f32.mxu1 %v3768_v55  ;;  %v3866_v55 = vpop.permute.xlu0 %3865  ;;  %4597 = vmatprep.mubr.f32.mxu0 %v4277_v12 }
 0x8fa   : > { %4098 = vmatmul.mubr.f32.gmra.mrb[166].mxu1 %v3767_v17 }
 0x8fb   : > { %4102 = vmatprep.mubr.f32.mxu1 %v3770_v53 }
 0x8fe   : > { %4103 = vmatmul.mubr.f32.gmra.mrb[168].mxu1 %v3769_v47 }
 0x8ff   : > { %4107 = vmatprep.mubr.f32.mxu1 %v3772_v45 }
 0x902   : > { %4108 = vmatmul.mubr.f32.gmra.mrb[170].mxu1 %v3771_v4 }
 0x903   : > { %4112 = vmatprep.mubr.f32.mxu1 %v3774_v7 }
 0x906   : > { %4113 = vmatmul.mubr.f32.gmra.mrb[172].mxu1 %v3773_v16 }
 0x907   : > { %4117 = vmatprep.mubr.f32.mxu1 %v3776_v44 }
 0x90a   : > { %4118 = vmatmul.mubr.f32.gmra.mrb[174].mxu1 %v3775_v40  ;;  %v3871_v40 = vpop.permute.xlu1 %3870 }
 0x90b   : > { %4122 = vmatprep.mubr.f32.mxu1 %v3778_v3 }
 0x90e   : > { %4123 = vmatmul.mubr.f32.gmra.mrb[176].mxu1 %v3777_v27  ;;  %v3876_v27 = vpop.permute.xlu0 %3875 }
 0x90f   : > { %4127 = vmatprep.mubr.f32.mxu1 %v3780_v57 }
 0x912   : > { %4128 = vmatmul.mubr.f32.gmra.mrb[178].mxu1 %v3779_v61 }
 0x913   : > { %4132 = vmatprep.mubr.f32.mxu1 %v3782_v34 }
 0x916   : > { %4133 = vmatmul.mubr.f32.gmra.mrb[180].mxu1 %v3781_v48 }
 0x917   : > { %4137 = vmatprep.mubr.f32.mxu1 %v3784_v42 }
 0x91a   : > { %4138 = vmatmul.mubr.f32.gmra.mrb[182].mxu1 %v3783_v54 }
 0x91b   : > { %4142 = vmatprep.mubr.f32.mxu1 %v3786_v20 }
 0x91e   : > { %4143 = vmatmul.mubr.f32.gmra.mrb[184].mxu1 %v3785_v21 }
 0x91f   : > { %4147 = vmatprep.mubr.f32.mxu1 %v3788_v6  ;;  %v3881_v6 = vpop.permute.xlu1 %3880 }
 0x922   : > { %4148 = vmatmul.mubr.f32.gmra.mrb[186].mxu1 %v3787_v62 }
 0x923   : > { %4152 = vmatprep.mubr.f32.mxu1 %v3790_v46  ;;  %v3886_v46 = vpop.permute.xlu0 %3885 }
 0x926   : > { %4153 = vmatmul.mubr.f32.gmra.mrb[188].mxu1 %v3789_v18 }
 0x927   : > { %4157 = vmatprep.mubr.f32.mxu1 %v3792_v50 }
 0x92a   : > { %4158 = vmatmul.mubr.f32.gmra.mrb[190].mxu1 %v3791_v35 }
 0x92b   : > { %4162 = vmatprep.mubr.f32.mxu1 %v3794_v56 }
 0x92e   : > { %4163 = vmatmul.mubr.f32.gmra.mrb[192].mxu1 %v3793_v11 }
 0x92f   : > { %4167 = vmatprep.mubr.f32.mxu1 %v3796_v31 }
 0x932   : > { %4168 = vmatmul.mubr.f32.gmra.mrb[194].mxu1 %v3795_v8 }
 0x933   : > { %4172 = vmatprep.mubr.f32.mxu1 %v3798_v23 }
 0x936   : > { %4173 = vmatmul.mubr.f32.gmra.mrb[196].mxu1 %v3797_v19  ;;  %v3891_v19 = vpop.permute.xlu1 %3890 }
 0x937   : > { %4177 = vmatprep.mubr.f32.mxu1 %v3800_v43 }
 0x93a   : > { %4178 = vmatmul.mubr.f32.gmra.mrb[198].mxu1 %v3799_v60  ;;  %v3896_v60 = vpop.permute.xlu0 %3895 }
 0x93b   : > { %4182 = vmatprep.mubr.f32.mxu1 %v3802_v1 }
 0x93e   : > { %4183 = vmatmul.mubr.f32.gmra.mrb[200].mxu1 %v3801_v9 }
 0x93f   : > { %4187 = vmatprep.mubr.f32.mxu1 %v3804_v32 }
 0x942   : > { %4188 = vmatmul.mubr.f32.gmra.mrb[202].mxu1 %v3803_v30 }
 0x943   : > { %4192 = vmatprep.mubr.f32.mxu1 %v3806_v52 }
 0x946   : > { %4193 = vmatmul.mubr.f32.gmra.mrb[204].mxu1 %v3805_v41 }
 0x947   : > { %4197 = vmatprep.mubr.f32.mxu1 %v3808_v0 }
 0x94a   : > { %4198 = vmatmul.mubr.f32.gmra.mrb[206].mxu1 %v3807_v63 }
 0x94b   : > { %4202 = vmatprep.mubr.f32.mxu1 %v3810_v38  ;;  %v3901_v38 = vpop.permute.xlu1 %3900 }
 0x94e   : > { %4203 = vmatmul.mubr.f32.gmra.mrb[208].mxu1 %v3809_v37 }
 0x94f   : > { %4207 = vmatprep.mubr.f32.mxu1 %v3812_v39  ;;  %v3906_v39 = vpop.permute.xlu0 %3905 }
 0x952   : > { %4208 = vmatmul.mubr.f32.gmra.mrb[210].mxu1 %v3811_v58 }
 0x953   : > { %4212 = vmatprep.mubr.f32.mxu1 %v3814_v24 }
 0x956   : > { %4213 = vmatmul.mubr.f32.gmra.mrb[212].mxu1 %v3813_v29 }
 0x957   : > { %4217 = vmatprep.mubr.f32.mxu1 %v3816_v26 }
 0x95a   : > { %4218 = vmatmul.mubr.f32.gmra.mrb[214].mxu1 %v3815_v2 }
 0x95b   : > { %4222 = vmatprep.mubr.f32.mxu1 %v3818_v14 }
 0x95e   : > { %4223 = vmatmul.mubr.f32.gmra.mrb[216].mxu1 %v3817_v51 }
 0x95f   : > { %4227 = vmatprep.mubr.f32.mxu1 %v3820_v25 }
 0x962   : > { %4228 = vmatmul.mubr.f32.gmra.mrb[218].mxu1 %v3819_v22  ;;  %v3911_v22 = vpop.permute.xlu1 %3910 }
 0x963   : > { %4232 = vmatprep.mubr.f32.mxu1 %v3822_v5 }
 0x966   : > { %4233 = vmatmul.mubr.f32.gmra.mrb[220].mxu1 %v3821_v36  ;;  %v3916_v36 = vpop.permute.xlu0 %3915 }
 0x967   : > { %4237 = vmatprep.mubr.f32.mxu1 %v3824_v49 }
 0x96a   : > { %4238 = vmatmul.mubr.f32.gmra.mrb[222].mxu1 %v3823_v15 }
 0x9c1   : > { %v4084_v13 = vpop.f32.mrb[160].mxu1 }
 0x9c2   : > { %v4086_v59 = vpop.f32.mrb[161].mxu1  ;;  %v4085_v10 = vadd.f32 %v4084_v13, %v3861_v33 }
 0x9c4   : > { %v4243_v45 = vmax.f32 %v4085_v10, 0.0 }
 0x9c5   : > { %v4089_v17 = vpop.f32.mrb[162].mxu1 }
 0x9c6   : > { %v4090_v53 = vadd.f32 %v4089_v17, %v3866_v55  ;;  %v4091_v47 = vpop.f32.mrb[163].mxu1  ;;  %v3921_v17 = vpop.permute.xlu1 %3920 }
 0x9c7   : > { %v3926_v47 = vpop.permute.xlu0 %3925 }
 0x9c8   : > { %v4244_v4 = vmax.f32 %v4090_v53, 0.0 }
 0x9c9   : > { %v4094_v7 = vpop.f32.mrb[164].mxu1 }
 0x9ca   : > { %v5645_v16 = vpack.c.bf16 %v4244_v4, %v4243_v45  ;;  %v4096_v44 = vpop.f32.mrb[165].mxu1  ;;  %v4095_v3 = vadd.f32 %v4094_v7, %v3871_v40 }
 0x9cc   : > { %5646 = vmatpush1.bf16.msra.mxu0 %v5645_v16  ;;  %v4245_v48 = vmax.f32 %v4095_v3, 0.0 }
 0x9cd   : > { %v4099_v57 = vpop.f32.mrb[166].mxu1  ;;  %5647 = vmatprep.subr.bf16.mxu0 %v8359_v28 }
 0x9ce   : > { %v4100_v61 = vadd.f32 %v4099_v57, %v3876_v27  ;;  %v4101_v34 = vpop.f32.mrb[167].mxu1  ;;  %v3931_v57 = vpop.permute.xlu1 %3930 }
 0x9cf   : > { %v3936_v34 = vpop.permute.xlu0 %3935 }
 0x9d0   : > { %v4246_v42 = vmax.f32 %v4100_v61, 0.0 }
 0x9d1   : > { %v4104_v54 = vpop.f32.mrb[168].mxu1 }
 0x9d2   : > { %v5648_v20 = vpack.c.bf16 %v4246_v42, %v4245_v48  ;;  %v4106_v21 = vpop.f32.mrb[169].mxu1  ;;  %v4105_v62 = vadd.f32 %v4104_v54, %v3881_v6 }
 0x9d4   : > { %5649 = vmatpush1.bf16.msra.mxu0 %v5648_v20  ;;  %v4247_v56 = vmax.f32 %v4105_v62, 0.0 }
 0x9d5   : > { %v4109_v18 = vpop.f32.mrb[170].mxu1  ;;  %5650 = vmatprep.subr.bf16.mxu0 %v8359_v28 }
 0x9d6   : > { %v4110_v50 = vadd.f32 %v4109_v18, %v3886_v46  ;;  %v4111_v35 = vpop.f32.mrb[171].mxu1  ;;  %v3941_v18 = vpop.permute.xlu1 %3940 }
 0x9d7   : > { %v3946_v35 = vpop.permute.xlu0 %3945 }
 0x9d8   : > { %v4248_v11 = vmax.f32 %v4110_v50, 0.0 }
 0x9d9   : > { %v4114_v31 = vpop.f32.mrb[172].mxu1 }
 0x9da   : > { %v5651_v8 = vpack.c.bf16 %v4248_v11, %v4247_v56  ;;  %v4116_v23 = vpop.f32.mrb[173].mxu1  ;;  %v4115_v43 = vadd.f32 %v4114_v31, %v3891_v19 }
 0x9dc   : > { %5652 = vmatpush1.bf16.msra.mxu0 %v5651_v8  ;;  %v4249_v30 = vmax.f32 %v4115_v43, 0.0 }
 0x9dd   : > { %v4119_v1 = vpop.f32.mrb[174].mxu1  ;;  %5653 = vmatprep.subr.bf16.mxu0 %v8359_v28 }
 0x9de   : > { %v4120_v9 = vadd.f32 %v4119_v1, %v3896_v60  ;;  %v4121_v32 = vpop.f32.mrb[175].mxu1  ;;  %v3951_v1 = vpop.permute.xlu1 %3950 }
 0x9df   : > { %v3956_v32 = vpop.permute.xlu0 %3955 }
 0x9e0   : > { %v4250_v52 = vmax.f32 %v4120_v9, 0.0 }
 0x9e1   : > { %v4124_v41 = vpop.f32.mrb[176].mxu1 }
 0x9e2   : > { %v5654_v0 = vpack.c.bf16 %v4250_v52, %v4249_v30  ;;  %v4126_v63 = vpop.f32.mrb[177].mxu1  ;;  %v4125_v37 = vadd.f32 %v4124_v41, %v3901_v38 }
 0x9e4   : > { %5655 = vmatpush1.bf16.msra.mxu0 %v5654_v0  ;;  %v4251_v26 = vmax.f32 %v4125_v37, 0.0 }
 0x9e5   : > { %v4129_v58 = vpop.f32.mrb[178].mxu1  ;;  %5656 = vmatprep.subr.bf16.mxu0 %v8359_v28 }
 0x9e6   : > { %v4130_v24 = vadd.f32 %v4129_v58, %v3906_v39  ;;  %v4131_v29 = vpop.f32.mrb[179].mxu1  ;;  %v3961_v58 = vpop.permute.xlu1 %3960 }
 0x9e7   : > { %v3966_v29 = vpop.permute.xlu0 %3965 }
 0x9e8   : > { %v4252_v2 = vmax.f32 %v4130_v24, 0.0 }
 0x9e9   : > { %v4134_v14 = vpop.f32.mrb[180].mxu1 }
 0x9ea   : > { %v5657_v51 = vpack.c.bf16 %v4252_v2, %v4251_v26  ;;  %v4136_v25 = vpop.f32.mrb[181].mxu1  ;;  %v4135_v5 = vadd.f32 %v4134_v14, %v3911_v22 }
 0x9ec   : > { %5658 = vmatpush1.bf16.msra.mxu0 %v5657_v51  ;;  %v4253_v59 = vmax.f32 %v4135_v5, 0.0 }
 0x9ed   : > { %v4139_v49 = vpop.f32.mrb[182].mxu1  ;;  %5659 = vmatprep.subr.bf16.mxu0 %v8359_v28 }
 0x9ee   : > { %v4140_v15 = vadd.f32 %v4139_v49, %v3916_v36  ;;  %v4141_v13 = vpop.f32.mrb[183].mxu1  ;;  %v3971_v49 = vpop.permute.xlu1 %3970 }
 0x9ef   : > { %v3976_v13 = vpop.permute.xlu0 %3975 }
 0x9f0   : > { %v4254_v33 = vmax.f32 %v4140_v15, 0.0 }
 0x9f1   : > { %v4144_v10 = vpop.f32.mrb[184].mxu1 }
 0x9f2   : > { %v5660_v12 = vpack.c.bf16 %v4254_v33, %v4253_v59  ;;  %v4146_v55 = vpop.f32.mrb[185].mxu1  ;;  %v4145_v53 = vadd.f32 %v4144_v10, %v3921_v17 }
 0x9f4   : > { %5661 = vmatpush1.bf16.msra.mxu0 %v5660_v12  ;;  %v4255_v16 = vmax.f32 %v4145_v53, 0.0 }
 0x9f5   : > { %v4149_v45 = vpop.f32.mrb[186].mxu1  ;;  %5662 = vmatprep.subr.bf16.mxu0 %v8359_v28 }
 0x9f6   : > { %v4150_v4 = vadd.f32 %v4149_v45, %v3926_v47  ;;  %v4151_v7 = vpop.f32.mrb[187].mxu1  ;;  %v3981_v45 = vpop.permute.xlu1 %3980 }
 0x9f7   : > { %v3986_v7 = vpop.permute.xlu0 %3985 }
 0x9f8   : > { %v4256_v44 = vmax.f32 %v4150_v4, 0.0 }
 0x9f9   : > { %v4154_v40 = vpop.f32.mrb[188].mxu1 }
 0x9fa   : > { %v5663_v3 = vpack.c.bf16 %v4256_v44, %v4255_v16  ;;  %v4156_v27 = vpop.f32.mrb[189].mxu1  ;;  %v4155_v61 = vadd.f32 %v4154_v40, %v3931_v57 }
 0x9fc   : > { %5664 = vmatpush1.bf16.msra.mxu0 %v5663_v3  ;;  %v4257_v20 = vmax.f32 %v4155_v61, 0.0 }
 0x9fd   : > { %v4159_v48 = vpop.f32.mrb[190].mxu1  ;;  %5665 = vmatprep.subr.bf16.mxu0 %v8359_v28 }
 0x9fe   : > { %v4160_v42 = vadd.f32 %v4159_v48, %v3936_v34  ;;  %v4161_v54 = vpop.f32.mrb[191].mxu1  ;;  %v3991_v48 = vpop.permute.xlu1 %3990 }
 0x9ff   : > { %v3996_v54 = vpop.permute.xlu0 %3995 }
 0xa00   : > { %v4258_v21 = vmax.f32 %v4160_v42, 0.0 }
 0xa01   : > { %v4164_v6 = vpop.f32.mrb[192].mxu1 }
 0xa02   : > { %v5666_v62 = vpack.c.bf16 %v4258_v21, %v4257_v20  ;;  %v4166_v46 = vpop.f32.mrb[193].mxu1  ;;  %v4165_v50 = vadd.f32 %v4164_v6, %v3941_v18 }
 0xa04   : > { %5667 = vmatpush1.bf16.msra.mxu0 %v5666_v62  ;;  %v4259_v8 = vmax.f32 %v4165_v50, 0.0 }
 0xa05   : > { %v4169_v56 = vpop.f32.mrb[194].mxu1  ;;  %5668 = vmatprep.subr.bf16.mxu0 %v8359_v28 }
 0xa06   : > { %v4170_v11 = vadd.f32 %v4169_v56, %v3946_v35  ;;  %v4171_v31 = vpop.f32.mrb[195].mxu1  ;;  %v4001_v56 = vpop.permute.xlu1 %4000 }
 0xa07   : > { %v4006_v31 = vpop.permute.xlu0 %4005 }
 0xa08   : > { %v4260_v23 = vmax.f32 %v4170_v11, 0.0 }
 0xa09   : > { %v4174_v19 = vpop.f32.mrb[196].mxu1 }
 0xa0a   : > { %v5669_v43 = vpack.c.bf16 %v4260_v23, %v4259_v8  ;;  %v4176_v60 = vpop.f32.mrb[197].mxu1  ;;  %v4175_v9 = vadd.f32 %v4174_v19, %v3951_v1 }
 0xa0c   : > { %5670 = vmatpush1.bf16.msra.mxu0 %v5669_v43  ;;  %v4261_v0 = vmax.f32 %v4175_v9, 0.0 }
 0xa0d   : > { %v4179_v30 = vpop.f32.mrb[198].mxu1  ;;  %5671 = vmatprep.subr.bf16.mxu0 %v8359_v28 }
 0xa0e   : > { %v4180_v52 = vadd.f32 %v4179_v30, %v3956_v32  ;;  %v4181_v41 = vpop.f32.mrb[199].mxu1  ;;  %v4011_v30 = vpop.permute.xlu1 %4010 }
 0xa0f   : > { %v4016_v41 = vpop.permute.xlu0 %4015 }
 0xa10   : > { %v4262_v63 = vmax.f32 %v4180_v52, 0.0 }
 0xa11   : > { %v4184_v38 = vpop.f32.mrb[200].mxu1 }
 0xa12   : > { %v5672_v37 = vpack.c.bf16 %v4262_v63, %v4261_v0  ;;  %v4186_v39 = vpop.f32.mrb[201].mxu1  ;;  %v4185_v24 = vadd.f32 %v4184_v38, %v3961_v58 }
 0xa14   : > { %5673 = vmatpush1.bf16.msra.mxu0 %v5672_v37  ;;  %v4263_v51 = vmax.f32 %v4185_v24, 0.0  ;;  %v4276_v24 = vld [vmem:[#allocation6 + $0xc00] sm:$0xff] }
 0xa15   : > { %v4189_v26 = vpop.f32.mrb[202].mxu1  ;;  %5674 = vmatprep.subr.bf16.mxu0 %v8359_v28 }
 0xa16   : > { %v4190_v2 = vadd.f32 %v4189_v26, %v3966_v29  ;;  %v4191_v14 = vpop.f32.mrb[203].mxu1  ;;  %v4279_v29 = vld [vmem:[#allocation6 + $0xc18] sm:$0xff]  ;;  %v4278_v26 = vld [vmem:[#allocation6 + $0xc10] sm:$0xff] }
 0xa17   : > { %v4280_v14 = vld [vmem:[#allocation6 + $0xc20] sm:$0xff] }
 0xa18   : > { %v4264_v25 = vmax.f32 %v4190_v2, 0.0  ;;  %v4281_v2 = vld [vmem:[#allocation6 + $0xc28] sm:$0xff] }
 0xa19   : > { %v4194_v22 = vpop.f32.mrb[204].mxu1 }
 0xa1a   : > { %v5675_v5 = vpack.c.bf16 %v4264_v25, %v4263_v51  ;;  %v4196_v36 = vpop.f32.mrb[205].mxu1  ;;  %v4195_v15 = vadd.f32 %v4194_v22, %v3971_v49  ;;  %v4283_v51 = vld [vmem:[#allocation6 + $0xc38] sm:$0xff]  ;;  %v4282_v25 = vld [vmem:[#allocation6 + $0xc30] sm:$0xff]  ;;  %v4284_v22 = vld [vmem:[#allocation6 + $0xc40] sm:$0xff] }
 0xa1b   : > { %v4286_v36 = vld [vmem:[#allocation6 + $0xc50] sm:$0xff]  ;;  %v4289_v49 = vld [vmem:[#allocation6 + $0xc68] sm:$0xff] }
 0xa1c   : > { %5676 = vmatpush1.bf16.msra.mxu0 %v5675_v5  ;;  %v4265_v12 = vmax.f32 %v4195_v15, 0.0  ;;  %v4287_v5 = vld [vmem:[#allocation6 + $0xc58] sm:$0xff]  ;;  %v4288_v15 = vld [vmem:[#allocation6 + $0xc60] sm:$0xff] }
 0xa1d   : > { %v4199_v59 = vpop.f32.mrb[206].mxu1  ;;  %5677 = vmatprep.subr.bf16.mxu0 %v8359_v28 }
 0xa1e   : > { %v4200_v33 = vadd.f32 %v4199_v59, %v3976_v13  ;;  %v4201_v10 = vpop.f32.mrb[207].mxu1  ;;  %v4291_v13 = vld [vmem:[#allocation6 + $0xc78] sm:$0xff]  ;;  %v4290_v59 = vld [vmem:[#allocation6 + $0xc70] sm:$0xff] }
 0xa1f   : > { %v4292_v10 = vld [vmem:[#allocation6 + $0xc80] sm:$0xff] }
 0xa20   : > { %v4266_v55 = vmax.f32 %v4200_v33, 0.0  ;;  %v4293_v33 = vld [vmem:[#allocation6 + $0xc88] sm:$0xff] }
 0xa21   : > { %v4204_v17 = vpop.f32.mrb[208].mxu1 }
 0xa22   : > { %v5678_v53 = vpack.c.bf16 %v4266_v55, %v4265_v12  ;;  %v4206_v47 = vpop.f32.mrb[209].mxu1  ;;  %v4205_v4 = vadd.f32 %v4204_v17, %v3981_v45  ;;  %v4295_v12 = vld [vmem:[#allocation6 + $0xc98] sm:$0xff]  ;;  %v4294_v55 = vld [vmem:[#allocation6 + $0xc90] sm:$0xff]  ;;  %v4297_v17 = vld [vmem:[#allocation6 + $0xca8] sm:$0xff] }
 0xa23   : > { %v4299_v47 = vld [vmem:[#allocation6 + $0xcb8] sm:$0xff]  ;;  %v4298_v45 = vld [vmem:[#allocation6 + $0xcb0] sm:$0xff] }
 0xa24   : > { %5679 = vmatpush1.bf16.msra.mxu0 %v5678_v53  ;;  %v4267_v3 = vmax.f32 %v4205_v4, 0.0  ;;  %v4296_v53 = vld [vmem:[#allocation6 + $0xca0] sm:$0xff]  ;;  %v4301_v4 = vld [vmem:[#allocation6 + $0xcc8] sm:$0xff] }
 0xa25   : > { %v4209_v16 = vpop.f32.mrb[210].mxu1  ;;  %5680 = vmatprep.subr.bf16.mxu0 %v8359_v28 }
 0xa26   : > { %v4210_v44 = vadd.f32 %v4209_v16, %v3986_v7  ;;  %v4211_v40 = vpop.f32.mrb[211].mxu1  ;;  %v4300_v7 = vld [vmem:[#allocation6 + $0xcc0] sm:$0xff]  ;;  %v4303_v16 = vld [vmem:[#allocation6 + $0xcd8] sm:$0xff] }
 0xa27   : > { %v4305_v40 = vld [vmem:[#allocation6 + $0xce8] sm:$0xff] }
 0xa28   : > { %v4268_v27 = vmax.f32 %v4210_v44, 0.0  ;;  %v4302_v44 = vld [vmem:[#allocation6 + $0xcd0] sm:$0xff] }
 0xa29   : > { %v4214_v57 = vpop.f32.mrb[212].mxu1 }
 0xa2a   : > { %v5681_v61 = vpack.c.bf16 %v4268_v27, %v4267_v3  ;;  %v4216_v34 = vpop.f32.mrb[213].mxu1  ;;  %v4215_v42 = vadd.f32 %v4214_v57, %v3991_v48  ;;  %v4304_v3 = vld [vmem:[#allocation6 + $0xce0] sm:$0xff]  ;;  %v4307_v27 = vld [vmem:[#allocation6 + $0xcf8] sm:$0xff]  ;;  %v4306_v57 = vld [vmem:[#allocation6 + $0xcf0] sm:$0xff] }
 0xa2b   : > { %v4308_v34 = vld [vmem:[#allocation6 + $0xd00] sm:$0xff]  ;;  %v4311_v48 = vld [vmem:[#allocation6 + $0xd18] sm:$0xff] }
 0xa2c   : > { %5682 = vmatpush1.bf16.msra.mxu0 %v5681_v61  ;;  %v4269_v62 = vmax.f32 %v4215_v42, 0.0  ;;  %v4309_v61 = vld [vmem:[#allocation6 + $0xd08] sm:$0xff]  ;;  %v4310_v42 = vld [vmem:[#allocation6 + $0xd10] sm:$0xff] }
 0xa2d   : > { %v4219_v20 = vpop.f32.mrb[214].mxu1  ;;  %5683 = vmatprep.subr.bf16.mxu0 %v8359_v28 }
 0xa2e   : > { %v4220_v21 = vadd.f32 %v4219_v20, %v3996_v54  ;;  %v4221_v6 = vpop.f32.mrb[215].mxu1  ;;  %v4313_v54 = vld [vmem:[#allocation6 + $0xd28] sm:$0xff]  ;;  %v4312_v20 = vld [vmem:[#allocation6 + $0xd20] sm:$0xff] }
 0xa2f   : > { %v4314_v6 = vld [vmem:[#allocation6 + $0xd30] sm:$0xff] }
 0xa30   : > { %v4270_v46 = vmax.f32 %v4220_v21, 0.0  ;;  %v4315_v21 = vld [vmem:[#allocation6 + $0xd38] sm:$0xff] }
 0xa31   : > { %v4224_v18 = vpop.f32.mrb[216].mxu1 }
 0xa32   : > { %v5684_v50 = vpack.c.bf16 %v4270_v46, %v4269_v62  ;;  %v4226_v35 = vpop.f32.mrb[217].mxu1  ;;  %v4225_v11 = vadd.f32 %v4224_v18, %v4001_v56  ;;  %v4317_v62 = vld [vmem:[#allocation6 + $0xd48] sm:$0xff]  ;;  %v4316_v46 = vld [vmem:[#allocation6 + $0xd40] sm:$0xff]  ;;  %v4319_v18 = vld [vmem:[#allocation6 + $0xd58] sm:$0xff] }
 0xa33   : > { %v4321_v35 = vld [vmem:[#allocation6 + $0xd68] sm:$0xff]  ;;  %v4320_v56 = vld [vmem:[#allocation6 + $0xd60] sm:$0xff] }
 0xa34   : > { %5685 = vmatpush1.bf16.msra.mxu0 %v5684_v50  ;;  %v4271_v43 = vmax.f32 %v4225_v11, 0.0  ;;  %v4318_v50 = vld [vmem:[#allocation6 + $0xd50] sm:$0xff]  ;;  %v4323_v11 = vld [vmem:[#allocation6 + $0xd78] sm:$0xff] }
 0xa35   : > { %v4229_v8 = vpop.f32.mrb[218].mxu1  ;;  %5686 = vmatprep.subr.bf16.mxu0 %v8359_v28 }
 0xa36   : > { %v4230_v23 = vadd.f32 %v4229_v8, %v4006_v31  ;;  %v4231_v19 = vpop.f32.mrb[219].mxu1  ;;  %v4322_v31 = vld [vmem:[#allocation6 + $0xd70] sm:$0xff]  ;;  %v4325_v8 = vld [vmem:[#allocation6 + $0xd88] sm:$0xff] }
 0xa37   : > { %v4327_v19 = vld [vmem:[#allocation6 + $0xd98] sm:$0xff] }
 0xa38   : > { %v4272_v60 = vmax.f32 %v4230_v23, 0.0  ;;  %v4324_v23 = vld [vmem:[#allocation6 + $0xd80] sm:$0xff] }
 0xa39   : > { %v4234_v1 = vpop.f32.mrb[220].mxu1 }
 0xa3a   : > { %v5687_v9 = vpack.c.bf16 %v4272_v60, %v4271_v43  ;;  %v4236_v32 = vpop.f32.mrb[221].mxu1  ;;  %v4235_v52 = vadd.f32 %v4234_v1, %v4011_v30  ;;  %v4326_v43 = vld [vmem:[#allocation6 + $0xd90] sm:$0xff]  ;;  %v4329_v60 = vld [vmem:[#allocation6 + $0xda8] sm:$0xff]  ;;  %v4328_v1 = vld [vmem:[#allocation6 + $0xda0] sm:$0xff] }
 0xa3b   : > { %v4330_v32 = vld [vmem:[#allocation6 + $0xdb0] sm:$0xff]  ;;  %v4333_v30 = vld [vmem:[#allocation6 + $0xdc8] sm:$0xff] }
 0xa3c   : > { %5688 = vmatpush1.bf16.msra.mxu0 %v5687_v9  ;;  %v4273_v37 = vmax.f32 %v4235_v52, 0.0  ;;  %v4331_v9 = vld [vmem:[#allocation6 + $0xdb8] sm:$0xff]  ;;  %v4332_v52 = vld [vmem:[#allocation6 + $0xdc0] sm:$0xff] }
 0xa3d   : > { %v4239_v0 = vpop.f32.mrb[222].mxu1  ;;  %5689 = vmatprep.subr.bf16.mxu0 %v8359_v28  ;;  %v4285_v28 = vld [vmem:[#allocation6 + $0xc48] sm:$0xff] }
 0xa3e   : > { %v4240_v63 = vadd.f32 %v4239_v0, %v4016_v41  ;;  %v4241_v38 = vpop.f32.mrb[223].mxu1  ;;  %v4335_v41 = vld [vmem:[#allocation6 + $0xdd8] sm:$0xff]  ;;  %v4334_v0 = vld [vmem:[#allocation6 + $0xdd0] sm:$0xff] }
 0xa3f   : > { %v4336_v38 = vld [vmem:[#allocation6 + $0xde0] sm:$0xff] }
 0xa40   : > { %v4274_v39 = vmax.f32 %v4240_v63, 0.0  ;;  %v4337_v63 = vld [vmem:[#allocation6 + $0xde8] sm:$0xff] }
 0xa42   : > { %v5690_v58 = vpack.c.bf16 %v4274_v39, %v4273_v37  ;;  %v4339_v37 = vld [vmem:[#allocation6 + $0xdf8] sm:$0xff]  ;;  %v4338_v39 = vld [vmem:[#allocation6 + $0xdf0] sm:$0xff] }
 0xa44   : > { %5691 = vmatpush1.bf16.msra.mxu0 %v5690_v58  ;;  %v4376_v58 = vpop.permute.xlu1 %4375 }
 0xa47   : > { %4598 = vmatmul.mubr.f32.vlgmr.msra.gmra.mrb[160].mxu0 %v4276_v24  ;;  %v4381_v24 = vpop.permute.xlu0 %4380 }
 0xa48   : > { %4602 = vmatprep.mubr.f32.mxu0 %v4279_v29  ;;  %v4386_v29 = vpop.permute.xlu1 %4385 }
 0xa4b   : > { %4603 = vmatmul.mubr.f32.gmra.mrb[162].mxu0 %v4278_v26  ;;  %v4391_v26 = vpop.permute.xlu0 %4390 }
 0xa4c   : > { %4607 = vmatprep.mubr.f32.mxu0 %v4281_v2  ;;  %v4396_v2 = vpop.permute.xlu1 %4395 }
 0xa4f   : > { %4608 = vmatmul.mubr.f32.gmra.mrb[164].mxu0 %v4280_v14  ;;  %v4401_v14 = vpop.permute.xlu0 %4400 }
 0xa50   : > { %4612 = vmatprep.mubr.f32.mxu0 %v4283_v51  ;;  %v8197_v51 = vpop.permute.xlu1 %4405 }
 0xa53   : > { %4613 = vmatmul.mubr.f32.gmra.mrb[166].mxu0 %v4282_v25  ;;  %v8199_v25 = vpop.permute.xlu0 %4410 }
 0xa54   : > { %4617 = vmatprep.mubr.f32.mxu0 %v4285_v28  ;;  %v8201_v28 = vpop.permute.xlu1 %4415 }
 0xa57   : > { %4618 = vmatmul.mubr.f32.gmra.mrb[168].mxu0 %v4284_v22  ;;  %v8203_v22 = vpop.permute.xlu0 %4420 }
 0xa58   : > { %4622 = vmatprep.mubr.f32.mxu0 %v4287_v5  ;;  %v8205_v5 = vpop.permute.xlu1 %4425 }
 0xa5b   : > { %4623 = vmatmul.mubr.f32.gmra.mrb[170].mxu0 %v4286_v36  ;;  %v8207_v36 = vpop.permute.xlu0 %4430 }
 0xa5c   : > { %4627 = vmatprep.mubr.f32.mxu0 %v4289_v49  ;;  %v8209_v49 = vpop.permute.xlu1 %4435 }
 0xa5f   : > { %4628 = vmatmul.mubr.f32.gmra.mrb[172].mxu0 %v4288_v15  ;;  %v8211_v15 = vpop.permute.xlu0 %4440 }
 0xa60   : > { %4632 = vmatprep.mubr.f32.mxu0 %v4291_v13  ;;  %v8213_v13 = vpop.permute.xlu1 %4445 }
 0xa63   : > { %4633 = vmatmul.mubr.f32.gmra.mrb[174].mxu0 %v4290_v59  ;;  %v8215_v59 = vpop.permute.xlu0 %4450 }
 0xa64   : > { %4637 = vmatprep.mubr.f32.mxu0 %v4293_v33  ;;  %v8217_v33 = vpop.permute.xlu1 %4455 }
 0xa67   : > { %4638 = vmatmul.mubr.f32.gmra.mrb[176].mxu0 %v4292_v10  ;;  %v8219_v10 = vpop.permute.xlu0 %4460 }
 0xa68   : > { %4642 = vmatprep.mubr.f32.mxu0 %v4295_v12  ;;  %v8221_v12 = vpop.permute.xlu1 %4465 }
 0xa6b   : > { %4643 = vmatmul.mubr.f32.gmra.mrb[178].mxu0 %v4294_v55  ;;  %v8223_v55 = vpop.permute.xlu0 %4470 }
 0xa6c   : > { %4647 = vmatprep.mubr.f32.mxu0 %v4297_v17  ;;  %v8225_v17 = vpop.permute.xlu1 %4475 }
 0xa6f   : > { %4648 = vmatmul.mubr.f32.gmra.mrb[180].mxu0 %v4296_v53  ;;  %v8227_v53 = vpop.permute.xlu0 %4480 }
 0xa70   : > { %4652 = vmatprep.mubr.f32.mxu0 %v4299_v47  ;;  %v8229_v47 = vpop.permute.xlu1 %4485 }
 0xa73   : > { %4653 = vmatmul.mubr.f32.gmra.mrb[182].mxu0 %v4298_v45  ;;  %v8231_v45 = vpop.permute.xlu0 %4490 }
 0xa74   : > { %4657 = vmatprep.mubr.f32.mxu0 %v4301_v4  ;;  %v8233_v4 = vpop.permute.xlu1 %4495 }
 0xa77   : > { %4658 = vmatmul.mubr.f32.gmra.mrb[184].mxu0 %v4300_v7  ;;  %v8235_v7 = vpop.permute.xlu0 %4500 }
 0xa78   : > { %4662 = vmatprep.mubr.f32.mxu0 %v4303_v16  ;;  %v8237_v16 = vpop.permute.xlu1 %4505 }
 0xa7b   : > { %4663 = vmatmul.mubr.f32.gmra.mrb[186].mxu0 %v4302_v44  ;;  %v8239_v44 = vpop.permute.xlu0 %4510 }
 0xa7c   : > { %4667 = vmatprep.mubr.f32.mxu0 %v4305_v40 }
 0xa7f   : > { %4668 = vmatmul.mubr.f32.gmra.mrb[188].mxu0 %v4304_v3 }
 0xa80   : > { %4672 = vmatprep.mubr.f32.mxu0 %v4307_v27 }
 0xa83   : > { %4673 = vmatmul.mubr.f32.gmra.mrb[190].mxu0 %v4306_v57  ;;  %v8241_v57 = vpop.permute.xlu1 %4515 }
 0xa84   : > { %4677 = vmatprep.mubr.f32.mxu0 %v4309_v61 }
 0xa87   : > { %4678 = vmatmul.mubr.f32.gmra.mrb[192].mxu0 %v4308_v34 }
 0xa88   : > { %4682 = vmatprep.mubr.f32.mxu0 %v4311_v48 }
 0xa8b   : > { %4683 = vmatmul.mubr.f32.gmra.mrb[194].mxu0 %v4310_v42 }
 0xa8c   : > { %4687 = vmatprep.mubr.f32.mxu0 %v4313_v54  ;;  %v4825_v54 = vpop.permute.xlu0 %4824 }
 0xa8f   : > { %4688 = vmatmul.mubr.f32.gmra.mrb[196].mxu0 %v4312_v20 }
 0xa90   : > { %4692 = vmatprep.mubr.f32.mxu0 %v4315_v21  ;;  %v4830_v21 = vpop.permute.xlu1 %4829 }
 0xa93   : > { %4693 = vmatmul.mubr.f32.gmra.mrb[198].mxu0 %v4314_v6 }
 0xa94   : > { %4697 = vmatprep.mubr.f32.mxu0 %v4317_v62 }
 0xa97   : > { %4698 = vmatmul.mubr.f32.gmra.mrb[200].mxu0 %v4316_v46 }
 0xa98   : > { %4702 = vmatprep.mubr.f32.mxu0 %v4319_v18 }
 0xa9b   : > { %4703 = vmatmul.mubr.f32.gmra.mrb[202].mxu0 %v4318_v50 }
 0xa9c   : > { %4707 = vmatprep.mubr.f32.mxu0 %v4321_v35 }
 0xa9f   : > { %4708 = vmatmul.mubr.f32.gmra.mrb[204].mxu0 %v4320_v56 }
 0xaa0   : > { %4712 = vmatprep.mubr.f32.mxu0 %v4323_v11  ;;  %v4835_v11 = vpop.permute.xlu0 %4834 }
 0xaa3   : > { %4713 = vmatmul.mubr.f32.gmra.mrb[206].mxu0 %v4322_v31 }
 0xaa4   : > { %4717 = vmatprep.mubr.f32.mxu0 %v4325_v8 }
 0xaa7   : > { %4718 = vmatmul.mubr.f32.gmra.mrb[208].mxu0 %v4324_v23 }
 0xaa8   : > { %4722 = vmatprep.mubr.f32.mxu0 %v4327_v19 }
 0xaab   : > { %4723 = vmatmul.mubr.f32.gmra.mrb[210].mxu0 %v4326_v43 }
 0xaac   : > { %4727 = vmatprep.mubr.f32.mxu0 %v4329_v60 }
 0xaaf   : > { %4728 = vmatmul.mubr.f32.gmra.mrb[212].mxu0 %v4328_v1  ;;  %v4840_v1 = vpop.permute.xlu1 %4839 }
 0xab0   : > { %4732 = vmatprep.mubr.f32.mxu0 %v4331_v9 }
 0xab3   : > { %4733 = vmatmul.mubr.f32.gmra.mrb[214].mxu0 %v4330_v32 }
 0xab4   : > { %4737 = vmatprep.mubr.f32.mxu0 %v4333_v30 }
 0xab7   : > { %4738 = vmatmul.mubr.f32.gmra.mrb[216].mxu0 %v4332_v52 }
 0xab8   : > { %4742 = vmatprep.mubr.f32.mxu0 %v4335_v41 }
 0xabb   : > { %4743 = vmatmul.mubr.f32.gmra.mrb[218].mxu0 %v4334_v0 }
 0xabc   : > { %4747 = vmatprep.mubr.f32.mxu0 %v4337_v63  ;;  %v4845_v63 = vpop.permute.xlu0 %4844 }
 0xabf   : > { %4748 = vmatmul.mubr.f32.gmra.mrb[220].mxu0 %v4336_v38 }
 0xac0   : > { %4752 = vmatprep.mubr.f32.mxu0 %v4339_v37 }
 0xac3   : > { %4753 = vmatmul.mubr.f32.gmra.mrb[222].mxu0 %v4338_v39 }
 0xb1a   : > { %v4599_v40 = vpop.f32.mrb[160].mxu0 }
 0xb1b   : > { %v4600_v3 = vadd.f32 %v4599_v40, %v4376_v58  ;;  %v4601_v27 = vpop.f32.mrb[161].mxu0  ;;  %v4850_v40 = vpop.permute.xlu1 %4849 }
 0xb1d   : > { %v4758_v34 = vmax.f32 %v4600_v3, 0.0 }
 0xb1e   : > { %v4604_v61 = vpop.f32.mrb[162].mxu0 }
 0xb1f   : > { %v4605_v48 = vadd.f32 %v4604_v61, %v4381_v24  ;;  %v4606_v42 = vpop.f32.mrb[163].mxu0  ;;  %v4982_v62 = vmul.f32 %v4825_v54, %v4758_v34 }
 0xb20   : > { %v4855_v42 = vpop.permute.xlu0 %4854 }
 0xb21   : > { %v4759_v20 = vmax.f32 %v4605_v48, 0.0 }
 0xb22   : > { %v4609_v6 = vpop.f32.mrb[164].mxu0 }
 0xb23   : > { %v4983_v46 = vmul.f32 %v4830_v21, %v4759_v20  ;;  %v4610_v18 = vadd.f32 %v4609_v6, %v4386_v29  ;;  %v4611_v50 = vpop.f32.mrb[165].mxu0 }
 0xb25   : > { %v5014_v35 = vadd.f32 %v4983_v46, %v4982_v62  ;;  %v4760_v56 = vmax.f32 %v4610_v18, 0.0 }
 0xb26   : > { %v4614_v31 = vpop.f32.mrb[166].mxu0 }
 0xb27   : > { %v4984_v8 = vmul.f32 %v4835_v11, %v4760_v56  ;;  %v4615_v23 = vadd.f32 %v4614_v31, %v4391_v26  ;;  %v4616_v19 = vpop.f32.mrb[167].mxu0 }
 0xb29   : > { %v5015_v43 = vadd.f32 %v5014_v35, %v4984_v8  ;;  %v4761_v60 = vmax.f32 %v4615_v23, 0.0 }
 0xb2a   : > { %v4619_v9 = vpop.f32.mrb[168].mxu0 }
 0xb2b   : > { %v4985_v32 = vmul.f32 %v4840_v1, %v4761_v60  ;;  %v4620_v30 = vadd.f32 %v4619_v9, %v4396_v2  ;;  %v4621_v52 = vpop.f32.mrb[169].mxu0 }
 0xb2d   : > { %v5016_v41 = vadd.f32 %v5015_v43, %v4985_v32  ;;  %v4762_v0 = vmax.f32 %v4620_v30, 0.0 }
 0xb2e   : > { %v4624_v38 = vpop.f32.mrb[170].mxu0 }
 0xb2f   : > { %v4986_v37 = vmul.f32 %v4845_v63, %v4762_v0  ;;  %v4625_v39 = vadd.f32 %v4624_v38, %v4401_v14  ;;  %v4626_v58 = vpop.f32.mrb[171].mxu0  ;;  %v4860_v14 = vpop.permute.xlu1 %4859 }
 0xb31   : > { %v5017_v24 = vadd.f32 %v5016_v41, %v4986_v37  ;;  %v4763_v29 = vmax.f32 %v4625_v39, 0.0 }
 0xb32   : > { %v4629_v3 = vpop.f32.mrb[172].mxu0 }
 0xb33   : > { %v4987_v26 = vmul.f32 %v4850_v40, %v4763_v29  ;;  %v4630_v27 = vadd.f32 %v4629_v3, %v8197_v51  ;;  %v4631_v61 = vpop.f32.mrb[173].mxu0  ;;  %v4865_v51 = vpop.permute.xlu0 %4864 }
 0xb35   : > { %v5018_v34 = vadd.f32 %v5017_v24, %v4987_v26  ;;  %v4764_v48 = vmax.f32 %v4630_v27, 0.0 }
 0xb36   : > { %v4634_v2 = vpop.f32.mrb[174].mxu0 }
 0xb37   : > { %v4988_v54 = vmul.f32 %v4855_v42, %v4764_v48  ;;  %v4635_v20 = vadd.f32 %v4634_v2, %v8199_v25  ;;  %v4636_v21 = vpop.f32.mrb[175].mxu0  ;;  %v4870_v25 = vpop.permute.xlu1 %4869 }
 0xb39   : > { %v5019_v6 = vadd.f32 %v5018_v34, %v4988_v54  ;;  %v4765_v62 = vmax.f32 %v4635_v20, 0.0 }
 0xb3a   : > { %v4639_v46 = vpop.f32.mrb[176].mxu0 }
 0xb3b   : > { %v4989_v18 = vmul.f32 %v4860_v14, %v4765_v62  ;;  %v4640_v50 = vadd.f32 %v4639_v46, %v8201_v28  ;;  %v4641_v35 = vpop.f32.mrb[177].mxu0  ;;  %v4875_v28 = vpop.permute.xlu0 %4874 }
 0xb3d   : > { %v5020_v56 = vadd.f32 %v5019_v6, %v4989_v18  ;;  %v4766_v11 = vmax.f32 %v4640_v50, 0.0 }
 0xb3e   : > { %v4644_v31 = vpop.f32.mrb[178].mxu0 }
 0xb3f   : > { %v4990_v8 = vmul.f32 %v4865_v51, %v4766_v11  ;;  %v4645_v23 = vadd.f32 %v4644_v31, %v8203_v22  ;;  %v4646_v19 = vpop.f32.mrb[179].mxu0  ;;  %v4880_v22 = vpop.permute.xlu1 %4879 }
 0xb41   : > { %v5021_v43 = vadd.f32 %v5020_v56, %v4990_v8  ;;  %v4767_v60 = vmax.f32 %v4645_v23, 0.0 }
 0xb42   : > { %v4649_v1 = vpop.f32.mrb[180].mxu0 }
 0xb43   : > { %v4991_v9 = vmul.f32 %v4870_v25, %v4767_v60  ;;  %v4650_v32 = vadd.f32 %v4649_v1, %v8205_v5  ;;  %v4651_v30 = vpop.f32.mrb[181].mxu0  ;;  %v4885_v5 = vpop.permute.xlu0 %4884 }
 0xb45   : > { %v5022_v52 = vadd.f32 %v5021_v43, %v4991_v9  ;;  %v4768_v41 = vmax.f32 %v4650_v32, 0.0 }
 0xb46   : > { %v4654_v0 = vpop.f32.mrb[182].mxu0 }
 0xb47   : > { %v4992_v63 = vmul.f32 %v4875_v28, %v4768_v41  ;;  %v4655_v38 = vadd.f32 %v4654_v0, %v8207_v36  ;;  %v4656_v37 = vpop.f32.mrb[183].mxu0  ;;  %v4890_v36 = vpop.permute.xlu1 %4889 }
 0xb49   : > { %v5023_v39 = vadd.f32 %v5022_v52, %v4992_v63  ;;  %v4769_v58 = vmax.f32 %v4655_v38, 0.0 }
 0xb4a   : > { %v4659_v24 = vpop.f32.mrb[184].mxu0 }
 0xb4b   : > { %v4993_v29 = vmul.f32 %v4880_v22, %v4769_v58  ;;  %v4660_v40 = vadd.f32 %v4659_v24, %v8209_v49  ;;  %v4661_v3 = vpop.f32.mrb[185].mxu0  ;;  %v4895_v49 = vpop.permute.xlu0 %4894 }
 0xb4d   : > { %v5024_v26 = vadd.f32 %v5023_v39, %v4993_v29  ;;  %v4770_v27 = vmax.f32 %v4660_v40, 0.0 }
 0xb4e   : > { %v4664_v61 = vpop.f32.mrb[186].mxu0 }
 0xb4f   : > { %v4994_v34 = vmul.f32 %v4885_v5, %v4770_v27  ;;  %v4665_v48 = vadd.f32 %v4664_v61, %v8211_v15  ;;  %v4666_v42 = vpop.f32.mrb[187].mxu0  ;;  %v4900_v15 = vpop.permute.xlu1 %4899 }
 0xb51   : > { %v5025_v2 = vadd.f32 %v5024_v26, %v4994_v34  ;;  %v4771_v54 = vmax.f32 %v4665_v48, 0.0 }
 0xb52   : > { %v4669_v20 = vpop.f32.mrb[188].mxu0 }
 0xb53   : > { %v4995_v21 = vmul.f32 %v4890_v36, %v4771_v54  ;;  %v4670_v6 = vadd.f32 %v4669_v20, %v8213_v13  ;;  %v4671_v62 = vpop.f32.mrb[189].mxu0  ;;  %v4905_v13 = vpop.permute.xlu0 %4904 }
 0xb55   : > { %v5026_v14 = vadd.f32 %v5025_v2, %v4995_v21  ;;  %v4772_v46 = vmax.f32 %v4670_v6, 0.0 }
 0xb56   : > { %v4674_v18 = vpop.f32.mrb[190].mxu0 }
 0xb57   : > { %v4996_v50 = vmul.f32 %v4895_v49, %v4772_v46  ;;  %v4675_v35 = vadd.f32 %v4674_v18, %v8215_v59  ;;  %v4676_v56 = vpop.f32.mrb[191].mxu0  ;;  %v4910_v59 = vpop.permute.xlu1 %4909 }
 0xb59   : > { %v5027_v11 = vadd.f32 %v5026_v14, %v4996_v50  ;;  %v4773_v51 = vmax.f32 %v4675_v35, 0.0 }
 0xb5a   : > { %v4679_v31 = vpop.f32.mrb[192].mxu0 }
 0xb5b   : > { %v4997_v8 = vmul.f32 %v4900_v15, %v4773_v51  ;;  %v4680_v23 = vadd.f32 %v4679_v31, %v8217_v33  ;;  %v4681_v19 = vpop.f32.mrb[193].mxu0  ;;  %v4915_v33 = vpop.permute.xlu0 %4914 }
 0xb5d   : > { %v5028_v43 = vadd.f32 %v5027_v11, %v4997_v8  ;;  %v4774_v60 = vmax.f32 %v4680_v23, 0.0 }
 0xb5e   : > { %v4684_v25 = vpop.f32.mrb[194].mxu0 }
 0xb5f   : > { %v4998_v1 = vmul.f32 %v4905_v13, %v4774_v60  ;;  %v4685_v9 = vadd.f32 %v4684_v25, %v8219_v10  ;;  %v4686_v32 = vpop.f32.mrb[195].mxu0  ;;  %v4920_v10 = vpop.permute.xlu1 %4919 }
 0xb61   : > { %v5029_v30 = vadd.f32 %v5028_v43, %v4998_v1  ;;  %v4775_v52 = vmax.f32 %v4685_v9, 0.0 }
 0xb62   : > { %v4689_v41 = vpop.f32.mrb[196].mxu0 }
 0xb63   : > { %v4999_v28 = vmul.f32 %v4910_v59, %v4775_v52  ;;  %v4690_v0 = vadd.f32 %v4689_v41, %v8221_v12  ;;  %v4691_v63 = vpop.f32.mrb[197].mxu0  ;;  %v4925_v12 = vpop.permute.xlu0 %4924 }
 0xb65   : > { %v5030_v38 = vadd.f32 %v5029_v30, %v4999_v28  ;;  %v4776_v37 = vmax.f32 %v4690_v0, 0.0 }
 0xb66   : > { %v4694_v39 = vpop.f32.mrb[198].mxu0 }
 0xb67   : > { %v5000_v58 = vmul.f32 %v4915_v33, %v4776_v37  ;;  %v4695_v22 = vadd.f32 %v4694_v39, %v8223_v55  ;;  %v4696_v24 = vpop.f32.mrb[199].mxu0  ;;  %v4930_v55 = vpop.permute.xlu1 %4929 }
 0xb68   : > { %v4935_v46 = vpop.permute.xlu0 %4934 }
 0xb69   : > { %v5031_v29 = vadd.f32 %v5030_v38, %v5000_v58  ;;  %v4777_v40 = vmax.f32 %v4695_v22, 0.0 }
 0xb6a   : > { %v4699_v3 = vpop.f32.mrb[200].mxu0 }
 0xb6b   : > { %v5001_v26 = vmul.f32 %v4920_v10, %v4777_v40  ;;  %v4700_v27 = vadd.f32 %v4699_v3, %v8225_v17  ;;  %v4701_v5 = vpop.f32.mrb[201].mxu0  ;;  %v4940_v11 = vpop.permute.xlu1 %4939 }
 0xb6c   : > { %v4945_v15 = vpop.permute.xlu0 %4944 }
 0xb6d   : > { %v5032_v61 = vadd.f32 %v5031_v29, %v5001_v26  ;;  %v4778_v34 = vmax.f32 %v4700_v27, 0.0 }
 0xb6e   : > { %v4704_v48 = vpop.f32.mrb[202].mxu0 }
 0xb6f   : > { %v5002_v42 = vmul.f32 %v4925_v12, %v4778_v34  ;;  %v4705_v2 = vadd.f32 %v4704_v48, %v8227_v53  ;;  %v4706_v54 = vpop.f32.mrb[203].mxu0  ;;  %v4950_v60 = vpop.permute.xlu1 %4949 }
 0xb70   : > { %v4955_v32 = vpop.permute.xlu0 %4954 }
 0xb71   : > { %v5033_v36 = vadd.f32 %v5032_v61, %v5002_v42  ;;  %v4779_v20 = vmax.f32 %v4705_v2, 0.0 }
 0xb72   : > { %v4709_v21 = vpop.f32.mrb[204].mxu0 }
 0xb73   : > { %v5003_v6 = vmul.f32 %v4930_v55, %v4779_v20  ;;  %v4710_v62 = vadd.f32 %v4709_v21, %v8229_v47  ;;  %v4711_v14 = vpop.f32.mrb[205].mxu0  ;;  %v4521_v0 = vpop.permute.xlu1 %4520 }
 0xb74   : > { %v4960_v38 = vpop.permute.xlu0 %4959 }
 0xb75   : > { %v5034_v49 = vadd.f32 %v5033_v36, %v5003_v6  ;;  %v4780_v17 = vmax.f32 %v4710_v62, 0.0 }
 0xb76   : > { %v4714_v18 = vpop.f32.mrb[206].mxu0 }
 0xb77   : > { %v5004_v50 = vmul.f32 %v4935_v46, %v4780_v17  ;;  %v4715_v35 = vadd.f32 %v4714_v18, %v8231_v45  ;;  %v4716_v56 = vpop.f32.mrb[207].mxu0  ;;  %v4526_v24 = vpop.permute.xlu1 %4525 }
 0xb78   : > { %v4965_v26 = vpop.permute.xlu0 %4964 }
 0xb79   : > { %v5035_v51 = vadd.f32 %v5034_v49, %v5004_v50  ;;  %v4781_v53 = vmax.f32 %v4715_v35, 0.0 }
 0xb7a   : > { %v4719_v31 = vpop.f32.mrb[208].mxu0 }
 0xb7b   : > { %v5005_v8 = vmul.f32 %v4940_v11, %v4781_v53  ;;  %v4720_v23 = vadd.f32 %v4719_v31, %v8233_v4  ;;  %v4721_v19 = vpop.f32.mrb[209].mxu0  ;;  %v4531_v48 = vpop.permute.xlu1 %4530 }
 0xb7d   : > { %v5036_v43 = vadd.f32 %v5035_v51, %v5005_v8  ;;  %v4782_v47 = vmax.f32 %v4720_v23, 0.0  ;;  %v8519_v23 = vld [vmem:[#allocation12_spill] sm:$0xff] }
 0xb7e   : > { %v4724_v13 = vpop.f32.mrb[210].mxu0  ;;  %v8520_v19 = vsub.s32 0, %v8519_v23 }
 0xb7f   : > { %v5006_v25 = vmul.f32 %v4945_v15, %v4782_v47  ;;  %v4725_v1 = vadd.f32 %v4724_v13, %v8235_v7  ;;  %v4726_v9 = vpop.f32.mrb[211].mxu0  ;;  %v4975_v62 = vpop.permute.xlu1 %4974 }
 0xb81   : > { %v5037_v45 = vadd.f32 %v5036_v43, %v5006_v25  ;;  %v4783_v30 = vmax.f32 %v4725_v1, 0.0 }
 0xb82   : > { %v4729_v52 = vpop.f32.mrb[212].mxu0 }
 0xb83   : > { %v5007_v59 = vmul.f32 %v4950_v60, %v4783_v30  ;;  %v4730_v41 = vadd.f32 %v4729_v52, %v8237_v16  ;;  %v4731_v28 = vpop.f32.mrb[213].mxu0  ;;  %v5055_v31 = vpop.permute.xlu1 %5054 }
 0xb84   : > { %v5060_v43 = vrot.slane %v5055_v31, %v8520_v19 }
 0xb85   : > { %v5038_v63 = vadd.f32 %v5037_v45, %v5007_v59  ;;  %v4784_v4 = vmax.f32 %v4730_v41, 0.0 }
 0xb86   : > { %v4734_v37 = vpop.f32.mrb[214].mxu0 }
 0xb87   : > { %v5008_v33 = vmul.f32 %v4955_v32, %v4784_v4  ;;  %v4735_v39 = vadd.f32 %v4734_v37, %v8239_v44  ;;  %v4736_v58 = vpop.f32.mrb[215].mxu0  ;;  %v4970_v44 = vpop.permute.xlu0 %4969 }
 0xb89   : > { %v5039_v22 = vadd.f32 %v5038_v63, %v5008_v33  ;;  %v4785_v7 = vmax.f32 %v4735_v39, 0.0 }
 0xb8a   : > { %v4739_v29 = vpop.f32.mrb[216].mxu0 }
 0xb8b   : > { %v5009_v40 = vmul.f32 %v4960_v38, %v4785_v7  ;;  %v4740_v10 = vadd.f32 %v4739_v29, %v8241_v57  ;;  %v4741_v3 = vpop.f32.mrb[217].mxu0  ;;  %v4980_v50 = vpop.permute.xlu0 %4979 }
 0xb8d   : > { %v5040_v16 = vadd.f32 %v5039_v22, %v5009_v40  ;;  %v4786_v27 = vmax.f32 %v4740_v10, 0.0 }
 0xb8e   : > { %v4744_v5 = vpop.f32.mrb[218].mxu0 }
 0xb8f   : > { %v5010_v61 = vmul.f32 %v4965_v26, %v4786_v27  ;;  %v4745_v34 = vadd.f32 %v4744_v5, %v4521_v0  ;;  %v4746_v12 = vpop.f32.mrb[219].mxu0 }
 0xb91   : > { %v5041_v42 = vadd.f32 %v5040_v16, %v5010_v61  ;;  %v4787_v2 = vmax.f32 %v4745_v34, 0.0 }
 0xb92   : > { %v4749_v54 = vpop.f32.mrb[220].mxu0 }
 0xb93   : > { %v5011_v36 = vmul.f32 %v4970_v44, %v4787_v2  ;;  %v4750_v20 = vadd.f32 %v4749_v54, %v4526_v24  ;;  %v4751_v55 = vpop.f32.mrb[221].mxu0 }
 0xb95   : > { %v5042_v21 = vadd.f32 %v5041_v42, %v5011_v36  ;;  %v4788_v6 = vmax.f32 %v4750_v20, 0.0 }
 0xb96   : > { %v4754_v57 = vpop.f32.mrb[222].mxu0 }
 0xb97   : > { %v5012_v14 = vmul.f32 %v4975_v62, %v4788_v6  ;;  %v4755_v46 = vadd.f32 %v4754_v57, %v4531_v48  ;;  %v4756_v49 = vpop.f32.mrb[223].mxu0 }
 0xb99   : > { %v5043_v17 = vadd.f32 %v5042_v21, %v5012_v14  ;;  %v4789_v18 = vmax.f32 %v4755_v46, 0.0 }
 0xb9b   : > { %v5013_v35 = vmul.f32 %v4980_v50, %v4789_v18 }
 0xb9d   : > { %v5044_v56 = vadd.f32 %v5043_v17, %v5013_v35 }
 0xb9f   : > { %v5045_v11 = vrot.slane %v5044_v56, 4 }
 0xba1   : > { %v5046_v51 = vadd.f32 %v5045_v11, %v5044_v56 }
 0xba3   : > { %v5047_v53 = vrot.slane %v5046_v51, 2 }
 0xba5   : > { %v5048_v15 = vadd.f32 %v5047_v53, %v5046_v51 }
 0xba7   : > { %v5049_v8 = vrot.slane %v5048_v15, 1 }
 0xba9   : > { %v5050_v47 = vadd.f32 %v5049_v8, %v5048_v15 }
 0xbab   : > { %v5061_v60 = vadd.f32 %v5060_v43, %v5050_v47 }
 0xbad   : > { %5062 = vst [vmem:[%s309_s13] sm:$0x1] %v5061_v60 }
 0xbae   : > { %5910 = shalt.err (!%p5907_p7)
}
 0xbaf   : > { %s5911_s30 = scalar_lea.hbm %s8273_s12, 16  ;;  %s5915_s15 = scalar_lea.hbm %s8324_s7, 32 }
 0xbb0   : > { %p5912_p9 = scmp.ne.s32.totalorder %s8273_s12, %s5911_s30  ;;  %p5916_p0 = scmp.lt.u32.totalorder %s8273_s12, %s8324_s7 }
 0xbb1   : > { %p5917_p11 = scmp.lt.u32.totalorder %s5915_s15, %s5911_s30  ;;  %p5919_p4 = scmp.lt.u32.totalorder %s5911_s30, %s8273_s12 }
 0xbb2   : > { %p5913_p2 = pnand %p5912_p9, %p6112_p12 }
 0xbb3   : > { %p5918_p1 = por %p5917_p11, %p5916_p0 }
 0xbb4   : > { %p5914_p5 = pneg %p5913_p2 }
 0xbb5   : > { %p5920_p6 = por %p5919_p4, %p5918_p1 }
 0xbb7   : > { %p5921_p8 = pnand %p5920_p6, %p5914_p5 }
 0xbb9   : > { %5924 = shalt.err (!%p5921_p8)
}
 0xbba   : > { %5730 = dma.vmem_to_hbm [thread:$0]  (%p6112_p12), %s8275_s20, 16, %s8273_s12, %s5064_s11  }
 0xbbb PF: > { %s5088_s13 = sand.u32 1, %s5955_s26   ;;  %p8521_p10 = scmp.ne.s32.totalorder %s8333_s9, 0 }
 0xbbc   : > { %p8522_p13 = scmp.ge.s32.totalorder %s5967_s29, 2  ;;  %s5089_s23 = scalar_lea.sflag [#allocation5], %s5088_s13 }
 0xbbe   : > { %p5741_p3 = pnand %p8522_p13, %p8521_p10 }
 0xbc0   : > { %5950 = dma.done.wait (!%p5741_p3), %s5089_s23, 16  }
 0xbc1   : > { %5952 = vsyncadd (!%p5741_p3), %s5089_s23, 4294967280  ;;  %p23_p7 = scmp.ge.s32.totalorder %s6077_s14, 4   ;;  %s8523_s26 = smov %s5959_s27 }
 0xbc2   : > { %s8524_s27 = smov %s5963_s28  ;;  %s8525_s28 = smov %s6108_s18 }
 0xbc3   : > { %s8526_s29 = smov %s6077_s14  ;;  %25 = sbr.rel (!%p23_p7) target bundleno = 9 (0x9), region = 109 }
 0xbca   :  { %5093 = vsyncpa [#allocation4], 1 }
 0xbcb   :  { %5095 = vsyncpa [#allocation4 + $0x1], 1 }
 0xbcc   :  { %5096 = vsyncpa [#allocation7], 1 }
 0xbcd   :  { %5097 = vsyncpa [#allocation5], 1 }
 0xbce   :  { %5099 = vsyncpa [#allocation5 + $0x1], 1 }

</bundles_post_ra>
